<compile_context>
chip_gen: v7x
topology: tpu7x:2x2x1
jax: 0.10.0
libtpu: 0.0.40
codegen_flags: <defaults>
</compile_context>

<pallas_src>
import math

import jax
import jax.numpy as jnp
import numpy as np
from jax.experimental import pallas as pl
from jax.experimental.pallas import tpu as pltpu


# ------------------------------ fused kernel -------------------------------

def _detect_head_kernel(patches_ref, shift_ref, avg_ref,
                        w_stem_ref, w_s2_ref, wbn_ref, w_big_ref, bias_ref,
                        o_ref):
    f32 = jnp.float32

    def dotf(a, b):
        return jnp.dot(a, b, preferred_element_type=f32)

    def silu(v):
        return v * jax.nn.sigmoid(v)

    m = avg_ref.shape[1]             # N * 4 * 4 rows of the 4x4 feature maps
    lanes = w_s2_ref.shape[2]        # 128 = [cls(64) | reg(64)] branch width
    half = lanes // 2
    n_bn = wbn_ref.shape[0] // 10    # bottlenecks per CSP layer
    n_out = o_ref.shape[1]           # 6 = obj(2) + reg(2) + cls(2)
    B = bias_ref[...]                # packed folded-BN bias table, load once

    # Shifted-row read on the flattened (n, ho, wo) layout.  The precomputed
    # 0/1 shift matrix both moves rows by (dy, dx) on the 4x4 grid and zeroes
    # out-of-bounds (conv zero-padding) rows, so the whole tap stays on MXU.
    def tap(x, dy, dx):
        if dy == 0 and dx == 0:
            return x
        return dotf(shift_ref[(dy + 1) * 3 + (dx + 1)], x)

    # ---- Focus stem conv (3x3, s=1): one GEMM on pre-built im2col rows ----
    stem = silu(dotf(patches_ref[...], w_stem_ref[...])
                + B[0:1, :w_stem_ref.shape[1]])

    # ---- cls_convs0 + reg_convs0 (3x3, s=2) fused -> 128-lane output ------
    # stem rows are parity-grouped (ph, pw, n, ho, wo): each of the 9 taps is
    # one parity plane shifted by (qh, qw) in {-1, 0} on the 4x4 output grid.
    acc = jnp.zeros((m, lanes), f32)
    for kh in range(3):
        qh, ph = (-1, 1) if kh == 0 else (0, kh - 1)
        for kw in range(3):
            qw, pw = (-1, 1) if kw == 0 else (0, kw - 1)
            plane = stem[(ph * 2 + pw) * m:(ph * 2 + pw + 1) * m, :]
            acc = acc + dotf(tap(plane, qh, qw), w_s2_ref[kh * 3 + kw])
    cr0 = silu(acc + B[1:2, :])            # (m, 128) = [cls_feat | reg_feat]

    # ---- CSP conv1 + conv2 of both branches: ONE block-structured GEMM ----
    # output lanes: [cls_x1 | reg_x1 | cls_x2 | reg_x2]
    x12 = silu(dotf(cr0, w_big_ref[0]) + B[2:3, :])
    x1, x2 = x12[:, :half], x12[:, half:]

    # ---- bottlenecks (1x1 -> 3x3 -> +residual), cls & reg in lockstep -----
    for i in range(n_bn):
        y = silu(dotf(x1, wbn_ref[10 * i]) + B[5 + 2 * i:6 + 2 * i, :half])
        acc = jnp.zeros_like(x1)
        for t in range(9):
            acc = acc + dotf(tap(y, t // 3 - 1, t % 3 - 1),
                             wbn_ref[10 * i + 1 + t])
        x1 = silu(acc + B[6 + 2 * i:7 + 2 * i, :half]) + x1

    # ---- CSP conv3 on torch.cat([x1, x2], ch) as ONE GEMM -----------------
    feat = silu(dotf(jnp.concatenate([x1, x2], axis=-1), w_big_ref[1])
                + B[3:4, :])                  # (m, 128) = [cls_feat | reg_feat]

    # ---- heads: AdaptiveAvgPool2d(1) as MXU contraction + merged preds ----
    pooled = dotf(avg_ref[...], feat)                          # (N, 128)
    logits = (dotf(pooled, w_big_ref[2]) + B[4:5, :])[:, :n_out]
    col = jax.lax.broadcasted_iota(jnp.int32, logits.shape, 1)
    # cols [0:2]=obj.sigmoid, [2:4]=reg.sigmoid, [4:6]=cls.tanh (torch.cat order)
    o_ref[...] = jnp.where(col < 4, jax.nn.sigmoid(logits), jnp.tanh(logits))


# ----------------------------- pallas_call glue -----------------------------

def _full_spec(shape):
    nd = len(shape)
    # whole-array block (satisfies the (8,128) rule since block == array dims)
    return pl.BlockSpec(shape, lambda i, _nd=nd: (0,) * _nd)


def _shift_matrices(n_batch, hw):
    """S[(dy+1)*3+(dx+1)] is a 0/1 matrix so that (S @ x) at flattened row
    (n, ho, wo) equals x at (n, ho+dy, wo+dx), and 0 where that is out of
    bounds (i.e. the conv's zero padding)."""
    m = n_batch * hw * hw
    mats = np.zeros((9, m, m), np.float32)
    for dy in (-1, 0, 1):
        for dx in (-1, 0, 1):
            t = (dy + 1) * 3 + (dx + 1)
            for n in range(n_batch):
                for ho in range(hw):
                    for wo in range(hw):
                        hi, wi = ho + dy, wo + dx
                        if 0 <= hi < hw and 0 <= wi < hw:
                            mats[t, (n * hw + ho) * hw + wo,
                                 (n * hw + hi) * hw + wi] = 1.0
    return mats


def _avg_matrix(n_batch, hw):
    m = n_batch * hw * hw
    a = np.zeros((n_batch, m), np.float32)
    for n in range(n_batch):
        a[n, n * hw * hw:(n + 1) * hw * hw] = 1.0 / float(hw * hw)
    return a


def detect_head_forward(params, x_nchw):
    x = jnp.transpose(x_nchw, (0, 2, 3, 1)).astype(jnp.float32)   # NCHW -> NHWC
    nb = x.shape[0]

    # Focus space-to-depth (torch order: top_left, bot_left, top_right, bot_right)
    f = jnp.concatenate([x[:, ::2, ::2, :], x[:, 1::2, ::2, :],
                         x[:, ::2, 1::2, :], x[:, 1::2, 1::2, :]], axis=-1)
    _, fh, fw, fc = f.shape                       # (N, 8, 8, 12)

    # im2col for the stem 3x3 conv on the network input only (pure layout);
    # rows are regrouped by output-pixel parity (ph, pw, n, ho, wo) so the
    # fused kernel can read each parity plane of the stem output as a
    # contiguous row block for the in-kernel stride-2 convs.
    fp = jnp.pad(f, ((0, 0), (1, 1), (1, 1), (0, 0)))
    cols = [fp[:, kh:kh + fh, kw:kw + fw, :] for kh in range(3) for kw in range(3)]
    patches = jnp.concatenate(cols, axis=-1)      # (N, fh, fw, 9*fc)
    hw = fh // 2                                  # spatial size after stride-2
    p = patches.reshape(nb, hw, 2, hw, 2, 9 * fc)
    p = jnp.transpose(p, (2, 4, 0, 1, 3, 5)).reshape(4 * nb * hw * hw, 9 * fc)

    shift = jnp.asarray(_shift_matrices(nb, hw))  # (9, N*16, N*16) constants
    avg = jnp.asarray(_avg_matrix(nb, hw))        # (N,   N*16)    constants

    args = (p, shift, avg,
            params["w_stem"], params["w_s2"],
            params["wbn"], params["w_big"], params["bias"])

    out = pl.pallas_call(
        _detect_head_kernel,
        out_shape=jax.ShapeDtypeStruct((nb, 6), jnp.float32),
        grid=(1,),
        in_specs=[_full_spec(a.shape) for a in args],
        out_specs=_full_spec((nb, 6)),
        compiler_params=pltpu.CompilerParams(dimension_semantics=("arbitrary",)),
    )(*args)
    return out.reshape(nb, 6, 1, 1)   # matches torch output (N, 6, 1, 1)


# ----------------------- deterministic parameter init -----------------------

def _make_baseconv_params(key, cin, cout, ksize, eps=1e-5):
    k1, k2, k3 = jax.random.split(key, 3)
    w = jax.random.normal(k1, (ksize, ksize, cin, cout), jnp.float32)
    w = w * (1.0 / math.sqrt(ksize * ksize * cin))
    gamma = 1.0 + 0.05 * jax.random.normal(k2, (cout,), jnp.float32)
    beta = 0.05 * jax.random.normal(k3, (cout,), jnp.float32)
    mean = jnp.zeros((cout,), jnp.float32)
    var = jnp.ones((cout,), jnp.float32)
    scale = gamma / jnp.sqrt(var + eps)                 # fold eval-mode BatchNorm
    wf = (w * scale).reshape(ksize * ksize * cin, cout)
    bf = (beta - mean * scale).reshape(1, cout)
    return {"w": wf, "b": bf}


def _make_csp_params(key, cin, cout, n_bottleneck):
    hidden = int(cout * 0.5)
    keys = jax.random.split(key, 3 + 2 * n_bottleneck)
    p = {
        "conv1": _make_baseconv_params(keys[0], cin, hidden, 1),
        "conv2": _make_baseconv_params(keys[1], cin, hidden, 1),
        "conv3": _make_baseconv_params(keys[2], 2 * hidden, cout, 1),
        "m": [],
    }
    for i in range(n_bottleneck):
        p["m"].append({
            "conv1": _make_baseconv_params(keys[3 + 2 * i], hidden, hidden, 1),
            "conv2": _make_baseconv_params(keys[4 + 2 * i], hidden, hidden, 3),
        })
    return p


def _pack_fused_params(raw):
    """Pack per-layer folded-BN weights into the few branch-concatenated /
    block-diagonal buffers consumed by the single fused kernel."""
    f32 = jnp.float32
    c1 = raw["stem"]["w"].shape[1]        # base channels (32)
    c2 = 2 * c1                           # branch feature width (64)
    hid = c1                              # CSP hidden width (32)
    lanes = 2 * c2                        # fused [cls | reg] width (128)

    fused = {"w_stem": raw["stem"]["w"]}

    # stride-2 convs share the stem output -> concat outputs => 128 lanes.
    wc0 = raw["cls_convs0"]["w"].reshape(9, c1, c2)
    wr0 = raw["reg_convs0"]["w"].reshape(9, c1, c2)
    fused["w_s2"] = jnp.concatenate([wc0, wr0], axis=-1)             # (9, 32, 128)

    # w_big[0]: CSP conv1 + conv2 of both branches in one (128,128) GEMM.
    # output lanes: [cls_x1 | reg_x1 | cls_x2 | reg_x2]
    w12 = jnp.zeros((lanes, lanes), f32)
    w12 = w12.at[:c2, 0 * hid:1 * hid].set(raw["cls_csp"]["conv1"]["w"])
    w12 = w12.at[c2:, 1 * hid:2 * hid].set(raw["reg_csp"]["conv1"]["w"])
    w12 = w12.at[:c2, 2 * hid:3 * hid].set(raw["cls_csp"]["conv2"]["w"])
    w12 = w12.at[c2:, 3 * hid:4 * hid].set(raw["reg_csp"]["conv2"]["w"])

    # w_big[1]: CSP conv3 on cat([x1, x2]) lanes [cls_x1|reg_x1|cls_x2|reg_x2].
    w3c = raw["cls_csp"]["conv3"]["w"]   # (2*hid, c2), rows = [x1 ; x2]
    w3r = raw["reg_csp"]["conv3"]["w"]
    w3 = jnp.zeros((lanes, lanes), f32)
    w3 = w3.at[0 * hid:1 * hid, :c2].set(w3c[:hid])
    w3 = w3.at[1 * hid:2 * hid, c2:].set(w3r[:hid])
    w3 = w3.at[2 * hid:3 * hid, :c2].set(w3c[hid:])
    w3 = w3.at[3 * hid:4 * hid, c2:].set(w3r[hid:])

    # w_big[2]: merged pred heads (obj/reg consume reg_feat, cls consumes
    # cls_feat), output cols [obj(2) | reg(2) | cls(2)], zero-padded to 128.
    wh = jnp.zeros((lanes, lanes), f32)
    wh = wh.at[c2:, 0:2].set(raw["obj_pred_w"])
    wh = wh.at[c2:, 2:4].set(raw["reg_pred_w"])
    wh = wh.at[:c2, 4:6].set(raw["cls_pred_w"])
    fused["w_big"] = jnp.stack([w12, w3, wh])                        # (3, 128, 128)

    # bottlenecks: [1x1 | 9 x 3x3-tap] weights, block-diagonal over [cls|reg],
    # all stacked into one buffer: index 10*i is the 1x1, 10*i+1+t is tap t.
    wbn = []
    for bn_cls, bn_reg in zip(raw["cls_csp"]["m"], raw["reg_csp"]["m"]):
        w1 = jnp.zeros((2 * hid, 2 * hid), f32)
        w1 = w1.at[:hid, :hid].set(bn_cls["conv1"]["w"])
        w1 = w1.at[hid:, hid:].set(bn_reg["conv1"]["w"])
        wbn.append(w1)
        w2c = bn_cls["conv2"]["w"].reshape(9, hid, hid)
        w2r = bn_reg["conv2"]["w"].reshape(9, hid, hid)
        for t in range(9):
            w2 = jnp.zeros((2 * hid, 2 * hid), f32)
            w2 = w2.at[:hid, :hid].set(w2c[t])
            w2 = w2.at[hid:, hid:].set(w2r[t])
            wbn.append(w2)
    fused["wbn"] = jnp.stack(wbn)                                    # (10*n_bn, 64, 64)

    # all folded-BN biases in one packed (5 + 2*n_bn, 128) operand:
    # row 0 stem, 1 stride-2, 2 conv1+conv2, 3 conv3, 4 heads, 5+2i / 6+2i bn_i.
    def put(rowvec):
        return jnp.pad(rowvec, ((0, 0), (0, lanes - rowvec.shape[1])))
    rows = [
        put(raw["stem"]["b"]),
        put(jnp.concatenate([raw["cls_convs0"]["b"], raw["reg_convs0"]["b"]], -1)),
        put(jnp.concatenate([raw["cls_csp"]["conv1"]["b"], raw["reg_csp"]["conv1"]["b"],
                             raw["cls_csp"]["conv2"]["b"], raw["reg_csp"]["conv2"]["b"]], -1)),
        put(jnp.concatenate([raw["cls_csp"]["conv3"]["b"], raw["reg_csp"]["conv3"]["b"]], -1)),
        put(jnp.concatenate([raw["obj_pred_b"], raw["reg_pred_b"], raw["cls_pred_b"]], -1)),
    ]
    for bn_cls, bn_reg in zip(raw["cls_csp"]["m"], raw["reg_csp"]["m"]):
        rows.append(put(jnp.concatenate([bn_cls["conv1"]["b"], bn_reg["conv1"]["b"]], -1)))
        rows.append(put(jnp.concatenate([bn_cls["conv2"]["b"], bn_reg["conv2"]["b"]], -1)))
    fused["bias"] = jnp.concatenate(rows, axis=0)                    # (5+2*n_bn, 128)
    return fused


def make_detect_head_params(key, num_classes=4, depth=1.0, width=1.0):
    del num_classes  # forward() hard-codes 2 output channels per prediction head
    base_channels = int(width * 32)
    base_depth = max(round(depth * 3), 1)
    keys = jax.random.split(key, 8)
    raw = {
        "stem": _make_baseconv_params(keys[0], 4 * 3, base_channels, 3),   # Focus conv
        "cls_convs0": _make_baseconv_params(keys[1], base_channels, base_channels * 2, 3),
        "cls_csp": _make_csp_params(keys[2], base_channels * 2, base_channels * 2, base_depth),
        "reg_convs0": _make_baseconv_params(keys[3], base_channels, base_channels * 2, 3),
        "reg_csp": _make_csp_params(keys[4], base_channels * 2, base_channels * 2, base_depth),
    }
    for name, k in (("cls_pred", keys[5]), ("reg_pred", keys[6]), ("obj_pred", keys[7])):
        kw_, kb_ = jax.random.split(k)
        raw[name + "_w"] = jax.random.normal(kw_, (base_channels * 2, 2), jnp.float32) * (
            1.0 / math.sqrt(base_channels * 2))
        raw[name + "_b"] = 0.05 * jax.random.normal(kb_, (1, 2), jnp.float32)
    return _pack_fused_params(raw)


# ----------------------------------- main -----------------------------------

if __name__ == "__main__":
    key = jax.random.PRNGKey(0)
    pkey, xkey = jax.random.split(key)
    params = make_detect_head_params(pkey, num_classes=4, depth=1.0, width=1.0)

    # NCHW input exactly like the torch module: (batch=2, 3 channels, 16x16)
    x = jax.random.normal(xkey, (2, 3, 16, 16), jnp.float32)

    out = jax.jit(detect_head_forward)(params, x)
    out = jax.block_until_ready(out)
    assert out.shape == (2, 6, 1, 1) and out.dtype == jnp.float32
    assert bool(jnp.all(jnp.isfinite(out)))
    print("KERNEL_OK")
</pallas_src>

<mosaic_0001>
module attributes {stable_mosaic.version = 11 : i64} {
  func.func @_detect_head_kernel(%arg0: i32, %arg1: memref<128x108xf32, #tpu.memory_space<vmem>>, %arg2: memref<9x32x32xf32, #tpu.memory_space<vmem>>, %arg3: memref<2x32xf32, #tpu.memory_space<vmem>>, %arg4: memref<108x32xf32, #tpu.memory_space<vmem>>, %arg5: memref<9x32x128xf32, #tpu.memory_space<vmem>>, %arg6: memref<30x64x64xf32, #tpu.memory_space<vmem>>, %arg7: memref<3x128x128xf32, #tpu.memory_space<vmem>>, %arg8: memref<11x128xf32, #tpu.memory_space<vmem>>, %arg9: memref<2x6xf32, #tpu.memory_space<vmem>>) attributes {dimension_semantics = [#tpu.dimension_semantics<arbitrary>], iteration_bounds = array<i64: 1>, scalar_prefetch = 0 : i64, scratch_operands = 0 : i64, tpu.core_type = #tpu.core_type<tc>, window_params = [{pipeline_mode = #tpu.pipeline_mode<synchronous>, transform_indices = @transform_0, window_bounds = array<i64: 128, 108>}, {pipeline_mode = #tpu.pipeline_mode<synchronous>, transform_indices = @transform_1, window_bounds = array<i64: 9, 32, 32>}, {pipeline_mode = #tpu.pipeline_mode<synchronous>, transform_indices = @transform_2, window_bounds = array<i64: 2, 32>}, {pipeline_mode = #tpu.pipeline_mode<synchronous>, transform_indices = @transform_3, window_bounds = array<i64: 108, 32>}, {pipeline_mode = #tpu.pipeline_mode<synchronous>, transform_indices = @transform_4, window_bounds = array<i64: 9, 32, 128>}, {pipeline_mode = #tpu.pipeline_mode<synchronous>, transform_indices = @transform_5, window_bounds = array<i64: 30, 64, 64>}, {pipeline_mode = #tpu.pipeline_mode<synchronous>, transform_indices = @transform_6, window_bounds = array<i64: 3, 128, 128>}, {pipeline_mode = #tpu.pipeline_mode<synchronous>, transform_indices = @transform_7, window_bounds = array<i64: 11, 128>}, {pipeline_mode = #tpu.pipeline_mode<synchronous>, transform_indices = @transform_8, window_bounds = array<i64: 2, 6>}]} {
    %c0 = arith.constant 0 : index
    %c0_0 = arith.constant 0 : index
    %0 = vector.load %arg8[%c0, %c0_0] : memref<11x128xf32, #tpu.memory_space<vmem>>, vector<11x128xf32>
    %c0_1 = arith.constant 0 : index
    %c0_2 = arith.constant 0 : index
    %1 = vector.load %arg1[%c0_1, %c0_2] : memref<128x108xf32, #tpu.memory_space<vmem>>, vector<128x108xf32>
    %c0_3 = arith.constant 0 : index
    %c0_4 = arith.constant 0 : index
    %2 = vector.load %arg4[%c0_3, %c0_4] : memref<108x32xf32, #tpu.memory_space<vmem>>, vector<108x32xf32>
    %cst = arith.constant dense<0.000000e+00> : vector<128x32xf32>
    %3 = tpu.matmul %1, %2, %cst {dimension_numbers = #tpu.dot_dimension_numbers<[1], [0], [0], [1], [0, 0, 1, 1], [], []>} : vector<128x108xf32>, vector<108x32xf32>, vector<128x32xf32> -> vector<128x32xf32>
    %4 = vector.extract_strided_slice %0 {offsets = [0, 0], sizes = [1, 32], strides = [1, 1]} : vector<11x128xf32> to vector<1x32xf32>
    %5 = vector.broadcast %4 : vector<1x32xf32> to vector<128x32xf32>
    %6 = arith.addf %3, %5 : vector<128x32xf32>
    %7 = arith.negf %6 : vector<128x32xf32>
    %8 = math.exp %7 : vector<128x32xf32>
    %cst_5 = arith.constant 1.000000e+00 : f32
    %9 = vector.broadcast %cst_5 : f32 to vector<128x32xf32>
    %10 = arith.addf %9, %8 : vector<128x32xf32>
    %11 = arith.divf %9, %10 : vector<128x32xf32>
    %12 = arith.mulf %6, %11 : vector<128x32xf32>
    %cst_6 = arith.constant 0.000000e+00 : f32
    %13 = vector.broadcast %cst_6 : f32 to vector<32x128xf32>
    %14 = vector.extract_strided_slice %12 {offsets = [96, 0], sizes = [32, 32], strides = [1, 1]} : vector<128x32xf32> to vector<32x32xf32>
    %c0_7 = arith.constant 0 : index
    %c0_8 = arith.constant 0 : index
    %c0_9 = arith.constant 0 : index
    %15 = vector.load %arg2[%c0_7, %c0_8, %c0_9] : memref<9x32x32xf32, #tpu.memory_space<vmem>>, vector<1x32x32xf32>
    %16 = vector.shape_cast %15 : vector<1x32x32xf32> to vector<32x32xf32>
    %cst_10 = arith.constant dense<0.000000e+00> : vector<32x32xf32>
    %17 = tpu.matmul %16, %14, %cst_10 {dimension_numbers = #tpu.dot_dimension_numbers<[1], [0], [0], [1], [0, 0, 1, 1], [], []>} : vector<32x32xf32>, vector<32x32xf32>, vector<32x32xf32> -> vector<32x32xf32>
    %c0_11 = arith.constant 0 : index
    %c0_12 = arith.constant 0 : index
    %c0_13 = arith.constant 0 : index
    %18 = vector.load %arg5[%c0_11, %c0_12, %c0_13] : memref<9x32x128xf32, #tpu.memory_space<vmem>>, vector<1x32x128xf32>
    %19 = vector.shape_cast %18 : vector<1x32x128xf32> to vector<32x128xf32>
    %cst_14 = arith.constant dense<0.000000e+00> : vector<32x128xf32>
    %20 = tpu.matmul %17, %19, %cst_14 {dimension_numbers = #tpu.dot_dimension_numbers<[1], [0], [0], [1], [0, 0, 1, 1], [], []>} : vector<32x32xf32>, vector<32x128xf32>, vector<32x128xf32> -> vector<32x128xf32>
    %21 = arith.addf %13, %20 : vector<32x128xf32>
    %22 = vector.extract_strided_slice %12 {offsets = [64, 0], sizes = [32, 32], strides = [1, 1]} : vector<128x32xf32> to vector<32x32xf32>
    %c1 = arith.constant 1 : index
    %c0_15 = arith.constant 0 : index
    %c0_16 = arith.constant 0 : index
    %23 = vector.load %arg2[%c1, %c0_15, %c0_16] : memref<9x32x32xf32, #tpu.memory_space<vmem>>, vector<1x32x32xf32>
    %24 = vector.shape_cast %23 : vector<1x32x32xf32> to vector<32x32xf32>
    %cst_17 = arith.constant dense<0.000000e+00> : vector<32x32xf32>
    %25 = tpu.matmul %24, %22, %cst_17 {dimension_numbers = #tpu.dot_dimension_numbers<[1], [0], [0], [1], [0, 0, 1, 1], [], []>} : vector<32x32xf32>, vector<32x32xf32>, vector<32x32xf32> -> vector<32x32xf32>
    %c1_18 = arith.constant 1 : index
    %c0_19 = arith.constant 0 : index
    %c0_20 = arith.constant 0 : index
    %26 = vector.load %arg5[%c1_18, %c0_19, %c0_20] : memref<9x32x128xf32, #tpu.memory_space<vmem>>, vector<1x32x128xf32>
    %27 = vector.shape_cast %26 : vector<1x32x128xf32> to vector<32x128xf32>
    %cst_21 = arith.constant dense<0.000000e+00> : vector<32x128xf32>
    %28 = tpu.matmul %25, %27, %cst_21 {dimension_numbers = #tpu.dot_dimension_numbers<[1], [0], [0], [1], [0, 0, 1, 1], [], []>} : vector<32x32xf32>, vector<32x128xf32>, vector<32x128xf32> -> vector<32x128xf32>
    %29 = arith.addf %21, %28 : vector<32x128xf32>
    %30 = vector.extract_strided_slice %12 {offsets = [96, 0], sizes = [32, 32], strides = [1, 1]} : vector<128x32xf32> to vector<32x32xf32>
    %c1_22 = arith.constant 1 : index
    %c0_23 = arith.constant 0 : index
    %c0_24 = arith.constant 0 : index
    %31 = vector.load %arg2[%c1_22, %c0_23, %c0_24] : memref<9x32x32xf32, #tpu.memory_space<vmem>>, vector<1x32x32xf32>
    %32 = vector.shape_cast %31 : vector<1x32x32xf32> to vector<32x32xf32>
    %cst_25 = arith.constant dense<0.000000e+00> : vector<32x32xf32>
    %33 = tpu.matmul %32, %30, %cst_25 {dimension_numbers = #tpu.dot_dimension_numbers<[1], [0], [0], [1], [0, 0, 1, 1], [], []>} : vector<32x32xf32>, vector<32x32xf32>, vector<32x32xf32> -> vector<32x32xf32>
    %c2 = arith.constant 2 : index
    %c0_26 = arith.constant 0 : index
    %c0_27 = arith.constant 0 : index
    %34 = vector.load %arg5[%c2, %c0_26, %c0_27] : memref<9x32x128xf32, #tpu.memory_space<vmem>>, vector<1x32x128xf32>
    %35 = vector.shape_cast %34 : vector<1x32x128xf32> to vector<32x128xf32>
    %cst_28 = arith.constant dense<0.000000e+00> : vector<32x128xf32>
    %36 = tpu.matmul %33, %35, %cst_28 {dimension_numbers = #tpu.dot_dimension_numbers<[1], [0], [0], [1], [0, 0, 1, 1], [], []>} : vector<32x32xf32>, vector<32x128xf32>, vector<32x128xf32> -> vector<32x128xf32>
    %37 = arith.addf %29, %36 : vector<32x128xf32>
    %38 = vector.extract_strided_slice %12 {offsets = [32, 0], sizes = [32, 32], strides = [1, 1]} : vector<128x32xf32> to vector<32x32xf32>
    %c3 = arith.constant 3 : index
    %c0_29 = arith.constant 0 : index
    %c0_30 = arith.constant 0 : index
    %39 = vector.load %arg2[%c3, %c0_29, %c0_30] : memref<9x32x32xf32, #tpu.memory_space<vmem>>, vector<1x32x32xf32>
    %40 = vector.shape_cast %39 : vector<1x32x32xf32> to vector<32x32xf32>
    %cst_31 = arith.constant dense<0.000000e+00> : vector<32x32xf32>
    %41 = tpu.matmul %40, %38, %cst_31 {dimension_numbers = #tpu.dot_dimension_numbers<[1], [0], [0], [1], [0, 0, 1, 1], [], []>} : vector<32x32xf32>, vector<32x32xf32>, vector<32x32xf32> -> vector<32x32xf32>
    %c3_32 = arith.constant 3 : index
    %c0_33 = arith.constant 0 : index
    %c0_34 = arith.constant 0 : index
    %42 = vector.load %arg5[%c3_32, %c0_33, %c0_34] : memref<9x32x128xf32, #tpu.memory_space<vmem>>, vector<1x32x128xf32>
    %43 = vector.shape_cast %42 : vector<1x32x128xf32> to vector<32x128xf32>
    %cst_35 = arith.constant dense<0.000000e+00> : vector<32x128xf32>
    %44 = tpu.matmul %41, %43, %cst_35 {dimension_numbers = #tpu.dot_dimension_numbers<[1], [0], [0], [1], [0, 0, 1, 1], [], []>} : vector<32x32xf32>, vector<32x128xf32>, vector<32x128xf32> -> vector<32x128xf32>
    %45 = arith.addf %37, %44 : vector<32x128xf32>
    %46 = vector.extract_strided_slice %12 {offsets = [0, 0], sizes = [32, 32], strides = [1, 1]} : vector<128x32xf32> to vector<32x32xf32>
    %c4 = arith.constant 4 : index
    %c0_36 = arith.constant 0 : index
    %c0_37 = arith.constant 0 : index
    %47 = vector.load %arg5[%c4, %c0_36, %c0_37] : memref<9x32x128xf32, #tpu.memory_space<vmem>>, vector<1x32x128xf32>
    %48 = vector.shape_cast %47 : vector<1x32x128xf32> to vector<32x128xf32>
    %cst_38 = arith.constant dense<0.000000e+00> : vector<32x128xf32>
    %49 = tpu.matmul %46, %48, %cst_38 {dimension_numbers = #tpu.dot_dimension_numbers<[1], [0], [0], [1], [0, 0, 1, 1], [], []>} : vector<32x32xf32>, vector<32x128xf32>, vector<32x128xf32> -> vector<32x128xf32>
    %50 = arith.addf %45, %49 : vector<32x128xf32>
    %51 = vector.extract_strided_slice %12 {offsets = [32, 0], sizes = [32, 32], strides = [1, 1]} : vector<128x32xf32> to vector<32x32xf32>
    %c5 = arith.constant 5 : index
    %c0_39 = arith.constant 0 : index
    %c0_40 = arith.constant 0 : index
    %52 = vector.load %arg5[%c5, %c0_39, %c0_40] : memref<9x32x128xf32, #tpu.memory_space<vmem>>, vector<1x32x128xf32>
    %53 = vector.shape_cast %52 : vector<1x32x128xf32> to vector<32x128xf32>
    %cst_41 = arith.constant dense<0.000000e+00> : vector<32x128xf32>
    %54 = tpu.matmul %51, %53, %cst_41 {dimension_numbers = #tpu.dot_dimension_numbers<[1], [0], [0], [1], [0, 0, 1, 1], [], []>} : vector<32x32xf32>, vector<32x128xf32>, vector<32x128xf32> -> vector<32x128xf32>
    %55 = arith.addf %50, %54 : vector<32x128xf32>
    %56 = vector.extract_strided_slice %12 {offsets = [96, 0], sizes = [32, 32], strides = [1, 1]} : vector<128x32xf32> to vector<32x32xf32>
    %c3_42 = arith.constant 3 : index
    %c0_43 = arith.constant 0 : index
    %c0_44 = arith.constant 0 : index
    %57 = vector.load %arg2[%c3_42, %c0_43, %c0_44] : memref<9x32x32xf32, #tpu.memory_space<vmem>>, vector<1x32x32xf32>
    %58 = vector.shape_cast %57 : vector<1x32x32xf32> to vector<32x32xf32>
    %cst_45 = arith.constant dense<0.000000e+00> : vector<32x32xf32>
    %59 = tpu.matmul %58, %56, %cst_45 {dimension_numbers = #tpu.dot_dimension_numbers<[1], [0], [0], [1], [0, 0, 1, 1], [], []>} : vector<32x32xf32>, vector<32x32xf32>, vector<32x32xf32> -> vector<32x32xf32>
    %c6 = arith.constant 6 : index
    %c0_46 = arith.constant 0 : index
    %c0_47 = arith.constant 0 : index
    %60 = vector.load %arg5[%c6, %c0_46, %c0_47] : memref<9x32x128xf32, #tpu.memory_space<vmem>>, vector<1x32x128xf32>
    %61 = vector.shape_cast %60 : vector<1x32x128xf32> to vector<32x128xf32>
    %cst_48 = arith.constant dense<0.000000e+00> : vector<32x128xf32>
    %62 = tpu.matmul %59, %61, %cst_48 {dimension_numbers = #tpu.dot_dimension_numbers<[1], [0], [0], [1], [0, 0, 1, 1], [], []>} : vector<32x32xf32>, vector<32x128xf32>, vector<32x128xf32> -> vector<32x128xf32>
    %63 = arith.addf %55, %62 : vector<32x128xf32>
    %64 = vector.extract_strided_slice %12 {offsets = [64, 0], sizes = [32, 32], strides = [1, 1]} : vector<128x32xf32> to vector<32x32xf32>
    %c7 = arith.constant 7 : index
    %c0_49 = arith.constant 0 : index
    %c0_50 = arith.constant 0 : index
    %65 = vector.load %arg5[%c7, %c0_49, %c0_50] : memref<9x32x128xf32, #tpu.memory_space<vmem>>, vector<1x32x128xf32>
    %66 = vector.shape_cast %65 : vector<1x32x128xf32> to vector<32x128xf32>
    %cst_51 = arith.constant dense<0.000000e+00> : vector<32x128xf32>
    %67 = tpu.matmul %64, %66, %cst_51 {dimension_numbers = #tpu.dot_dimension_numbers<[1], [0], [0], [1], [0, 0, 1, 1], [], []>} : vector<32x32xf32>, vector<32x128xf32>, vector<32x128xf32> -> vector<32x128xf32>
    %68 = arith.addf %63, %67 : vector<32x128xf32>
    %69 = vector.extract_strided_slice %12 {offsets = [96, 0], sizes = [32, 32], strides = [1, 1]} : vector<128x32xf32> to vector<32x32xf32>
    %c8 = arith.constant 8 : index
    %c0_52 = arith.constant 0 : index
    %c0_53 = arith.constant 0 : index
    %70 = vector.load %arg5[%c8, %c0_52, %c0_53] : memref<9x32x128xf32, #tpu.memory_space<vmem>>, vector<1x32x128xf32>
    %71 = vector.shape_cast %70 : vector<1x32x128xf32> to vector<32x128xf32>
    %cst_54 = arith.constant dense<0.000000e+00> : vector<32x128xf32>
    %72 = tpu.matmul %69, %71, %cst_54 {dimension_numbers = #tpu.dot_dimension_numbers<[1], [0], [0], [1], [0, 0, 1, 1], [], []>} : vector<32x32xf32>, vector<32x128xf32>, vector<32x128xf32> -> vector<32x128xf32>
    %73 = arith.addf %68, %72 : vector<32x128xf32>
    %74 = vector.extract_strided_slice %0 {offsets = [1, 0], sizes = [1, 128], strides = [1, 1]} : vector<11x128xf32> to vector<1x128xf32>
    %75 = vector.broadcast %74 : vector<1x128xf32> to vector<32x128xf32>
    %76 = arith.addf %73, %75 : vector<32x128xf32>
    %77 = arith.negf %76 : vector<32x128xf32>
    %78 = math.exp %77 : vector<32x128xf32>
    %cst_55 = arith.constant 1.000000e+00 : f32
    %79 = vector.broadcast %cst_55 : f32 to vector<32x128xf32>
    %80 = arith.addf %79, %78 : vector<32x128xf32>
    %81 = arith.divf %79, %80 : vector<32x128xf32>
    %82 = arith.mulf %76, %81 : vector<32x128xf32>
    %c0_56 = arith.constant 0 : index
    %c0_57 = arith.constant 0 : index
    %c0_58 = arith.constant 0 : index
    %83 = vector.load %arg7[%c0_56, %c0_57, %c0_58] : memref<3x128x128xf32, #tpu.memory_space<vmem>>, vector<1x128x128xf32>
    %84 = vector.shape_cast %83 : vector<1x128x128xf32> to vector<128x128xf32>
    %cst_59 = arith.constant dense<0.000000e+00> : vector<32x128xf32>
    %85 = tpu.matmul %82, %84, %cst_59 {dimension_numbers = #tpu.dot_dimension_numbers<[1], [0], [0], [1], [0, 0, 1, 1], [], []>} : vector<32x128xf32>, vector<128x128xf32>, vector<32x128xf32> -> vector<32x128xf32>
    %86 = vector.extract_strided_slice %0 {offsets = [2, 0], sizes = [1, 128], strides = [1, 1]} : vector<11x128xf32> to vector<1x128xf32>
    %87 = vector.broadcast %86 : vector<1x128xf32> to vector<32x128xf32>
    %88 = arith.addf %85, %87 : vector<32x128xf32>
    %89 = arith.negf %88 : vector<32x128xf32>
    %90 = math.exp %89 : vector<32x128xf32>
    %cst_60 = arith.constant 1.000000e+00 : f32
    %91 = vector.broadcast %cst_60 : f32 to vector<32x128xf32>
    %92 = arith.addf %91, %90 : vector<32x128xf32>
    %93 = arith.divf %91, %92 : vector<32x128xf32>
    %94 = arith.mulf %88, %93 : vector<32x128xf32>
    %95 = vector.extract_strided_slice %94 {offsets = [0, 0], sizes = [32, 64], strides = [1, 1]} : vector<32x128xf32> to vector<32x64xf32>
    %96 = vector.extract_strided_slice %94 {offsets = [0, 64], sizes = [32, 64], strides = [1, 1]} : vector<32x128xf32> to vector<32x64xf32>
    %c0_61 = arith.constant 0 : index
    %c0_62 = arith.constant 0 : index
    %c0_63 = arith.constant 0 : index
    %97 = vector.load %arg6[%c0_61, %c0_62, %c0_63] : memref<30x64x64xf32, #tpu.memory_space<vmem>>, vector<1x64x64xf32>
    %98 = vector.shape_cast %97 : vector<1x64x64xf32> to vector<64x64xf32>
    %cst_64 = arith.constant dense<0.000000e+00> : vector<32x64xf32>
    %99 = tpu.matmul %95, %98, %cst_64 {dimension_numbers = #tpu.dot_dimension_numbers<[1], [0], [0], [1], [0, 0, 1, 1], [], []>} : vector<32x64xf32>, vector<64x64xf32>, vector<32x64xf32> -> vector<32x64xf32>
    %100 = vector.extract_strided_slice %0 {offsets = [5, 0], sizes = [1, 64], strides = [1, 1]} : vector<11x128xf32> to vector<1x64xf32>
    %101 = vector.broadcast %100 : vector<1x64xf32> to vector<32x64xf32>
    %102 = arith.addf %99, %101 : vector<32x64xf32>
    %103 = arith.negf %102 : vector<32x64xf32>
    %104 = math.exp %103 : vector<32x64xf32>
    %cst_65 = arith.constant 1.000000e+00 : f32
    %105 = vector.broadcast %cst_65 : f32 to vector<32x64xf32>
    %106 = arith.addf %105, %104 : vector<32x64xf32>
    %107 = arith.divf %105, %106 : vector<32x64xf32>
    %108 = arith.mulf %102, %107 : vector<32x64xf32>
    %cst_66 = arith.constant 0.000000e+00 : f32
    %109 = vector.broadcast %cst_66 : f32 to vector<32x64xf32>
    %c0_67 = arith.constant 0 : index
    %c0_68 = arith.constant 0 : index
    %c0_69 = arith.constant 0 : index
    %110 = vector.load %arg2[%c0_67, %c0_68, %c0_69] : memref<9x32x32xf32, #tpu.memory_space<vmem>>, vector<1x32x32xf32>
    %111 = vector.shape_cast %110 : vector<1x32x32xf32> to vector<32x32xf32>
    %cst_70 = arith.constant dense<0.000000e+00> : vector<32x64xf32>
    %112 = tpu.matmul %111, %108, %cst_70 {dimension_numbers = #tpu.dot_dimension_numbers<[1], [0], [0], [1], [0, 0, 1, 1], [], []>} : vector<32x32xf32>, vector<32x64xf32>, vector<32x64xf32> -> vector<32x64xf32>
    %c1_71 = arith.constant 1 : index
    %c0_72 = arith.constant 0 : index
    %c0_73 = arith.constant 0 : index
    %113 = vector.load %arg6[%c1_71, %c0_72, %c0_73] : memref<30x64x64xf32, #tpu.memory_space<vmem>>, vector<1x64x64xf32>
    %114 = vector.shape_cast %113 : vector<1x64x64xf32> to vector<64x64xf32>
    %cst_74 = arith.constant dense<0.000000e+00> : vector<32x64xf32>
    %115 = tpu.matmul %112, %114, %cst_74 {dimension_numbers = #tpu.dot_dimension_numbers<[1], [0], [0], [1], [0, 0, 1, 1], [], []>} : vector<32x64xf32>, vector<64x64xf32>, vector<32x64xf32> -> vector<32x64xf32>
    %116 = arith.addf %109, %115 : vector<32x64xf32>
    %c1_75 = arith.constant 1 : index
    %c0_76 = arith.constant 0 : index
    %c0_77 = arith.constant 0 : index
    %117 = vector.load %arg2[%c1_75, %c0_76, %c0_77] : memref<9x32x32xf32, #tpu.memory_space<vmem>>, vector<1x32x32xf32>
    %118 = vector.shape_cast %117 : vector<1x32x32xf32> to vector<32x32xf32>
    %cst_78 = arith.constant dense<0.000000e+00> : vector<32x64xf32>
    %119 = tpu.matmul %118, %108, %cst_78 {dimension_numbers = #tpu.dot_dimension_numbers<[1], [0], [0], [1], [0, 0, 1, 1], [], []>} : vector<32x32xf32>, vector<32x64xf32>, vector<32x64xf32> -> vector<32x64xf32>
    %c2_79 = arith.constant 2 : index
    %c0_80 = arith.constant 0 : index
    %c0_81 = arith.constant 0 : index
    %120 = vector.load %arg6[%c2_79, %c0_80, %c0_81] : memref<30x64x64xf32, #tpu.memory_space<vmem>>, vector<1x64x64xf32>
    %121 = vector.shape_cast %120 : vector<1x64x64xf32> to vector<64x64xf32>
    %cst_82 = arith.constant dense<0.000000e+00> : vector<32x64xf32>
    %122 = tpu.matmul %119, %121, %cst_82 {dimension_numbers = #tpu.dot_dimension_numbers<[1], [0], [0], [1], [0, 0, 1, 1], [], []>} : vector<32x64xf32>, vector<64x64xf32>, vector<32x64xf32> -> vector<32x64xf32>
    %123 = arith.addf %116, %122 : vector<32x64xf32>
    %c2_83 = arith.constant 2 : index
    %c0_84 = arith.constant 0 : index
    %c0_85 = arith.constant 0 : index
    %124 = vector.load %arg2[%c2_83, %c0_84, %c0_85] : memref<9x32x32xf32, #tpu.memory_space<vmem>>, vector<1x32x32xf32>
    %125 = vector.shape_cast %124 : vector<1x32x32xf32> to vector<32x32xf32>
    %cst_86 = arith.constant dense<0.000000e+00> : vector<32x64xf32>
    %126 = tpu.matmul %125, %108, %cst_86 {dimension_numbers = #tpu.dot_dimension_numbers<[1], [0], [0], [1], [0, 0, 1, 1], [], []>} : vector<32x32xf32>, vector<32x64xf32>, vector<32x64xf32> -> vector<32x64xf32>
    %c3_87 = arith.constant 3 : index
    %c0_88 = arith.constant 0 : index
    %c0_89 = arith.constant 0 : index
    %127 = vector.load %arg6[%c3_87, %c0_88, %c0_89] : memref<30x64x64xf32, #tpu.memory_space<vmem>>, vector<1x64x64xf32>
    %128 = vector.shape_cast %127 : vector<1x64x64xf32> to vector<64x64xf32>
    %cst_90 = arith.constant dense<0.000000e+00> : vector<32x64xf32>
    %129 = tpu.matmul %126, %128, %cst_90 {dimension_numbers = #tpu.dot_dimension_numbers<[1], [0], [0], [1], [0, 0, 1, 1], [], []>} : vector<32x64xf32>, vector<64x64xf32>, vector<32x64xf32> -> vector<32x64xf32>
    %130 = arith.addf %123, %129 : vector<32x64xf32>
    %c3_91 = arith.constant 3 : index
    %c0_92 = arith.constant 0 : index
    %c0_93 = arith.constant 0 : index
    %131 = vector.load %arg2[%c3_91, %c0_92, %c0_93] : memref<9x32x32xf32, #tpu.memory_space<vmem>>, vector<1x32x32xf32>
    %132 = vector.shape_cast %131 : vector<1x32x32xf32> to vector<32x32xf32>
    %cst_94 = arith.constant dense<0.000000e+00> : vector<32x64xf32>
    %133 = tpu.matmul %132, %108, %cst_94 {dimension_numbers = #tpu.dot_dimension_numbers<[1], [0], [0], [1], [0, 0, 1, 1], [], []>} : vector<32x32xf32>, vector<32x64xf32>, vector<32x64xf32> -> vector<32x64xf32>
    %c4_95 = arith.constant 4 : index
    %c0_96 = arith.constant 0 : index
    %c0_97 = arith.constant 0 : index
    %134 = vector.load %arg6[%c4_95, %c0_96, %c0_97] : memref<30x64x64xf32, #tpu.memory_space<vmem>>, vector<1x64x64xf32>
    %135 = vector.shape_cast %134 : vector<1x64x64xf32> to vector<64x64xf32>
    %cst_98 = arith.constant dense<0.000000e+00> : vector<32x64xf32>
    %136 = tpu.matmul %133, %135, %cst_98 {dimension_numbers = #tpu.dot_dimension_numbers<[1], [0], [0], [1], [0, 0, 1, 1], [], []>} : vector<32x64xf32>, vector<64x64xf32>, vector<32x64xf32> -> vector<32x64xf32>
    %137 = arith.addf %130, %136 : vector<32x64xf32>
    %c5_99 = arith.constant 5 : index
    %c0_100 = arith.constant 0 : index
    %c0_101 = arith.constant 0 : index
    %138 = vector.load %arg6[%c5_99, %c0_100, %c0_101] : memref<30x64x64xf32, #tpu.memory_space<vmem>>, vector<1x64x64xf32>
    %139 = vector.shape_cast %138 : vector<1x64x64xf32> to vector<64x64xf32>
    %cst_102 = arith.constant dense<0.000000e+00> : vector<32x64xf32>
    %140 = tpu.matmul %108, %139, %cst_102 {dimension_numbers = #tpu.dot_dimension_numbers<[1], [0], [0], [1], [0, 0, 1, 1], [], []>} : vector<32x64xf32>, vector<64x64xf32>, vector<32x64xf32> -> vector<32x64xf32>
    %141 = arith.addf %137, %140 : vector<32x64xf32>
    %c5_103 = arith.constant 5 : index
    %c0_104 = arith.constant 0 : index
    %c0_105 = arith.constant 0 : index
    %142 = vector.load %arg2[%c5_103, %c0_104, %c0_105] : memref<9x32x32xf32, #tpu.memory_space<vmem>>, vector<1x32x32xf32>
    %143 = vector.shape_cast %142 : vector<1x32x32xf32> to vector<32x32xf32>
    %cst_106 = arith.constant dense<0.000000e+00> : vector<32x64xf32>
    %144 = tpu.matmul %143, %108, %cst_106 {dimension_numbers = #tpu.dot_dimension_numbers<[1], [0], [0], [1], [0, 0, 1, 1], [], []>} : vector<32x32xf32>, vector<32x64xf32>, vector<32x64xf32> -> vector<32x64xf32>
    %c6_107 = arith.constant 6 : index
    %c0_108 = arith.constant 0 : index
    %c0_109 = arith.constant 0 : index
    %145 = vector.load %arg6[%c6_107, %c0_108, %c0_109] : memref<30x64x64xf32, #tpu.memory_space<vmem>>, vector<1x64x64xf32>
    %146 = vector.shape_cast %145 : vector<1x64x64xf32> to vector<64x64xf32>
    %cst_110 = arith.constant dense<0.000000e+00> : vector<32x64xf32>
    %147 = tpu.matmul %144, %146, %cst_110 {dimension_numbers = #tpu.dot_dimension_numbers<[1], [0], [0], [1], [0, 0, 1, 1], [], []>} : vector<32x64xf32>, vector<64x64xf32>, vector<32x64xf32> -> vector<32x64xf32>
    %148 = arith.addf %141, %147 : vector<32x64xf32>
    %c6_111 = arith.constant 6 : index
    %c0_112 = arith.constant 0 : index
    %c0_113 = arith.constant 0 : index
    %149 = vector.load %arg2[%c6_111, %c0_112, %c0_113] : memref<9x32x32xf32, #tpu.memory_space<vmem>>, vector<1x32x32xf32>
    %150 = vector.shape_cast %149 : vector<1x32x32xf32> to vector<32x32xf32>
    %cst_114 = arith.constant dense<0.000000e+00> : vector<32x64xf32>
    %151 = tpu.matmul %150, %108, %cst_114 {dimension_numbers = #tpu.dot_dimension_numbers<[1], [0], [0], [1], [0, 0, 1, 1], [], []>} : vector<32x32xf32>, vector<32x64xf32>, vector<32x64xf32> -> vector<32x64xf32>
    %c7_115 = arith.constant 7 : index
    %c0_116 = arith.constant 0 : index
    %c0_117 = arith.constant 0 : index
    %152 = vector.load %arg6[%c7_115, %c0_116, %c0_117] : memref<30x64x64xf32, #tpu.memory_space<vmem>>, vector<1x64x64xf32>
    %153 = vector.shape_cast %152 : vector<1x64x64xf32> to vector<64x64xf32>
    %cst_118 = arith.constant dense<0.000000e+00> : vector<32x64xf32>
    %154 = tpu.matmul %151, %153, %cst_118 {dimension_numbers = #tpu.dot_dimension_numbers<[1], [0], [0], [1], [0, 0, 1, 1], [], []>} : vector<32x64xf32>, vector<64x64xf32>, vector<32x64xf32> -> vector<32x64xf32>
    %155 = arith.addf %148, %154 : vector<32x64xf32>
    %c7_119 = arith.constant 7 : index
    %c0_120 = arith.constant 0 : index
    %c0_121 = arith.constant 0 : index
    %156 = vector.load %arg2[%c7_119, %c0_120, %c0_121] : memref<9x32x32xf32, #tpu.memory_space<vmem>>, vector<1x32x32xf32>
    %157 = vector.shape_cast %156 : vector<1x32x32xf32> to vector<32x32xf32>
    %cst_122 = arith.constant dense<0.000000e+00> : vector<32x64xf32>
    %158 = tpu.matmul %157, %108, %cst_122 {dimension_numbers = #tpu.dot_dimension_numbers<[1], [0], [0], [1], [0, 0, 1, 1], [], []>} : vector<32x32xf32>, vector<32x64xf32>, vector<32x64xf32> -> vector<32x64xf32>
    %c8_123 = arith.constant 8 : index
    %c0_124 = arith.constant 0 : index
    %c0_125 = arith.constant 0 : index
    %159 = vector.load %arg6[%c8_123, %c0_124, %c0_125] : memref<30x64x64xf32, #tpu.memory_space<vmem>>, vector<1x64x64xf32>
    %160 = vector.shape_cast %159 : vector<1x64x64xf32> to vector<64x64xf32>
    %cst_126 = arith.constant dense<0.000000e+00> : vector<32x64xf32>
    %161 = tpu.matmul %158, %160, %cst_126 {dimension_numbers = #tpu.dot_dimension_numbers<[1], [0], [0], [1], [0, 0, 1, 1], [], []>} : vector<32x64xf32>, vector<64x64xf32>, vector<32x64xf32> -> vector<32x64xf32>
    %162 = arith.addf %155, %161 : vector<32x64xf32>
    %c8_127 = arith.constant 8 : index
    %c0_128 = arith.constant 0 : index
    %c0_129 = arith.constant 0 : index
    %163 = vector.load %arg2[%c8_127, %c0_128, %c0_129] : memref<9x32x32xf32, #tpu.memory_space<vmem>>, vector<1x32x32xf32>
    %164 = vector.shape_cast %163 : vector<1x32x32xf32> to vector<32x32xf32>
    %cst_130 = arith.constant dense<0.000000e+00> : vector<32x64xf32>
    %165 = tpu.matmul %164, %108, %cst_130 {dimension_numbers = #tpu.dot_dimension_numbers<[1], [0], [0], [1], [0, 0, 1, 1], [], []>} : vector<32x32xf32>, vector<32x64xf32>, vector<32x64xf32> -> vector<32x64xf32>
    %c9 = arith.constant 9 : index
    %c0_131 = arith.constant 0 : index
    %c0_132 = arith.constant 0 : index
    %166 = vector.load %arg6[%c9, %c0_131, %c0_132] : memref<30x64x64xf32, #tpu.memory_space<vmem>>, vector<1x64x64xf32>
    %167 = vector.shape_cast %166 : vector<1x64x64xf32> to vector<64x64xf32>
    %cst_133 = arith.constant dense<0.000000e+00> : vector<32x64xf32>
    %168 = tpu.matmul %165, %167, %cst_133 {dimension_numbers = #tpu.dot_dimension_numbers<[1], [0], [0], [1], [0, 0, 1, 1], [], []>} : vector<32x64xf32>, vector<64x64xf32>, vector<32x64xf32> -> vector<32x64xf32>
    %169 = arith.addf %162, %168 : vector<32x64xf32>
    %170 = vector.extract_strided_slice %0 {offsets = [6, 0], sizes = [1, 64], strides = [1, 1]} : vector<11x128xf32> to vector<1x64xf32>
    %171 = vector.broadcast %170 : vector<1x64xf32> to vector<32x64xf32>
    %172 = arith.addf %169, %171 : vector<32x64xf32>
    %173 = arith.negf %172 : vector<32x64xf32>
    %174 = math.exp %173 : vector<32x64xf32>
    %cst_134 = arith.constant 1.000000e+00 : f32
    %175 = vector.broadcast %cst_134 : f32 to vector<32x64xf32>
    %176 = arith.addf %175, %174 : vector<32x64xf32>
    %177 = arith.divf %175, %176 : vector<32x64xf32>
    %178 = arith.mulf %172, %177 : vector<32x64xf32>
    %179 = arith.addf %178, %95 : vector<32x64xf32>
    %c10 = arith.constant 10 : index
    %c0_135 = arith.constant 0 : index
    %c0_136 = arith.constant 0 : index
    %180 = vector.load %arg6[%c10, %c0_135, %c0_136] : memref<30x64x64xf32, #tpu.memory_space<vmem>>, vector<1x64x64xf32>
    %181 = vector.shape_cast %180 : vector<1x64x64xf32> to vector<64x64xf32>
    %cst_137 = arith.constant dense<0.000000e+00> : vector<32x64xf32>
    %182 = tpu.matmul %179, %181, %cst_137 {dimension_numbers = #tpu.dot_dimension_numbers<[1], [0], [0], [1], [0, 0, 1, 1], [], []>} : vector<32x64xf32>, vector<64x64xf32>, vector<32x64xf32> -> vector<32x64xf32>
    %183 = vector.extract_strided_slice %0 {offsets = [7, 0], sizes = [1, 64], strides = [1, 1]} : vector<11x128xf32> to vector<1x64xf32>
    %184 = vector.broadcast %183 : vector<1x64xf32> to vector<32x64xf32>
    %185 = arith.addf %182, %184 : vector<32x64xf32>
    %186 = arith.negf %185 : vector<32x64xf32>
    %187 = math.exp %186 : vector<32x64xf32>
    %cst_138 = arith.constant 1.000000e+00 : f32
    %188 = vector.broadcast %cst_138 : f32 to vector<32x64xf32>
    %189 = arith.addf %188, %187 : vector<32x64xf32>
    %190 = arith.divf %188, %189 : vector<32x64xf32>
    %191 = arith.mulf %185, %190 : vector<32x64xf32>
    %cst_139 = arith.constant 0.000000e+00 : f32
    %192 = vector.broadcast %cst_139 : f32 to vector<32x64xf32>
    %c0_140 = arith.constant 0 : index
    %c0_141 = arith.constant 0 : index
    %c0_142 = arith.constant 0 : index
    %193 = vector.load %arg2[%c0_140, %c0_141, %c0_142] : memref<9x32x32xf32, #tpu.memory_space<vmem>>, vector<1x32x32xf32>
    %194 = vector.shape_cast %193 : vector<1x32x32xf32> to vector<32x32xf32>
    %cst_143 = arith.constant dense<0.000000e+00> : vector<32x64xf32>
    %195 = tpu.matmul %194, %191, %cst_143 {dimension_numbers = #tpu.dot_dimension_numbers<[1], [0], [0], [1], [0, 0, 1, 1], [], []>} : vector<32x32xf32>, vector<32x64xf32>, vector<32x64xf32> -> vector<32x64xf32>
    %c11 = arith.constant 11 : index
    %c0_144 = arith.constant 0 : index
    %c0_145 = arith.constant 0 : index
    %196 = vector.load %arg6[%c11, %c0_144, %c0_145] : memref<30x64x64xf32, #tpu.memory_space<vmem>>, vector<1x64x64xf32>
    %197 = vector.shape_cast %196 : vector<1x64x64xf32> to vector<64x64xf32>
    %cst_146 = arith.constant dense<0.000000e+00> : vector<32x64xf32>
    %198 = tpu.matmul %195, %197, %cst_146 {dimension_numbers = #tpu.dot_dimension_numbers<[1], [0], [0], [1], [0, 0, 1, 1], [], []>} : vector<32x64xf32>, vector<64x64xf32>, vector<32x64xf32> -> vector<32x64xf32>
    %199 = arith.addf %192, %198 : vector<32x64xf32>
    %c1_147 = arith.constant 1 : index
    %c0_148 = arith.constant 0 : index
    %c0_149 = arith.constant 0 : index
    %200 = vector.load %arg2[%c1_147, %c0_148, %c0_149] : memref<9x32x32xf32, #tpu.memory_space<vmem>>, vector<1x32x32xf32>
    %201 = vector.shape_cast %200 : vector<1x32x32xf32> to vector<32x32xf32>
    %cst_150 = arith.constant dense<0.000000e+00> : vector<32x64xf32>
    %202 = tpu.matmul %201, %191, %cst_150 {dimension_numbers = #tpu.dot_dimension_numbers<[1], [0], [0], [1], [0, 0, 1, 1], [], []>} : vector<32x32xf32>, vector<32x64xf32>, vector<32x64xf32> -> vector<32x64xf32>
    %c12 = arith.constant 12 : index
    %c0_151 = arith.constant 0 : index
    %c0_152 = arith.constant 0 : index
    %203 = vector.load %arg6[%c12, %c0_151, %c0_152] : memref<30x64x64xf32, #tpu.memory_space<vmem>>, vector<1x64x64xf32>
    %204 = vector.shape_cast %203 : vector<1x64x64xf32> to vector<64x64xf32>
    %cst_153 = arith.constant dense<0.000000e+00> : vector<32x64xf32>
    %205 = tpu.matmul %202, %204, %cst_153 {dimension_numbers = #tpu.dot_dimension_numbers<[1], [0], [0], [1], [0, 0, 1, 1], [], []>} : vector<32x64xf32>, vector<64x64xf32>, vector<32x64xf32> -> vector<32x64xf32>
    %206 = arith.addf %199, %205 : vector<32x64xf32>
    %c2_154 = arith.constant 2 : index
    %c0_155 = arith.constant 0 : index
    %c0_156 = arith.constant 0 : index
    %207 = vector.load %arg2[%c2_154, %c0_155, %c0_156] : memref<9x32x32xf32, #tpu.memory_space<vmem>>, vector<1x32x32xf32>
    %208 = vector.shape_cast %207 : vector<1x32x32xf32> to vector<32x32xf32>
    %cst_157 = arith.constant dense<0.000000e+00> : vector<32x64xf32>
    %209 = tpu.matmul %208, %191, %cst_157 {dimension_numbers = #tpu.dot_dimension_numbers<[1], [0], [0], [1], [0, 0, 1, 1], [], []>} : vector<32x32xf32>, vector<32x64xf32>, vector<32x64xf32> -> vector<32x64xf32>
    %c13 = arith.constant 13 : index
    %c0_158 = arith.constant 0 : index
    %c0_159 = arith.constant 0 : index
    %210 = vector.load %arg6[%c13, %c0_158, %c0_159] : memref<30x64x64xf32, #tpu.memory_space<vmem>>, vector<1x64x64xf32>
    %211 = vector.shape_cast %210 : vector<1x64x64xf32> to vector<64x64xf32>
    %cst_160 = arith.constant dense<0.000000e+00> : vector<32x64xf32>
    %212 = tpu.matmul %209, %211, %cst_160 {dimension_numbers = #tpu.dot_dimension_numbers<[1], [0], [0], [1], [0, 0, 1, 1], [], []>} : vector<32x64xf32>, vector<64x64xf32>, vector<32x64xf32> -> vector<32x64xf32>
    %213 = arith.addf %206, %212 : vector<32x64xf32>
    %c3_161 = arith.constant 3 : index
    %c0_162 = arith.constant 0 : index
    %c0_163 = arith.constant 0 : index
    %214 = vector.load %arg2[%c3_161, %c0_162, %c0_163] : memref<9x32x32xf32, #tpu.memory_space<vmem>>, vector<1x32x32xf32>
    %215 = vector.shape_cast %214 : vector<1x32x32xf32> to vector<32x32xf32>
    %cst_164 = arith.constant dense<0.000000e+00> : vector<32x64xf32>
    %216 = tpu.matmul %215, %191, %cst_164 {dimension_numbers = #tpu.dot_dimension_numbers<[1], [0], [0], [1], [0, 0, 1, 1], [], []>} : vector<32x32xf32>, vector<32x64xf32>, vector<32x64xf32> -> vector<32x64xf32>
    %c14 = arith.constant 14 : index
    %c0_165 = arith.constant 0 : index
    %c0_166 = arith.constant 0 : index
    %217 = vector.load %arg6[%c14, %c0_165, %c0_166] : memref<30x64x64xf32, #tpu.memory_space<vmem>>, vector<1x64x64xf32>
    %218 = vector.shape_cast %217 : vector<1x64x64xf32> to vector<64x64xf32>
    %cst_167 = arith.constant dense<0.000000e+00> : vector<32x64xf32>
    %219 = tpu.matmul %216, %218, %cst_167 {dimension_numbers = #tpu.dot_dimension_numbers<[1], [0], [0], [1], [0, 0, 1, 1], [], []>} : vector<32x64xf32>, vector<64x64xf32>, vector<32x64xf32> -> vector<32x64xf32>
    %220 = arith.addf %213, %219 : vector<32x64xf32>
    %c15 = arith.constant 15 : index
    %c0_168 = arith.constant 0 : index
    %c0_169 = arith.constant 0 : index
    %221 = vector.load %arg6[%c15, %c0_168, %c0_169] : memref<30x64x64xf32, #tpu.memory_space<vmem>>, vector<1x64x64xf32>
    %222 = vector.shape_cast %221 : vector<1x64x64xf32> to vector<64x64xf32>
    %cst_170 = arith.constant dense<0.000000e+00> : vector<32x64xf32>
    %223 = tpu.matmul %191, %222, %cst_170 {dimension_numbers = #tpu.dot_dimension_numbers<[1], [0], [0], [1], [0, 0, 1, 1], [], []>} : vector<32x64xf32>, vector<64x64xf32>, vector<32x64xf32> -> vector<32x64xf32>
    %224 = arith.addf %220, %223 : vector<32x64xf32>
    %c5_171 = arith.constant 5 : index
    %c0_172 = arith.constant 0 : index
    %c0_173 = arith.constant 0 : index
    %225 = vector.load %arg2[%c5_171, %c0_172, %c0_173] : memref<9x32x32xf32, #tpu.memory_space<vmem>>, vector<1x32x32xf32>
    %226 = vector.shape_cast %225 : vector<1x32x32xf32> to vector<32x32xf32>
    %cst_174 = arith.constant dense<0.000000e+00> : vector<32x64xf32>
    %227 = tpu.matmul %226, %191, %cst_174 {dimension_numbers = #tpu.dot_dimension_numbers<[1], [0], [0], [1], [0, 0, 1, 1], [], []>} : vector<32x32xf32>, vector<32x64xf32>, vector<32x64xf32> -> vector<32x64xf32>
    %c16 = arith.constant 16 : index
    %c0_175 = arith.constant 0 : index
    %c0_176 = arith.constant 0 : index
    %228 = vector.load %arg6[%c16, %c0_175, %c0_176] : memref<30x64x64xf32, #tpu.memory_space<vmem>>, vector<1x64x64xf32>
    %229 = vector.shape_cast %228 : vector<1x64x64xf32> to vector<64x64xf32>
    %cst_177 = arith.constant dense<0.000000e+00> : vector<32x64xf32>
    %230 = tpu.matmul %227, %229, %cst_177 {dimension_numbers = #tpu.dot_dimension_numbers<[1], [0], [0], [1], [0, 0, 1, 1], [], []>} : vector<32x64xf32>, vector<64x64xf32>, vector<32x64xf32> -> vector<32x64xf32>
    %231 = arith.addf %224, %230 : vector<32x64xf32>
    %c6_178 = arith.constant 6 : index
    %c0_179 = arith.constant 0 : index
    %c0_180 = arith.constant 0 : index
    %232 = vector.load %arg2[%c6_178, %c0_179, %c0_180] : memref<9x32x32xf32, #tpu.memory_space<vmem>>, vector<1x32x32xf32>
    %233 = vector.shape_cast %232 : vector<1x32x32xf32> to vector<32x32xf32>
    %cst_181 = arith.constant dense<0.000000e+00> : vector<32x64xf32>
    %234 = tpu.matmul %233, %191, %cst_181 {dimension_numbers = #tpu.dot_dimension_numbers<[1], [0], [0], [1], [0, 0, 1, 1], [], []>} : vector<32x32xf32>, vector<32x64xf32>, vector<32x64xf32> -> vector<32x64xf32>
    %c17 = arith.constant 17 : index
    %c0_182 = arith.constant 0 : index
    %c0_183 = arith.constant 0 : index
    %235 = vector.load %arg6[%c17, %c0_182, %c0_183] : memref<30x64x64xf32, #tpu.memory_space<vmem>>, vector<1x64x64xf32>
    %236 = vector.shape_cast %235 : vector<1x64x64xf32> to vector<64x64xf32>
    %cst_184 = arith.constant dense<0.000000e+00> : vector<32x64xf32>
    %237 = tpu.matmul %234, %236, %cst_184 {dimension_numbers = #tpu.dot_dimension_numbers<[1], [0], [0], [1], [0, 0, 1, 1], [], []>} : vector<32x64xf32>, vector<64x64xf32>, vector<32x64xf32> -> vector<32x64xf32>
    %238 = arith.addf %231, %237 : vector<32x64xf32>
    %c7_185 = arith.constant 7 : index
    %c0_186 = arith.constant 0 : index
    %c0_187 = arith.constant 0 : index
    %239 = vector.load %arg2[%c7_185, %c0_186, %c0_187] : memref<9x32x32xf32, #tpu.memory_space<vmem>>, vector<1x32x32xf32>
    %240 = vector.shape_cast %239 : vector<1x32x32xf32> to vector<32x32xf32>
    %cst_188 = arith.constant dense<0.000000e+00> : vector<32x64xf32>
    %241 = tpu.matmul %240, %191, %cst_188 {dimension_numbers = #tpu.dot_dimension_numbers<[1], [0], [0], [1], [0, 0, 1, 1], [], []>} : vector<32x32xf32>, vector<32x64xf32>, vector<32x64xf32> -> vector<32x64xf32>
    %c18 = arith.constant 18 : index
    %c0_189 = arith.constant 0 : index
    %c0_190 = arith.constant 0 : index
    %242 = vector.load %arg6[%c18, %c0_189, %c0_190] : memref<30x64x64xf32, #tpu.memory_space<vmem>>, vector<1x64x64xf32>
    %243 = vector.shape_cast %242 : vector<1x64x64xf32> to vector<64x64xf32>
    %cst_191 = arith.constant dense<0.000000e+00> : vector<32x64xf32>
    %244 = tpu.matmul %241, %243, %cst_191 {dimension_numbers = #tpu.dot_dimension_numbers<[1], [0], [0], [1], [0, 0, 1, 1], [], []>} : vector<32x64xf32>, vector<64x64xf32>, vector<32x64xf32> -> vector<32x64xf32>
    %245 = arith.addf %238, %244 : vector<32x64xf32>
    %c8_192 = arith.constant 8 : index
    %c0_193 = arith.constant 0 : index
    %c0_194 = arith.constant 0 : index
    %246 = vector.load %arg2[%c8_192, %c0_193, %c0_194] : memref<9x32x32xf32, #tpu.memory_space<vmem>>, vector<1x32x32xf32>
    %247 = vector.shape_cast %246 : vector<1x32x32xf32> to vector<32x32xf32>
    %cst_195 = arith.constant dense<0.000000e+00> : vector<32x64xf32>
    %248 = tpu.matmul %247, %191, %cst_195 {dimension_numbers = #tpu.dot_dimension_numbers<[1], [0], [0], [1], [0, 0, 1, 1], [], []>} : vector<32x32xf32>, vector<32x64xf32>, vector<32x64xf32> -> vector<32x64xf32>
    %c19 = arith.constant 19 : index
    %c0_196 = arith.constant 0 : index
    %c0_197 = arith.constant 0 : index
    %249 = vector.load %arg6[%c19, %c0_196, %c0_197] : memref<30x64x64xf32, #tpu.memory_space<vmem>>, vector<1x64x64xf32>
    %250 = vector.shape_cast %249 : vector<1x64x64xf32> to vector<64x64xf32>
    %cst_198 = arith.constant dense<0.000000e+00> : vector<32x64xf32>
    %251 = tpu.matmul %248, %250, %cst_198 {dimension_numbers = #tpu.dot_dimension_numbers<[1], [0], [0], [1], [0, 0, 1, 1], [], []>} : vector<32x64xf32>, vector<64x64xf32>, vector<32x64xf32> -> vector<32x64xf32>
    %252 = arith.addf %245, %251 : vector<32x64xf32>
    %253 = vector.extract_strided_slice %0 {offsets = [8, 0], sizes = [1, 64], strides = [1, 1]} : vector<11x128xf32> to vector<1x64xf32>
    %254 = vector.broadcast %253 : vector<1x64xf32> to vector<32x64xf32>
    %255 = arith.addf %252, %254 : vector<32x64xf32>
    %256 = arith.negf %255 : vector<32x64xf32>
    %257 = math.exp %256 : vector<32x64xf32>
    %cst_199 = arith.constant 1.000000e+00 : f32
    %258 = vector.broadcast %cst_199 : f32 to vector<32x64xf32>
    %259 = arith.addf %258, %257 : vector<32x64xf32>
    %260 = arith.divf %258, %259 : vector<32x64xf32>
    %261 = arith.mulf %255, %260 : vector<32x64xf32>
    %262 = arith.addf %261, %179 : vector<32x64xf32>
    %c20 = arith.constant 20 : index
    %c0_200 = arith.constant 0 : index
    %c0_201 = arith.constant 0 : index
    %263 = vector.load %arg6[%c20, %c0_200, %c0_201] : memref<30x64x64xf32, #tpu.memory_space<vmem>>, vector<1x64x64xf32>
    %264 = vector.shape_cast %263 : vector<1x64x64xf32> to vector<64x64xf32>
    %cst_202 = arith.constant dense<0.000000e+00> : vector<32x64xf32>
    %265 = tpu.matmul %262, %264, %cst_202 {dimension_numbers = #tpu.dot_dimension_numbers<[1], [0], [0], [1], [0, 0, 1, 1], [], []>} : vector<32x64xf32>, vector<64x64xf32>, vector<32x64xf32> -> vector<32x64xf32>
    %266 = vector.extract_strided_slice %0 {offsets = [9, 0], sizes = [1, 64], strides = [1, 1]} : vector<11x128xf32> to vector<1x64xf32>
    %267 = vector.broadcast %266 : vector<1x64xf32> to vector<32x64xf32>
    %268 = arith.addf %265, %267 : vector<32x64xf32>
    %269 = arith.negf %268 : vector<32x64xf32>
    %270 = math.exp %269 : vector<32x64xf32>
    %cst_203 = arith.constant 1.000000e+00 : f32
    %271 = vector.broadcast %cst_203 : f32 to vector<32x64xf32>
    %272 = arith.addf %271, %270 : vector<32x64xf32>
    %273 = arith.divf %271, %272 : vector<32x64xf32>
    %274 = arith.mulf %268, %273 : vector<32x64xf32>
    %cst_204 = arith.constant 0.000000e+00 : f32
    %275 = vector.broadcast %cst_204 : f32 to vector<32x64xf32>
    %c0_205 = arith.constant 0 : index
    %c0_206 = arith.constant 0 : index
    %c0_207 = arith.constant 0 : index
    %276 = vector.load %arg2[%c0_205, %c0_206, %c0_207] : memref<9x32x32xf32, #tpu.memory_space<vmem>>, vector<1x32x32xf32>
    %277 = vector.shape_cast %276 : vector<1x32x32xf32> to vector<32x32xf32>
    %cst_208 = arith.constant dense<0.000000e+00> : vector<32x64xf32>
    %278 = tpu.matmul %277, %274, %cst_208 {dimension_numbers = #tpu.dot_dimension_numbers<[1], [0], [0], [1], [0, 0, 1, 1], [], []>} : vector<32x32xf32>, vector<32x64xf32>, vector<32x64xf32> -> vector<32x64xf32>
    %c21 = arith.constant 21 : index
    %c0_209 = arith.constant 0 : index
    %c0_210 = arith.constant 0 : index
    %279 = vector.load %arg6[%c21, %c0_209, %c0_210] : memref<30x64x64xf32, #tpu.memory_space<vmem>>, vector<1x64x64xf32>
    %280 = vector.shape_cast %279 : vector<1x64x64xf32> to vector<64x64xf32>
    %cst_211 = arith.constant dense<0.000000e+00> : vector<32x64xf32>
    %281 = tpu.matmul %278, %280, %cst_211 {dimension_numbers = #tpu.dot_dimension_numbers<[1], [0], [0], [1], [0, 0, 1, 1], [], []>} : vector<32x64xf32>, vector<64x64xf32>, vector<32x64xf32> -> vector<32x64xf32>
    %282 = arith.addf %275, %281 : vector<32x64xf32>
    %c1_212 = arith.constant 1 : index
    %c0_213 = arith.constant 0 : index
    %c0_214 = arith.constant 0 : index
    %283 = vector.load %arg2[%c1_212, %c0_213, %c0_214] : memref<9x32x32xf32, #tpu.memory_space<vmem>>, vector<1x32x32xf32>
    %284 = vector.shape_cast %283 : vector<1x32x32xf32> to vector<32x32xf32>
    %cst_215 = arith.constant dense<0.000000e+00> : vector<32x64xf32>
    %285 = tpu.matmul %284, %274, %cst_215 {dimension_numbers = #tpu.dot_dimension_numbers<[1], [0], [0], [1], [0, 0, 1, 1], [], []>} : vector<32x32xf32>, vector<32x64xf32>, vector<32x64xf32> -> vector<32x64xf32>
    %c22 = arith.constant 22 : index
    %c0_216 = arith.constant 0 : index
    %c0_217 = arith.constant 0 : index
    %286 = vector.load %arg6[%c22, %c0_216, %c0_217] : memref<30x64x64xf32, #tpu.memory_space<vmem>>, vector<1x64x64xf32>
    %287 = vector.shape_cast %286 : vector<1x64x64xf32> to vector<64x64xf32>
    %cst_218 = arith.constant dense<0.000000e+00> : vector<32x64xf32>
    %288 = tpu.matmul %285, %287, %cst_218 {dimension_numbers = #tpu.dot_dimension_numbers<[1], [0], [0], [1], [0, 0, 1, 1], [], []>} : vector<32x64xf32>, vector<64x64xf32>, vector<32x64xf32> -> vector<32x64xf32>
    %289 = arith.addf %282, %288 : vector<32x64xf32>
    %c2_219 = arith.constant 2 : index
    %c0_220 = arith.constant 0 : index
    %c0_221 = arith.constant 0 : index
    %290 = vector.load %arg2[%c2_219, %c0_220, %c0_221] : memref<9x32x32xf32, #tpu.memory_space<vmem>>, vector<1x32x32xf32>
    %291 = vector.shape_cast %290 : vector<1x32x32xf32> to vector<32x32xf32>
    %cst_222 = arith.constant dense<0.000000e+00> : vector<32x64xf32>
    %292 = tpu.matmul %291, %274, %cst_222 {dimension_numbers = #tpu.dot_dimension_numbers<[1], [0], [0], [1], [0, 0, 1, 1], [], []>} : vector<32x32xf32>, vector<32x64xf32>, vector<32x64xf32> -> vector<32x64xf32>
    %c23 = arith.constant 23 : index
    %c0_223 = arith.constant 0 : index
    %c0_224 = arith.constant 0 : index
    %293 = vector.load %arg6[%c23, %c0_223, %c0_224] : memref<30x64x64xf32, #tpu.memory_space<vmem>>, vector<1x64x64xf32>
    %294 = vector.shape_cast %293 : vector<1x64x64xf32> to vector<64x64xf32>
    %cst_225 = arith.constant dense<0.000000e+00> : vector<32x64xf32>
    %295 = tpu.matmul %292, %294, %cst_225 {dimension_numbers = #tpu.dot_dimension_numbers<[1], [0], [0], [1], [0, 0, 1, 1], [], []>} : vector<32x64xf32>, vector<64x64xf32>, vector<32x64xf32> -> vector<32x64xf32>
    %296 = arith.addf %289, %295 : vector<32x64xf32>
    %c3_226 = arith.constant 3 : index
    %c0_227 = arith.constant 0 : index
    %c0_228 = arith.constant 0 : index
    %297 = vector.load %arg2[%c3_226, %c0_227, %c0_228] : memref<9x32x32xf32, #tpu.memory_space<vmem>>, vector<1x32x32xf32>
    %298 = vector.shape_cast %297 : vector<1x32x32xf32> to vector<32x32xf32>
    %cst_229 = arith.constant dense<0.000000e+00> : vector<32x64xf32>
    %299 = tpu.matmul %298, %274, %cst_229 {dimension_numbers = #tpu.dot_dimension_numbers<[1], [0], [0], [1], [0, 0, 1, 1], [], []>} : vector<32x32xf32>, vector<32x64xf32>, vector<32x64xf32> -> vector<32x64xf32>
    %c24 = arith.constant 24 : index
    %c0_230 = arith.constant 0 : index
    %c0_231 = arith.constant 0 : index
    %300 = vector.load %arg6[%c24, %c0_230, %c0_231] : memref<30x64x64xf32, #tpu.memory_space<vmem>>, vector<1x64x64xf32>
    %301 = vector.shape_cast %300 : vector<1x64x64xf32> to vector<64x64xf32>
    %cst_232 = arith.constant dense<0.000000e+00> : vector<32x64xf32>
    %302 = tpu.matmul %299, %301, %cst_232 {dimension_numbers = #tpu.dot_dimension_numbers<[1], [0], [0], [1], [0, 0, 1, 1], [], []>} : vector<32x64xf32>, vector<64x64xf32>, vector<32x64xf32> -> vector<32x64xf32>
    %303 = arith.addf %296, %302 : vector<32x64xf32>
    %c25 = arith.constant 25 : index
    %c0_233 = arith.constant 0 : index
    %c0_234 = arith.constant 0 : index
    %304 = vector.load %arg6[%c25, %c0_233, %c0_234] : memref<30x64x64xf32, #tpu.memory_space<vmem>>, vector<1x64x64xf32>
    %305 = vector.shape_cast %304 : vector<1x64x64xf32> to vector<64x64xf32>
    %cst_235 = arith.constant dense<0.000000e+00> : vector<32x64xf32>
    %306 = tpu.matmul %274, %305, %cst_235 {dimension_numbers = #tpu.dot_dimension_numbers<[1], [0], [0], [1], [0, 0, 1, 1], [], []>} : vector<32x64xf32>, vector<64x64xf32>, vector<32x64xf32> -> vector<32x64xf32>
    %307 = arith.addf %303, %306 : vector<32x64xf32>
    %c5_236 = arith.constant 5 : index
    %c0_237 = arith.constant 0 : index
    %c0_238 = arith.constant 0 : index
    %308 = vector.load %arg2[%c5_236, %c0_237, %c0_238] : memref<9x32x32xf32, #tpu.memory_space<vmem>>, vector<1x32x32xf32>
    %309 = vector.shape_cast %308 : vector<1x32x32xf32> to vector<32x32xf32>
    %cst_239 = arith.constant dense<0.000000e+00> : vector<32x64xf32>
    %310 = tpu.matmul %309, %274, %cst_239 {dimension_numbers = #tpu.dot_dimension_numbers<[1], [0], [0], [1], [0, 0, 1, 1], [], []>} : vector<32x32xf32>, vector<32x64xf32>, vector<32x64xf32> -> vector<32x64xf32>
    %c26 = arith.constant 26 : index
    %c0_240 = arith.constant 0 : index
    %c0_241 = arith.constant 0 : index
    %311 = vector.load %arg6[%c26, %c0_240, %c0_241] : memref<30x64x64xf32, #tpu.memory_space<vmem>>, vector<1x64x64xf32>
    %312 = vector.shape_cast %311 : vector<1x64x64xf32> to vector<64x64xf32>
    %cst_242 = arith.constant dense<0.000000e+00> : vector<32x64xf32>
    %313 = tpu.matmul %310, %312, %cst_242 {dimension_numbers = #tpu.dot_dimension_numbers<[1], [0], [0], [1], [0, 0, 1, 1], [], []>} : vector<32x64xf32>, vector<64x64xf32>, vector<32x64xf32> -> vector<32x64xf32>
    %314 = arith.addf %307, %313 : vector<32x64xf32>
    %c6_243 = arith.constant 6 : index
    %c0_244 = arith.constant 0 : index
    %c0_245 = arith.constant 0 : index
    %315 = vector.load %arg2[%c6_243, %c0_244, %c0_245] : memref<9x32x32xf32, #tpu.memory_space<vmem>>, vector<1x32x32xf32>
    %316 = vector.shape_cast %315 : vector<1x32x32xf32> to vector<32x32xf32>
    %cst_246 = arith.constant dense<0.000000e+00> : vector<32x64xf32>
    %317 = tpu.matmul %316, %274, %cst_246 {dimension_numbers = #tpu.dot_dimension_numbers<[1], [0], [0], [1], [0, 0, 1, 1], [], []>} : vector<32x32xf32>, vector<32x64xf32>, vector<32x64xf32> -> vector<32x64xf32>
    %c27 = arith.constant 27 : index
    %c0_247 = arith.constant 0 : index
    %c0_248 = arith.constant 0 : index
    %318 = vector.load %arg6[%c27, %c0_247, %c0_248] : memref<30x64x64xf32, #tpu.memory_space<vmem>>, vector<1x64x64xf32>
    %319 = vector.shape_cast %318 : vector<1x64x64xf32> to vector<64x64xf32>
    %cst_249 = arith.constant dense<0.000000e+00> : vector<32x64xf32>
    %320 = tpu.matmul %317, %319, %cst_249 {dimension_numbers = #tpu.dot_dimension_numbers<[1], [0], [0], [1], [0, 0, 1, 1], [], []>} : vector<32x64xf32>, vector<64x64xf32>, vector<32x64xf32> -> vector<32x64xf32>
    %321 = arith.addf %314, %320 : vector<32x64xf32>
    %c7_250 = arith.constant 7 : index
    %c0_251 = arith.constant 0 : index
    %c0_252 = arith.constant 0 : index
    %322 = vector.load %arg2[%c7_250, %c0_251, %c0_252] : memref<9x32x32xf32, #tpu.memory_space<vmem>>, vector<1x32x32xf32>
    %323 = vector.shape_cast %322 : vector<1x32x32xf32> to vector<32x32xf32>
    %cst_253 = arith.constant dense<0.000000e+00> : vector<32x64xf32>
    %324 = tpu.matmul %323, %274, %cst_253 {dimension_numbers = #tpu.dot_dimension_numbers<[1], [0], [0], [1], [0, 0, 1, 1], [], []>} : vector<32x32xf32>, vector<32x64xf32>, vector<32x64xf32> -> vector<32x64xf32>
    %c28 = arith.constant 28 : index
    %c0_254 = arith.constant 0 : index
    %c0_255 = arith.constant 0 : index
    %325 = vector.load %arg6[%c28, %c0_254, %c0_255] : memref<30x64x64xf32, #tpu.memory_space<vmem>>, vector<1x64x64xf32>
    %326 = vector.shape_cast %325 : vector<1x64x64xf32> to vector<64x64xf32>
    %cst_256 = arith.constant dense<0.000000e+00> : vector<32x64xf32>
    %327 = tpu.matmul %324, %326, %cst_256 {dimension_numbers = #tpu.dot_dimension_numbers<[1], [0], [0], [1], [0, 0, 1, 1], [], []>} : vector<32x64xf32>, vector<64x64xf32>, vector<32x64xf32> -> vector<32x64xf32>
    %328 = arith.addf %321, %327 : vector<32x64xf32>
    %c8_257 = arith.constant 8 : index
    %c0_258 = arith.constant 0 : index
    %c0_259 = arith.constant 0 : index
    %329 = vector.load %arg2[%c8_257, %c0_258, %c0_259] : memref<9x32x32xf32, #tpu.memory_space<vmem>>, vector<1x32x32xf32>
    %330 = vector.shape_cast %329 : vector<1x32x32xf32> to vector<32x32xf32>
    %cst_260 = arith.constant dense<0.000000e+00> : vector<32x64xf32>
    %331 = tpu.matmul %330, %274, %cst_260 {dimension_numbers = #tpu.dot_dimension_numbers<[1], [0], [0], [1], [0, 0, 1, 1], [], []>} : vector<32x32xf32>, vector<32x64xf32>, vector<32x64xf32> -> vector<32x64xf32>
    %c29 = arith.constant 29 : index
    %c0_261 = arith.constant 0 : index
    %c0_262 = arith.constant 0 : index
    %332 = vector.load %arg6[%c29, %c0_261, %c0_262] : memref<30x64x64xf32, #tpu.memory_space<vmem>>, vector<1x64x64xf32>
    %333 = vector.shape_cast %332 : vector<1x64x64xf32> to vector<64x64xf32>
    %cst_263 = arith.constant dense<0.000000e+00> : vector<32x64xf32>
    %334 = tpu.matmul %331, %333, %cst_263 {dimension_numbers = #tpu.dot_dimension_numbers<[1], [0], [0], [1], [0, 0, 1, 1], [], []>} : vector<32x64xf32>, vector<64x64xf32>, vector<32x64xf32> -> vector<32x64xf32>
    %335 = arith.addf %328, %334 : vector<32x64xf32>
    %336 = vector.extract_strided_slice %0 {offsets = [10, 0], sizes = [1, 64], strides = [1, 1]} : vector<11x128xf32> to vector<1x64xf32>
    %337 = vector.broadcast %336 : vector<1x64xf32> to vector<32x64xf32>
    %338 = arith.addf %335, %337 : vector<32x64xf32>
    %339 = arith.negf %338 : vector<32x64xf32>
    %340 = math.exp %339 : vector<32x64xf32>
    %cst_264 = arith.constant 1.000000e+00 : f32
    %341 = vector.broadcast %cst_264 : f32 to vector<32x64xf32>
    %342 = arith.addf %341, %340 : vector<32x64xf32>
    %343 = arith.divf %341, %342 : vector<32x64xf32>
    %344 = arith.mulf %338, %343 : vector<32x64xf32>
    %345 = arith.addf %344, %262 : vector<32x64xf32>
    %346 = tpu.concatenate %345, %96 in 1 : vector<32x64xf32>, vector<32x64xf32> -> vector<32x128xf32>
    %c1_265 = arith.constant 1 : index
    %c0_266 = arith.constant 0 : index
    %c0_267 = arith.constant 0 : index
    %347 = vector.load %arg7[%c1_265, %c0_266, %c0_267] : memref<3x128x128xf32, #tpu.memory_space<vmem>>, vector<1x128x128xf32>
    %348 = vector.shape_cast %347 : vector<1x128x128xf32> to vector<128x128xf32>
    %cst_268 = arith.constant dense<0.000000e+00> : vector<32x128xf32>
    %349 = tpu.matmul %346, %348, %cst_268 {dimension_numbers = #tpu.dot_dimension_numbers<[1], [0], [0], [1], [0, 0, 1, 1], [], []>} : vector<32x128xf32>, vector<128x128xf32>, vector<32x128xf32> -> vector<32x128xf32>
    %350 = vector.extract_strided_slice %0 {offsets = [3, 0], sizes = [1, 128], strides = [1, 1]} : vector<11x128xf32> to vector<1x128xf32>
    %351 = vector.broadcast %350 : vector<1x128xf32> to vector<32x128xf32>
    %352 = arith.addf %349, %351 : vector<32x128xf32>
    %353 = arith.negf %352 : vector<32x128xf32>
    %354 = math.exp %353 : vector<32x128xf32>
    %cst_269 = arith.constant 1.000000e+00 : f32
    %355 = vector.broadcast %cst_269 : f32 to vector<32x128xf32>
    %356 = arith.addf %355, %354 : vector<32x128xf32>
    %357 = arith.divf %355, %356 : vector<32x128xf32>
    %358 = arith.mulf %352, %357 : vector<32x128xf32>
    %c0_270 = arith.constant 0 : index
    %c0_271 = arith.constant 0 : index
    %359 = vector.load %arg3[%c0_270, %c0_271] : memref<2x32xf32, #tpu.memory_space<vmem>>, vector<2x32xf32>
    %cst_272 = arith.constant dense<0.000000e+00> : vector<2x128xf32>
    %360 = tpu.matmul %359, %358, %cst_272 {dimension_numbers = #tpu.dot_dimension_numbers<[1], [0], [0], [1], [0, 0, 1, 1], [], []>} : vector<2x32xf32>, vector<32x128xf32>, vector<2x128xf32> -> vector<2x128xf32>
    %c2_273 = arith.constant 2 : index
    %c0_274 = arith.constant 0 : index
    %c0_275 = arith.constant 0 : index
    %361 = vector.load %arg7[%c2_273, %c0_274, %c0_275] : memref<3x128x128xf32, #tpu.memory_space<vmem>>, vector<1x128x128xf32>
    %362 = vector.shape_cast %361 : vector<1x128x128xf32> to vector<128x128xf32>
    %cst_276 = arith.constant dense<0.000000e+00> : vector<2x128xf32>
    %363 = tpu.matmul %360, %362, %cst_276 {dimension_numbers = #tpu.dot_dimension_numbers<[1], [0], [0], [1], [0, 0, 1, 1], [], []>} : vector<2x128xf32>, vector<128x128xf32>, vector<2x128xf32> -> vector<2x128xf32>
    %364 = vector.extract_strided_slice %0 {offsets = [4, 0], sizes = [1, 128], strides = [1, 1]} : vector<11x128xf32> to vector<1x128xf32>
    %365 = vector.broadcast %364 : vector<1x128xf32> to vector<2x128xf32>
    %366 = arith.addf %363, %365 : vector<2x128xf32>
    %367 = vector.extract_strided_slice %366 {offsets = [0, 0], sizes = [2, 6], strides = [1, 1]} : vector<2x128xf32> to vector<2x6xf32>
    %368 = tpu.iota {dimensions = array<i32: 1>} : vector<2x6xi32>
    %c4_i32 = arith.constant 4 : i32
    %369 = vector.broadcast %c4_i32 : i32 to vector<2x6xi32>
    %370 = arith.cmpi slt, %368, %369 : vector<2x6xi32>
    %371 = arith.negf %367 : vector<2x6xf32>
    %372 = math.exp %371 : vector<2x6xf32>
    %cst_277 = arith.constant 1.000000e+00 : f32
    %373 = vector.broadcast %cst_277 : f32 to vector<2x6xf32>
    %374 = arith.addf %373, %372 : vector<2x6xf32>
    %375 = arith.divf %373, %374 : vector<2x6xf32>
    %376 = math.tanh %367 : vector<2x6xf32>
    %377 = arith.select %370, %375, %376 : vector<2x6xi1>, vector<2x6xf32>
    %c0_278 = arith.constant 0 : index
    %c0_279 = arith.constant 0 : index
    %378 = vector.load %arg9[%c0_278, %c0_279] : memref<2x6xf32, #tpu.memory_space<vmem>>, vector<2x6xf32>
    tpu.vector_store %arg9[%c0_278, %c0_279], %377 {strides = array<i32>} : memref<2x6xf32, #tpu.memory_space<vmem>>, vector<2x6xf32>,
    return
  }
  func.func @transform_0(%arg0: i32) -> (i32, i32) {
    %c0_i32 = arith.constant 0 : i32
    %c0_i32_0 = arith.constant 0 : i32
    %c0_i32_1 = arith.constant 0 : i32
    return %c0_i32, %c0_i32_0 : i32, i32
  }
  func.func @transform_1(%arg0: i32) -> (i32, i32, i32) {
    %c0_i32 = arith.constant 0 : i32
    %c0_i32_0 = arith.constant 0 : i32
    %c0_i32_1 = arith.constant 0 : i32
    %c0_i32_2 = arith.constant 0 : i32
    return %c0_i32, %c0_i32_0, %c0_i32_1 : i32, i32, i32
  }
  func.func @transform_2(%arg0: i32) -> (i32, i32) {
    %c0_i32 = arith.constant 0 : i32
    %c0_i32_0 = arith.constant 0 : i32
    %c0_i32_1 = arith.constant 0 : i32
    return %c0_i32, %c0_i32_0 : i32, i32
  }
  func.func @transform_3(%arg0: i32) -> (i32, i32) {
    %c0_i32 = arith.constant 0 : i32
    %c0_i32_0 = arith.constant 0 : i32
    %c0_i32_1 = arith.constant 0 : i32
    return %c0_i32, %c0_i32_0 : i32, i32
  }
  func.func @transform_4(%arg0: i32) -> (i32, i32, i32) {
    %c0_i32 = arith.constant 0 : i32
    %c0_i32_0 = arith.constant 0 : i32
    %c0_i32_1 = arith.constant 0 : i32
    %c0_i32_2 = arith.constant 0 : i32
    return %c0_i32, %c0_i32_0, %c0_i32_1 : i32, i32, i32
  }
  func.func @transform_5(%arg0: i32) -> (i32, i32, i32) {
    %c0_i32 = arith.constant 0 : i32
    %c0_i32_0 = arith.constant 0 : i32
    %c0_i32_1 = arith.constant 0 : i32
    %c0_i32_2 = arith.constant 0 : i32
    return %c0_i32, %c0_i32_0, %c0_i32_1 : i32, i32, i32
  }
  func.func @transform_6(%arg0: i32) -> (i32, i32, i32) {
    %c0_i32 = arith.constant 0 : i32
    %c0_i32_0 = arith.constant 0 : i32
    %c0_i32_1 = arith.constant 0 : i32
    %c0_i32_2 = arith.constant 0 : i32
    return %c0_i32, %c0_i32_0, %c0_i32_1 : i32, i32, i32
  }
  func.func @transform_7(%arg0: i32) -> (i32, i32) {
    %c0_i32 = arith.constant 0 : i32
    %c0_i32_0 = arith.constant 0 : i32
    %c0_i32_1 = arith.constant 0 : i32
    return %c0_i32, %c0_i32_0 : i32, i32
  }
  func.func @transform_8(%arg0: i32) -> (i32, i32) {
    %c0_i32 = arith.constant 0 : i32
    %c0_i32_0 = arith.constant 0 : i32
    %c0_i32_1 = arith.constant 0 : i32
    return %c0_i32, %c0_i32_0 : i32, i32
  }
}

</mosaic_0001>

<bundles_post_ra>
// kernel: detect_head_forward.1
= control target key start
LH: loop header
LB: loop body
LE: loop exit
PB: predicated region body
PF: predicated region fallthrough
CT: control target
= control target key end

     0   :  { %vm66_vm0 = vcmask 883712   ;;  %s14341_s0 = inlined_call_operand.vmem [shape: f32[128,108], index: 0, kind: input, shape index: {}]   ;;  %s14342_s1 = inlined_call_operand.vmem [shape: f32[9,32,32], index: 1, kind: input, shape index: {}]   ;;  %s14343_s2 = inlined_call_operand.vmem [shape: f32[2,32], index: 2, kind: input, shape index: {}]   ;;  %s14344_s3 = inlined_call_operand.vmem [shape: f32[108,32], index: 3, kind: input, shape index: {}]   ;;  %s14345_s4 = inlined_call_operand.vmem [shape: f32[9,32,128], index: 4, kind: input, shape index: {}]   ;;  %s14346_s5 = inlined_call_operand.vmem [shape: f32[30,64,64], index: 5, kind: input, shape index: {}]   ;;  %s14347_s6 = inlined_call_operand.vmem [shape: f32[3,128,128], index: 6, kind: input, shape index: {}]   ;;  %s14348_s7 = inlined_call_operand.vmem [shape: f32[11,128], index: 7, kind: input, shape index: {}]   ;;  %s14349_s8 = inlined_call_operand.hbm [shape: f32[2,6], index: 8, kind: output, shape index: {}]  }
   0x1   :  { %v48_v0 = vld [vmem:[%s14344_s3] sm:$0xff]  ;;  %v49_v1 = vld [vmem:[%s14344_s3 + $0x8] sm:$0xff]  ;;  %v50_v2 = vld [vmem:[%s14344_s3 + $0x10] sm:$0xff] }
   0x2   :  { %v10690_v3 = vpack.c.bf16 %v49_v1, %v48_v0  ;;  %v51_v4 = vld [vmem:[%s14344_s3 + $0x18] sm:$0xff]  ;;  %v52_v6 = vld [vmem:[%s14344_s3 + $0x20] sm:$0xff]  ;;  %v53_v7 = vld [vmem:[%s14344_s3 + $0x28] sm:$0xff] }
   0x3   :  { %v10694_v5 = vpack.c.bf16 %v51_v4, %v50_v2  ;;  %v10698_v8 = vpack.c.bf16 %v53_v7, %v52_v6  ;;  %v32_v9 = vld [vmem:[%s14341_s0] sm:$0xff]  ;;  %v54_v10 = vld [vmem:[%s14344_s3 + $0x30] sm:$0xff]  ;;  %v55_v11 = vld [vmem:[%s14344_s3 + $0x38] sm:$0xff] }
   0x4   :  { %10691 = vmatprep.subr.bf16.mxu0 %v10690_v3  ;;  %9352 = vmatprep.mubr.msk.f32.mxu0 %vm66_vm0, %v32_v9  ;;  %v10702_v12 = vpack.c.bf16 %v55_v11, %v54_v10  ;;  %v56_v13 = vld [vmem:[%s14344_s3 + $0x40] sm:$0xff]  ;;  %v57_v14 = vld [vmem:[%s14344_s3 + $0x48] sm:$0xff] }
   0x5   :  { %10693 = vmatpush3.bf16.msra.mxu0 %v10690_v3 }
   0x6   :  { %10695 = vmatprep.subr.bf16.mxu0 %v10694_v5 }
   0x9   :  { %10697 = vmatpush3.bf16.msra.mxu0 %v10694_v5 }
   0xa   :  { %10699 = vmatprep.subr.bf16.mxu0 %v10698_v8 }
   0xb   :  { %13 = vsyncpa [#allocation3], 0  ;;  %v10706_v15 = vpack.c.bf16 %v57_v14, %v56_v13  ;;  %v58_v16 = vld [vmem:[%s14344_s3 + $0x50] sm:$0xff]  ;;  %v59_v17 = vld [vmem:[%s14344_s3 + $0x58] sm:$0xff]  ;;  %vm115_vm1 = vcmask 1043456   ;;  %vm12003_vm2 = vmmov 1   ;;  %v62_v38 = vlaneseq }
   0xc   :  { %v10710_v18 = vpack.c.bf16 %v59_v17, %v58_v16  ;;  %v60_v19 = vld [vmem:[%s14344_s3 + $0x60] sm:$0xff]  ;;  %v61_v20 = vld [vmem:[%s14344_s3 + $0x68] sm:$0xf]  ;;  %vm10715_vm3 = vmpackc.low %vm115_vm1, %vm12003_vm2  ;;  %vm380_vm4 = vcmask 261120   ;;  %vm1978_vm5 = vcmask 523264   ;;  %vm12005_vm6 = vmmov 0  }
   0xd   :  { %10701 = vmatpush3.bf16.msra.mxu0 %v10698_v8  ;;  %v10714_v21 = vpack.c.bf16 %v61_v20, %v60_v19  ;;  %v33_v22 = vld [vmem:[%s14341_s0 + $0x8] sm:$0xff]  ;;  %v34_v23 = vld [vmem:[%s14341_s0 + $0x10] sm:$0xff]  ;;  %v35_v24 = vld [vmem:[%s14341_s0 + $0x18] sm:$0xff]  ;;  %v12167_v39 = vshrl.u32 %v62_v38, 7  ;;  %vm7885_vm8 = vcmask 41984  }
   0xe   :  { %10703 = vmatprep.subr.bf16.mxu0 %v10702_v12  ;;  %v36_v25 = vld [vmem:[%s14341_s0 + $0x20] sm:$0xff]  ;;  %v37_v26 = vld [vmem:[%s14341_s0 + $0x28] sm:$0xff]  ;;  %v38_v27 = vld [vmem:[%s14341_s0 + $0x30] sm:$0xff] }
   0xf   :  { %v39_v28 = vld [vmem:[%s14341_s0 + $0x38] sm:$0xff]  ;;  %v40_v29 = vld [vmem:[%s14341_s0 + $0x40] sm:$0xff]  ;;  %v41_v30 = vld [vmem:[%s14341_s0 + $0x48] sm:$0xff]  ;;  %v64_v40 = vsub.s32 0, %v12167_v39 }
  0x10   :  { %v42_v31 = vld [vmem:[%s14341_s0 + $0x50] sm:$0xff]  ;;  %v43_v32 = vld [vmem:[%s14341_s0 + $0x58] sm:$0xff]  ;;  %v44_v33 = vld [vmem:[%s14341_s0 + $0x60] sm:$0xff] }
  0x11   :  { %10705 = vmatpush3.bf16.msra.mxu0 %v10702_v12  ;;  %v45_v34 = vld [vmem:[%s14341_s0 + $0x68] sm:$0xff]  ;;  %v46_v35 = vld [vmem:[%s14341_s0 + $0x70] sm:$0xff]  ;;  %v47_v36 = vld [vmem:[%s14341_s0 + $0x78] sm:$0xff] }
  0x12   :  { %10707 = vmatprep.subr.bf16.mxu0 %v10706_v15  ;;  %v12162_v37 = vld [vmem:[%s14342_s1] sm:$0xff] }
  0x13   :  { %9384 = vmatprep.mubr.msk.f32.mxu1 %vm380_vm4, %v12162_v37  ;;  %v12173_v41 = vld [vmem:[%s14348_s7] sm:$0xff] }
  0x14   :  { %v65_v42 = vrot.slane %v12173_v41, %v64_v40 }
  0x15   :  { %10709 = vmatpush3.bf16.msra.mxu0 %v10706_v15 }
  0x16   :  { %10711 = vmatprep.subr.bf16.mxu0 %v10710_v18 }
  0x19   :  { %10713 = vmatpush3.bf16.msra.mxu0 %v10710_v18 }
  0x1a   :  { %10716 = vmatprep.subr.msk.bf16.mxu0 %vm10715_vm3, %v10714_v21 }
  0x1d   :  { %10719 = vmatpush3.bf16.msk.msra.mxu0 %vm10715_vm3, %v10714_v21 }
  0x20   :  { %9353 = vmatmul.mubr.msk.f32.vlgmr.msra.gmra.mrb[0].mxu0 %vm66_vm0, %v33_v22 }
  0x21   :  { %9355 = vmatprep.mubr.msk.f32.mxu0 %vm66_vm0, %v34_v23 }
  0x24   :  { %9356 = vmatmul.mubr.msk.f32.gmra.mrb[2].mxu0 %vm66_vm0, %v35_v24 }
  0x25   :  { %9358 = vmatprep.mubr.msk.f32.mxu0 %vm66_vm0, %v36_v25 }
  0x28   :  { %9359 = vmatmul.mubr.msk.f32.gmra.mrb[4].mxu0 %vm66_vm0, %v37_v26 }
  0x29   :  { %9361 = vmatprep.mubr.msk.f32.mxu0 %vm66_vm0, %v38_v27 }
  0x2c   :  { %9362 = vmatmul.mubr.msk.f32.gmra.mrb[6].mxu0 %vm66_vm0, %v39_v28 }
  0x2d   :  { %9364 = vmatprep.mubr.msk.f32.mxu0 %vm66_vm0, %v40_v29 }
  0x30   :  { %9365 = vmatmul.mubr.msk.f32.gmra.mrb[8].mxu0 %vm66_vm0, %v41_v30 }
  0x31   :  { %9367 = vmatprep.mubr.msk.f32.mxu0 %vm66_vm0, %v42_v31 }
  0x34   :  { %9368 = vmatmul.mubr.msk.f32.gmra.mrb[10].mxu0 %vm66_vm0, %v43_v32 }
  0x35   :  { %9370 = vmatprep.mubr.msk.f32.mxu0 %vm66_vm0, %v44_v33 }
  0x38   :  { %9371 = vmatmul.mubr.msk.f32.gmra.mrb[12].mxu0 %vm66_vm0, %v45_v34 }
  0x39   :  { %9373 = vmatprep.mubr.msk.f32.mxu0 %vm66_vm0, %v46_v35 }
  0x3c   :  { %9374 = vmatmul.mubr.msk.f32.gmra.mrb[14].mxu0 %vm66_vm0, %v47_v36 }
  0xf3   :  { %v9354_v43 = vpop.f32.mrb[0].mxu0 }
  0xf4   :  { %v12178_v44 = vadd.f32 %v9354_v43, %v65_v42  ;;  %v185_v45 = vpop.f32.mrb[1].mxu0 }
  0xf5   :  { %v12180_v46 = vadd.f32 %v185_v45, %v65_v42 }
  0xf7   :  { %v9357_v47 = vpop.f32.mrb[2].mxu0 }
  0xf8   :  { %v12182_v48 = vadd.f32 %v9357_v47, %v65_v42  ;;  %v195_v49 = vpop.f32.mrb[3].mxu0 }
  0xf9   :  { %v12184_v50 = vadd.f32 %v195_v49, %v65_v42 }
  0xfb   :  { %v9360_v51 = vpop.f32.mrb[4].mxu0 }
  0xfc   :  { %v12186_v52 = vadd.f32 %v9360_v51, %v65_v42  ;;  %v205_v53 = vpop.f32.mrb[5].mxu0 }
  0xfd   :  { %v12188_v54 = vadd.f32 %v205_v53, %v65_v42 }
  0xff   :  { %v9363_v55 = vpop.f32.mrb[6].mxu0 }
 0x100   :  { %v12190_v56 = vadd.f32 %v9363_v55, %v65_v42  ;;  %v215_v57 = vpop.f32.mrb[7].mxu0 }
 0x101   :  { %v12192_v58 = vadd.f32 %v215_v57, %v65_v42 }
 0x103   :  { %v9366_v59 = vpop.f32.mrb[8].mxu0 }
 0x104   :  { %v225_v60 = vpop.f32.mrb[9].mxu0  ;;  %v12194_v61 = vadd.f32 %v9366_v59, %v65_v42 }
 0x105   :  { %v12196_v0 = vadd.f32 %v225_v60, %v65_v42 }
 0x106   :  { %v7927_v1 = vmul.f32 -1.442695, %v12194_v61 }
 0x107   :  { %v9369_v62 = vpop.f32.mrb[10].mxu0  ;;  %v7926_v6 = vmul.f32 -1.442695, %v12196_v0 }
 0x108   :  { %v235_v63 = vpop.f32.mrb[11].mxu0  ;;  %v12199_v3 = vadd.f32 %v9369_v62, %v65_v42  ;;  %11731 = vpow2.f32 %v7927_v1 }
 0x109   :  { %v12202_v7 = vadd.f32 %v235_v63, %v65_v42 }
 0x10a   :  { %v7929_v12 = vmul.f32 -1.442695, %v12199_v3 }
 0x10b   :  { %v9372_v2 = vpop.f32.mrb[12].mxu0  ;;  %v7928_v15 = vmul.f32 -1.442695, %v12202_v7 }
 0x10c   :  { %v251_v4 = vadd.f32 %v9372_v2, %v65_v42  ;;  %v245_v5 = vpop.f32.mrb[13].mxu0 }
 0x10d   :  { %v246_v8 = vadd.f32 %v245_v5, %v65_v42 }
 0x10e   :  { %v7931_v9 = vmul.f32 -1.442695, %v251_v4 }
 0x10f   :  { %v7930_v10 = vmul.f32 -1.442695, %v246_v8  ;;  %v9375_v11 = vpop.f32.mrb[14].mxu0 }
 0x110   :  { %11733 = vpow2.f32 %v7931_v9  ;;  %v261_v13 = vadd.f32 %v9375_v11, %v65_v42  ;;  %v255_v14 = vpop.f32.mrb[15].mxu0  ;;  %v12282_v9 = vld [vmem:[%s14342_s1 + $0x30] sm:$0xff]  ;;  %v7946_v11 = vld [vmem:[%s14345_s4 + $0x20] sm:$0xff] }
 0x111   :  { %11735 = vpow2.f32 %v7926_v6  ;;  %v256_v16 = vadd.f32 %v255_v14, %v65_v42  ;;  %v12263_v6 = vld [vmem:[%s14342_s1 + $0x18] sm:$0xff]  ;;  %v7948_v14 = vld [vmem:[%s14345_s4 + $0x30] sm:$0xff] }
 0x112   :  { %11737 = vpow2.f32 %v7930_v10  ;;  %v7933_v17 = vmul.f32 -1.442695, %v261_v13  ;;  %v11732_v19 = vpop.eup %11731  ;;  %v12291_v10 = vld [vmem:[%s14342_s1 + $0x38] sm:$0xff] }
 0x113   :  { %v7932_v18 = vmul.f32 -1.442695, %v256_v16  ;;  %11739 = vpow2.f32 %v7929_v12  ;;  %v321_v24 = vadd.f32 1.0, %v11732_v19  ;;  %v7947_v12 = vld [vmem:[%s14345_s4 + $0x28] sm:$0xff] }
 0x114   :  { %11741 = vpow2.f32 %v7928_v15  ;;  %v7949_v15 = vld [vmem:[%s14345_s4 + $0x38] sm:$0xff] }
 0x115   :  { %11743 = vpow2.f32 %v7933_v17  ;;  %v478_v17 = vld [vmem:[%s14345_s4] sm:$0xff] }
 0x116   :  { %11745 = vpow2.f32 %v7932_v18  ;;  %v479_v18 = vld [vmem:[%s14345_s4 + $0x8] sm:$0xff] }
 0x117   :  { %v10744_v19 = vpack.c.bf16 %v479_v18, %v478_v17 }
 0x11a   :  { %v11734_v20 = vpop.eup %11733 }
 0x11b   :  { %v11736_v21 = vpop.eup %11735  ;;  %v325_v22 = vadd.f32 1.0, %v11734_v20  ;;  %v7923_v20 = vmul.f32 -1.442695, %v12186_v52 }
 0x11c   :  { %v11738_v23 = vpop.eup %11737  ;;  %v320_v27 = vadd.f32 1.0, %v11736_v21  ;;  %v7922_v21 = vmul.f32 -1.442695, %v12188_v54 }
 0x11d   :  { %11747 = vrcp.f32 %v325_v22  ;;  %v324_v25 = vadd.f32 1.0, %v11738_v23  ;;  %v11740_v26 = vpop.eup %11739 }
 0x11e   :  { %v11742_v28 = vpop.eup %11741  ;;  %v323_v31 = vadd.f32 1.0, %v11740_v26 }
 0x11f   :  { %11749 = vrcp.f32 %v324_v25  ;;  %v11744_v29 = vpop.eup %11743  ;;  %v322_v33 = vadd.f32 1.0, %v11742_v28  ;;  %v481_v28 = vld [vmem:[%s14345_s4 + $0x18] sm:$0xff] }
 0x120   :  { %v11746_v30 = vpop.eup %11745  ;;  %11751 = vrcp.f32 %v321_v24  ;;  %v327_v32 = vadd.f32 1.0, %v11744_v29 }
 0x121   :  { %11753 = vrcp.f32 %v320_v27  ;;  %v326_v34 = vadd.f32 1.0, %v11746_v30  ;;  %v480_v27 = vld [vmem:[%s14345_s4 + $0x10] sm:$0xff] }
 0x122   :  { %11755 = vrcp.f32 %v327_v32 }
 0x123   :  { %11757 = vrcp.f32 %v326_v34 }
 0x124   :  { %11759 = vrcp.f32 %v323_v31 }
 0x125   :  { %11761 = vrcp.f32 %v322_v33  ;;  %v10748_v33 = vpack.c.bf16 %v481_v28, %v480_v27  ;;  %v7979_v27 = vld [vmem:[%s14345_s4 + $0x68] sm:$0xff] }
 0x126   :  { %11763 = vpow2.f32 %v7923_v20 }
 0x127   :  { %v11748_v35 = vpop.eup %11747  ;;  %11765 = vpow2.f32 %v7922_v21 }
 0x128   :  { %v12206_v36 = vmul.f32 %v11748_v35, %v251_v4  ;;  %v12247_v4 = vld [vmem:[%s14342_s1 + $0x8] sm:$0xff] }
 0x129   :  { %v11750_v42 = vpop.eup %11749 }
 0x12a   :  { %v12208_v43 = vmul.f32 %v11750_v42, %v246_v8  ;;  %v11752_v45 = vpop.eup %11751  ;;  %v12277_v8 = vld [vmem:[%s14342_s1 + $0x28] sm:$0xff] }
 0x12b   :  { %v11754_v47 = vpop.eup %11753  ;;  %v12219_v59 = vmul.f32 %v11752_v45, %v12194_v61  ;;  %v7962_v45 = vld [vmem:[%s14345_s4 + $0x40] sm:$0xff] }
 0x12c   :  { %v12212_v49 = vpack.c.bf16 %v12206_v36, %v12208_v43  ;;  %v11756_v51 = vpop.eup %11755  ;;  %v12222_v60 = vmul.f32 %v11754_v47, %v12196_v0  ;;  %v7963_v47 = vld [vmem:[%s14345_s4 + $0x48] sm:$0xff] }
 0x12d   :  { %v11758_v53 = vpop.eup %11757  ;;  %v12214_v55 = vmul.f32 %v11756_v51, %v261_v13  ;;  %v10736_v13 = vpack.c.bf16 %v7947_v12, %v7946_v11  ;;  %v10760_v51 = vpack.c.bf16 %v7963_v47, %v7962_v45  ;;  %v12378_v12 = vld [vmem:[%s14342_s1 + $0x70] sm:$0xff] }
 0x12e   :  { %10721 = vmatprep.subr.bf16.mxu1 %v12212_v49  ;;  %10801 = vmatprep.subr.bf16.mxu0 %v12212_v49  ;;  %v11760_v57 = vpop.eup %11759  ;;  %v12224_v62 = vmul.f32 %v11758_v53, %v256_v16  ;;  %v10728_v0 = vpack.c.bf16 %v12219_v59, %v12222_v60  ;;  %v10740_v16 = vpack.c.bf16 %v7949_v15, %v7948_v14  ;;  %v7964_v53 = vld [vmem:[%s14345_s4 + $0x50] sm:$0xff]  ;;  %v7925_v14 = vmul.f32 -1.442695, %v12190_v56 }
 0x12f   :  { %10723 = vmatpush3.bf16.msra.mxu1 %v12212_v49  ;;  %10803 = vmatpush3.bf16.msra.mxu0 %v12212_v49  ;;  %v11762_v63 = vpop.eup %11761  ;;  %v12233_v2 = vmul.f32 %v11760_v57, %v12199_v3  ;;  %v12252_v3 = vld [vmem:[%s14342_s1 + $0x10] sm:$0xff]  ;;  %v7965_v57 = vld [vmem:[%s14345_s4 + $0x58] sm:$0xff]  ;;  %v7924_v15 = vmul.f32 -1.442695, %v12192_v58 }
 0x130   :  { %v12230_v1 = vpack.c.bf16 %v12214_v55, %v12224_v62  ;;  %v12236_v61 = vmul.f32 %v11762_v63, %v12202_v7  ;;  %v12268_v7 = vld [vmem:[%s14342_s1 + $0x20] sm:$0xff]  ;;  %v11764_v26 = vpop.eup %11763 }
 0x131   :  { %v11766_v29 = vpop.eup %11765  ;;  %v317_v31 = vadd.f32 1.0, %v11764_v26  ;;  %v7978_v26 = vld [vmem:[%s14345_s4 + $0x60] sm:$0xff] }
 0x132   :  { %10725 = vmatprep.subr.bf16.mxu1 %v12230_v1  ;;  %10805 = vmatprep.subr.bf16.mxu0 %v12230_v1  ;;  %v10732_v5 = vpack.c.bf16 %v12233_v2, %v12236_v61  ;;  %v316_v34 = vadd.f32 1.0, %v11766_v29  ;;  %v10776_v29 = vpack.c.bf16 %v7979_v27, %v7978_v26  ;;  %v7994_v27 = vld [vmem:[%s14345_s4 + $0xa0] sm:$0xff] }
 0x133   :  { %10727 = vmatpush3.bf16.msra.mxu1 %v12230_v1  ;;  %10807 = vmatpush3.bf16.msra.mxu0 %v12230_v1  ;;  %11767 = vrcp.f32 %v317_v31  ;;  %v7981_v31 = vld [vmem:[%s14345_s4 + $0x78] sm:$0xff] }
 0x134   :  { %10729 = vmatprep.subr.bf16.mxu1 %v10728_v0  ;;  %11769 = vrcp.f32 %v316_v34  ;;  %v7987_v34 = vld [vmem:[%s14345_s4 + $0x88] sm:$0xff] }
 0x135   :  { %11771 = vpow2.f32 %v7925_v14 }
 0x136   :  { %9385 = vmatmul.mubr.msk.f32.vlgmr.msra.gmra.mrb[0].mxu1 %vm380_vm4, %v12247_v4  ;;  %11773 = vpow2.f32 %v7924_v15 }
 0x137   :  { %10731 = vmatpush3.bf16.msra.mxu1 %v10728_v0  ;;  %9387 = vmatprep.mubr.msk.f32.mxu1 %vm380_vm4, %v12252_v3 }
 0x138   :  { %10733 = vmatprep.subr.bf16.mxu1 %v10732_v5 }
 0x13a   :  { %9388 = vmatmul.mubr.msk.f32.gmra.mrb[2].mxu1 %vm380_vm4, %v12263_v6 }
 0x13b   :  { %10735 = vmatpush3.bf16.msra.mxu1 %v10732_v5  ;;  %9398 = vmatprep.mubr.msk.f32.mxu1 %vm380_vm4, %v12268_v7 }
 0x13c   :  { %10737 = vmatprep.subr.bf16.mxu1 %v10736_v13 }
 0x13d   :  { %v11768_v63 = vpop.eup %11767 }
 0x13e   :  { %9399 = vmatmul.mubr.msk.f32.vlgmr.msra.gmra.mrb[4].mxu1 %vm380_vm4, %v12277_v8  ;;  %v11770_v0 = vpop.eup %11769  ;;  %v12348_v5 = vmul.f32 %v11768_v63, %v12186_v52  ;;  %v12364_v52 = vld [vmem:[%s14342_s1 + $0x60] sm:$0xff]  ;;  %v7920_v63 = vmul.f32 -1.442695, %v12184_v50 }
 0x13f   :  { %9401 = vmatprep.mubr.msk.f32.mxu1 %vm380_vm4, %v12282_v9  ;;  %10739 = vmatpush3.bf16.msra.mxu1 %v10736_v13  ;;  %v12351_v11 = vmul.f32 %v11770_v0, %v12188_v54  ;;  %v12369_v54 = vld [vmem:[%s14342_s1 + $0x68] sm:$0xff]  ;;  %v12385_v13 = vld [vmem:[%s14342_s1 + $0x78] sm:$0xff]  ;;  %v7921_v0 = vmul.f32 -1.442695, %v12182_v48 }
 0x140   :  { %10741 = vmatprep.subr.bf16.mxu1 %v10740_v16  ;;  %9524 = vmatprep.mubr.msk.f32.mxu0 %vm380_vm4, %v12364_v52 }
 0x141   :  { %9525 = vmatmul.mubr.msk.f32.vlgmr.msra.gmra.mrb[16].mxu0 %vm380_vm4, %v12369_v54 }
 0x142   :  { %9402 = vmatmul.mubr.msk.f32.gmra.mrb[6].mxu1 %vm380_vm4, %v12291_v10  ;;  %9527 = vmatprep.mubr.msk.f32.mxu0 %vm380_vm4, %v12378_v12 }
 0x143   :  { %10743 = vmatpush3.bf16.msra.mxu1 %v10740_v16  ;;  %v11772_v16 = vpop.eup %11771 }
 0x144   :  { %10745 = vmatprep.subr.bf16.mxu1 %v10744_v19  ;;  %v11774_v17 = vpop.eup %11773  ;;  %v319_v18 = vadd.f32 1.0, %v11772_v16 }
 0x145   :  { %9528 = vmatmul.mubr.msk.f32.gmra.mrb[18].mxu0 %vm380_vm4, %v12385_v13 }
 0x146   :  { %11775 = vrcp.f32 %v319_v18 }
 0x150   :  { %v11776_v20 = vpop.eup %11775 }
 0x209   :  { %v9386_v22 = vpop.f32.mrb[0].mxu1 }
 0x20a   :  { %v459_v23 = vpop.f32.mrb[1].mxu1 }
 0x20d   :  { %v9389_v24 = vpop.f32.mrb[2].mxu1 }
 0x20e   :  { %v469_v25 = vpop.f32.mrb[3].mxu1 }
 0x211   :  { %v9400_v30 = vpop.f32.mrb[4].mxu1 }
 0x212   :  { %v565_v32 = vpop.f32.mrb[5].mxu1 }
 0x213   :  { %9412 = vmatprep.mubr.msk.f32.mxu1 %vm380_vm4, %v565_v32 }
 0x214   :  { %9413 = vmatmul.mubr.msk.f32.vlgmr.msra.gmra.mrb[8].mxu1 %vm380_vm4, %v9400_v30  ;;  %v7980_v30 = vld [vmem:[%s14345_s4 + $0x70] sm:$0xff] }
 0x215   :  { %10747 = vmatpush3.bf16.msra.mxu1 %v10744_v19  ;;  %v9403_v35 = vpop.f32.mrb[6].mxu1  ;;  %v318_v19 = vadd.f32 1.0, %v11774_v17  ;;  %v10780_v32 = vpack.c.bf16 %v7981_v31, %v7980_v30 }
 0x216   :  { %v575_v42 = vpop.f32.mrb[7].mxu1  ;;  %10749 = vmatprep.subr.bf16.mxu1 %v10748_v33 }
 0x217   :  { %9415 = vmatprep.mubr.msk.f32.mxu1 %vm380_vm4, %v575_v42  ;;  %11777 = vrcp.f32 %v318_v19  ;;  %v12429_v42 = vpop.f32.mrb[16].mxu0 }
 0x218   :  { %9416 = vmatmul.mubr.msk.f32.gmra.mrb[10].mxu1 %vm380_vm4, %v9403_v35  ;;  %v12431_v45 = vpop.f32.mrb[17].mxu0 }
 0x219   :  { %10751 = vmatpush3.bf16.msra.mxu1 %v10748_v33  ;;  %9426 = vmatprep.mubr.msk.f32.mxu1 %vm380_vm4, %v459_v23  ;;  %v7986_v33 = vld [vmem:[%s14345_s4 + $0x80] sm:$0xff]  ;;  %v12433_v47 = vpop.f32.mrb[18].mxu0 }
 0x21a   :  { %10753 = vmatprep.subr.bf16.mxu1 %v12212_v49  ;;  %v10784_v35 = vpack.c.bf16 %v7987_v34, %v7986_v33  ;;  %v7996_v33 = vld [vmem:[%s14345_s4 + $0xb0] sm:$0xff]  ;;  %v7997_v34 = vld [vmem:[%s14345_s4 + $0xb8] sm:$0xff] }
 0x21c   :  { %9427 = vmatmul.mubr.msk.f32.vlgmr.msra.gmra.mrb[8].mxu1 %vm380_vm4, %v9386_v22  ;;  %v12392_v22 = vmul.f32 %v11776_v20, %v12190_v56  ;;  %v7988_v20 = vld [vmem:[%s14345_s4 + $0x90] sm:$0xff] }
 0x21d   :  { %10755 = vmatpush3.bf16.msra.mxu1 %v12212_v49  ;;  %9429 = vmatprep.mubr.msk.f32.mxu1 %vm380_vm4, %v469_v25  ;;  %v10764_v49 = vpack.c.bf16 %v7965_v57, %v7964_v53  ;;  %v7918_v53 = vmul.f32 -1.442695, %v12180_v46  ;;  %v7919_v57 = vmul.f32 -1.442695, %v12178_v44 }
 0x21e   :  { %10757 = vmatprep.subr.bf16.mxu1 %v12230_v1 }
 0x21f   :  { %11779 = vpow2.f32 %v7918_v53 }
 0x220   :  { %9430 = vmatmul.mubr.msk.f32.gmra.mrb[10].mxu1 %vm380_vm4, %v9389_v24  ;;  %11781 = vpow2.f32 %v7919_v57 }
 0x221   :  { %10759 = vmatpush3.bf16.msra.mxu1 %v12230_v1  ;;  %9440 = vmatprep.mubr.msk.f32.mxu1 %vm380_vm4, %v12268_v7  ;;  %v10768_v1 = vpack.c.bf16 %v12348_v5, %v12351_v11  ;;  %v11778_v21 = vpop.eup %11777  ;;  %11783 = vpow2.f32 %v7920_v63 }
 0x222   :  { %10761 = vmatprep.subr.bf16.mxu1 %v10760_v51  ;;  %v12395_v23 = vmul.f32 %v11778_v21, %v12192_v58  ;;  %11785 = vpow2.f32 %v7921_v0  ;;  %v7989_v21 = vld [vmem:[%s14345_s4 + $0x98] sm:$0xff]  ;;  %v8006_v0 = vld [vmem:[%s14345_s4 + $0xc0] sm:$0xff] }
 0x223   :  { %v10788_v26 = vpack.c.bf16 %v7989_v21, %v7988_v20  ;;  %v8025_v20 = vld [vmem:[%s14345_s4 + $0x118] sm:$0xff] }
 0x224   :  { %9441 = vmatmul.mubr.msk.f32.vlgmr.msra.gmra.mrb[12].mxu1 %vm380_vm4, %v12277_v8  ;;  %v10772_v56 = vpack.c.bf16 %v12392_v22, %v12395_v23 }
 0x225   :  { %10763 = vmatpush3.bf16.msra.mxu1 %v10760_v51  ;;  %9443 = vmatprep.mubr.msk.f32.mxu1 %vm380_vm4, %v12282_v9  ;;  %v12435_v51 = vpop.f32.mrb[19].mxu0 }
 0x226   :  { %10765 = vmatprep.subr.bf16.mxu1 %v10764_v49 }
 0x228   :  { %9444 = vmatmul.mubr.msk.f32.gmra.mrb[14].mxu1 %vm380_vm4, %v12291_v10 }
 0x229   :  { %10767 = vmatpush3.bf16.msra.mxu1 %v10764_v49  ;;  %v11780_v49 = vpop.eup %11779 }
 0x22a   :  { %10769 = vmatprep.subr.bf16.mxu1 %v10768_v1  ;;  %v312_v14 = vadd.f32 1.0, %v11780_v49  ;;  %v8007_v49 = vld [vmem:[%s14345_s4 + $0xc8] sm:$0xff] }
 0x22c   :  { %11787 = vrcp.f32 %v312_v14  ;;  %v8009_v14 = vld [vmem:[%s14345_s4 + $0xd8] sm:$0xff] }
 0x2f7   :  { %v9442_v24 = vpop.f32.mrb[12].mxu1 }
 0x2f8   :  { %v849_v25 = vpop.f32.mrb[13].mxu1 }
 0x2f9   :  { %9454 = vmatprep.mubr.msk.f32.mxu1 %vm380_vm4, %v849_v25 }
 0x2fa   :  { %9455 = vmatmul.mubr.msk.f32.vlgmr.msra.gmra.mrb[8].mxu1 %vm380_vm4, %v9442_v24 }
 0x2fb   :  { %10771 = vmatpush3.bf16.msra.mxu1 %v10768_v1  ;;  %v9445_v58 = vpop.f32.mrb[14].mxu1  ;;  %v11782_v1 = vpop.eup %11781 }
 0x2fc   :  { %10773 = vmatprep.subr.bf16.mxu1 %v10772_v56  ;;  %v859_v28 = vpop.f32.mrb[15].mxu1  ;;  %v11784_v15 = vpop.eup %11783  ;;  %v313_v16 = vadd.f32 1.0, %v11782_v1  ;;  %v10808_v1 = vpack.c.bf16 %v8007_v49, %v8006_v0 }
 0x2fd   :  { %9457 = vmatprep.mubr.msk.f32.mxu1 %vm380_vm4, %v859_v28  ;;  %v11786_v17 = vpop.eup %11785  ;;  %v314_v18 = vadd.f32 1.0, %v11784_v15 }
 0x2fe   :  { %9458 = vmatmul.mubr.msk.f32.gmra.mrb[10].mxu1 %vm380_vm4, %v9445_v58  ;;  %11789 = vrcp.f32 %v313_v16  ;;  %v315_v19 = vadd.f32 1.0, %v11786_v17  ;;  %v11788_v58 = vpop.eup %11787  ;;  %v8015_v16 = vld [vmem:[%s14345_s4 + $0xe8] sm:$0xff] }
 0x2ff   :  { %10775 = vmatpush3.bf16.msra.mxu1 %v10772_v56  ;;  %9468 = vmatprep.mubr.msk.f32.mxu1 %vm380_vm4, %v12364_v52  ;;  %11791 = vrcp.f32 %v314_v18  ;;  %v7995_v56 = vld [vmem:[%s14345_s4 + $0xa8] sm:$0xff]  ;;  %v8017_v18 = vld [vmem:[%s14345_s4 + $0xf8] sm:$0xff] }
 0x300   :  { %10777 = vmatprep.subr.bf16.mxu1 %v10776_v29  ;;  %11793 = vrcp.f32 %v315_v19  ;;  %v10792_v30 = vpack.c.bf16 %v7995_v56, %v7994_v27  ;;  %v8023_v19 = vld [vmem:[%s14345_s4 + $0x108] sm:$0xff]  ;;  %v1843_v27 = vld [vmem:[%s14347_s6 + $0x50] sm:$0xff]  ;;  %v1844_v56 = vld [vmem:[%s14347_s6 + $0x58] sm:$0xff] }
 0x302   :  { %9469 = vmatmul.mubr.msk.f32.vlgmr.msra.gmra.mrb[16].mxu1 %vm380_vm4, %v12369_v54 }
 0x303   :  { %9471 = vmatprep.mubr.msk.f32.mxu1 %vm380_vm4, %v12378_v12  ;;  %10779 = vmatpush3.bf16.msra.mxu1 %v10776_v29 }
 0x304   :  { %10781 = vmatprep.subr.bf16.mxu1 %v10780_v32 }
 0x306   :  { %9472 = vmatmul.mubr.msk.f32.gmra.mrb[18].mxu1 %vm380_vm4, %v12385_v13 }
 0x307   :  { %10783 = vmatpush3.bf16.msra.mxu1 %v10780_v32  ;;  %v360_v32 = vmul.f32 %v11788_v58, %v12180_v46  ;;  %v10796_v46 = vpack.c.bf16 %v7997_v34, %v7996_v33  ;;  %v10852_v58 = vpack.c.bf16 %v1844_v56, %v1843_v27  ;;  %v1799_v34 = vsub.s32 1, %v12167_v39  ;;  %v1973_v27 = vld [vmem:[%s14346_s5 + $0x38] sm:$0xff] }
 0x308   :  { %10785 = vmatprep.subr.bf16.mxu1 %v10784_v35  ;;  %v11790_v31 = vpop.eup %11789 }
 0x309   :  { %v11792_v53 = vpop.eup %11791 }
 0x30a   :  { %v11794_v57 = vpop.eup %11793  ;;  %v362_v63 = vmul.f32 %v11792_v53, %v12184_v50  ;;  %v8008_v50 = vld [vmem:[%s14345_s4 + $0xd0] sm:$0xff]  ;;  %v1800_v53 = vrot.slane %v12173_v41, %v1799_v34 }
 0x30b   :  { %v10812_v15 = vpack.c.bf16 %v8009_v14, %v8008_v50 }
 0x3d5   :  { %v9470_v24 = vpop.f32.mrb[16].mxu1 }
 0x3d6   :  { %v1057_v25 = vpop.f32.mrb[17].mxu1 }
 0x3d7   :  { %9482 = vmatprep.mubr.msk.f32.mxu1 %vm380_vm4, %v1057_v25  ;;  %v1842_v25 = vld [vmem:[%s14347_s6 + $0x48] sm:$0xff] }
 0x3d8   :  { %9483 = vmatmul.mubr.msk.f32.vlgmr.msra.gmra.mrb[8].mxu1 %vm380_vm4, %v9470_v24  ;;  %v1841_v24 = vld [vmem:[%s14347_s6 + $0x40] sm:$0xff] }
 0x3d9   :  { %v9473_v28 = vpop.f32.mrb[18].mxu1  ;;  %10787 = vmatpush3.bf16.msra.mxu1 %v10784_v35  ;;  %v361_v35 = vmul.f32 %v11790_v31, %v12178_v44  ;;  %v363_v44 = vmul.f32 %v11794_v57, %v12182_v48  ;;  %v8014_v48 = vld [vmem:[%s14345_s4 + $0xe0] sm:$0xff]  ;;  %v1847_v31 = vld [vmem:[%s14347_s6 + $0x70] sm:$0xff] }
 0x3da   :  { %v1067_v29 = vpop.f32.mrb[19].mxu1  ;;  %10789 = vmatprep.subr.bf16.mxu1 %v10788_v26  ;;  %v10816_v17 = vpack.c.bf16 %v8015_v16, %v8014_v48 }
 0x3db   :  { %9485 = vmatprep.mubr.msk.f32.mxu1 %vm380_vm4, %v1067_v29  ;;  %v1846_v29 = vld [vmem:[%s14347_s6 + $0x68] sm:$0xff] }
 0x3dc   :  { %9486 = vmatmul.mubr.msk.f32.gmra.mrb[10].mxu1 %vm380_vm4, %v9473_v28  ;;  %v1845_v28 = vld [vmem:[%s14347_s6 + $0x60] sm:$0xff] }
 0x3dd   :  { %10791 = vmatpush3.bf16.msra.mxu1 %v10788_v26  ;;  %9496 = vmatprep.mubr.msk.f32.mxu1 %vm380_vm4, %v360_v32  ;;  %v10848_v26 = vpack.c.bf16 %v1842_v25, %v1841_v24  ;;  %v1848_v32 = vld [vmem:[%s14347_s6 + $0x78] sm:$0xff]  ;;  %v1971_v24 = vld [vmem:[%s14346_s5 + $0x28] sm:$0xff] }
 0x3de   :  { %10793 = vmatprep.subr.bf16.mxu1 %v10792_v30  ;;  %v10860_v33 = vpack.c.bf16 %v1848_v32, %v1847_v31 }
 0x3e0   :  { %9497 = vmatmul.mubr.msk.f32.vlgmr.msra.gmra.mrb[8].mxu1 %vm380_vm4, %v361_v35 }
 0x3e1   :  { %9499 = vmatprep.mubr.msk.f32.mxu1 %vm380_vm4, %v362_v63  ;;  %10795 = vmatpush3.bf16.msra.mxu1 %v10792_v30  ;;  %v10856_v30 = vpack.c.bf16 %v1846_v29, %v1845_v28 }
 0x3e2   :  { %10797 = vmatprep.subr.bf16.mxu1 %v10796_v46 }
 0x3e4   :  { %9500 = vmatmul.mubr.msk.f32.gmra.mrb[10].mxu1 %vm380_vm4, %v363_v44 }
 0x3e5   :  { %10799 = vmatpush3.bf16.msra.mxu1 %v10796_v46  ;;  %9510 = vmatprep.mubr.msk.f32.mxu1 %vm380_vm4, %v12351_v11  ;;  %v8016_v11 = vld [vmem:[%s14345_s4 + $0xf0] sm:$0xff] }
 0x3e6   :  { %10809 = vmatprep.subr.bf16.mxu1 %v10808_v1 }
 0x3e8   :  { %9511 = vmatmul.mubr.msk.f32.vlgmr.msra.gmra.mrb[8].mxu1 %vm380_vm4, %v12348_v5  ;;  %v10820_v5 = vpack.c.bf16 %v8017_v18, %v8016_v11 }
 0x3e9   :  { %9513 = vmatprep.mubr.msk.f32.mxu1 %vm380_vm4, %v12395_v23  ;;  %10811 = vmatpush3.bf16.msra.mxu1 %v10808_v1  ;;  %v8022_v23 = vld [vmem:[%s14345_s4 + $0x100] sm:$0xff] }
 0x3ea   :  { %10813 = vmatprep.subr.bf16.mxu1 %v10812_v15 }
 0x3ec   :  { %9514 = vmatmul.mubr.msk.f32.gmra.mrb[10].mxu1 %vm380_vm4, %v12392_v22  ;;  %v10824_v22 = vpack.c.bf16 %v8023_v19, %v8022_v23 }
 0x3ed   :  { %10815 = vmatpush3.bf16.msra.mxu1 %v10812_v15  ;;  %9538 = vmatprep.mubr.msk.f32.mxu1 %vm380_vm4, %v12431_v45  ;;  %v8024_v45 = vld [vmem:[%s14345_s4 + $0x110] sm:$0xff] }
 0x3ee   :  { %10817 = vmatprep.subr.bf16.mxu1 %v10816_v17 }
 0x3f0   :  { %9539 = vmatmul.mubr.msk.f32.vlgmr.msra.gmra.mrb[8].mxu1 %vm380_vm4, %v12429_v42  ;;  %v10828_v42 = vpack.c.bf16 %v8025_v20, %v8024_v45 }
 0x3f1   :  { %10819 = vmatpush3.bf16.msra.mxu1 %v10816_v17  ;;  %9541 = vmatprep.mubr.msk.f32.mxu1 %vm380_vm4, %v12435_v51  ;;  %v1840_v51 = vld [vmem:[%s14347_s6 + $0x38] sm:$0xff] }
 0x3f2   :  { %10821 = vmatprep.subr.bf16.mxu1 %v10820_v5 }
 0x3f4   :  { %9542 = vmatmul.mubr.msk.f32.gmra.mrb[10].mxu1 %vm380_vm4, %v12433_v47  ;;  %v1839_v47 = vld [vmem:[%s14347_s6 + $0x30] sm:$0xff] }
 0x3f5   :  { %10823 = vmatpush3.bf16.msra.mxu1 %v10820_v5  ;;  %9552 = vmatprep.mubr.msk.f32.mxu1 %vm380_vm4, %v12222_v60  ;;  %v10844_v21 = vpack.c.bf16 %v1840_v51, %v1839_v47  ;;  %v1969_v47 = vld [vmem:[%s14346_s5 + $0x18] sm:$0xff] }
 0x3f6   :  { %10825 = vmatprep.subr.bf16.mxu1 %v10824_v22 }
 0x3f8   :  { %9553 = vmatmul.mubr.msk.f32.vlgmr.msra.gmra.mrb[8].mxu1 %vm380_vm4, %v12219_v59  ;;  %v1833_v59 = vld [vmem:[%s14347_s6] sm:$0xff] }
 0x3f9   :  { %9555 = vmatprep.mubr.msk.f32.mxu1 %vm380_vm4, %v12236_v61  ;;  %10827 = vmatpush3.bf16.msra.mxu1 %v10824_v22 }
 0x3fa   :  { %10829 = vmatprep.subr.bf16.mxu1 %v10828_v42 }
 0x3fc   :  { %9556 = vmatmul.mubr.msk.f32.gmra.mrb[10].mxu1 %vm380_vm4, %v12233_v2  ;;  %v1838_v2 = vld [vmem:[%s14347_s6 + $0x28] sm:$0xff] }
 0x3fd   :  { %10831 = vmatpush3.bf16.msra.mxu1 %v10828_v42  ;;  %9566 = vmatprep.mubr.msk.f32.mxu1 %vm380_vm4, %v12208_v43  ;;  %v1834_v43 = vld [vmem:[%s14347_s6 + $0x8] sm:$0xff] }
 0x3fe   :  { %v10832_v60 = vpack.c.bf16 %v1834_v43, %v1833_v59 }
 0x400   :  { %9567 = vmatmul.mubr.msk.f32.vlgmr.msra.gmra.mrb[8].mxu1 %vm380_vm4, %v12206_v36  ;;  %10833 = vmatprep.subr.bf16.mxu0 %v10832_v60  ;;  %v1835_v36 = vld [vmem:[%s14347_s6 + $0x10] sm:$0xff] }
 0x401   :  { %9569 = vmatprep.mubr.msk.f32.mxu1 %vm380_vm4, %v12224_v62  ;;  %10835 = vmatpush3.bf16.msra.mxu0 %v10832_v60  ;;  %v1837_v62 = vld [vmem:[%s14347_s6 + $0x20] sm:$0xff] }
 0x402   :  { %v10840_v61 = vpack.c.bf16 %v1838_v2, %v1837_v62  ;;  %v1967_v62 = vld [vmem:[%s14346_s5 + $0x8] sm:$0xff] }
 0x404   :  { %9570 = vmatmul.mubr.msk.f32.gmra.mrb[10].mxu1 %vm380_vm4, %v12214_v55  ;;  %v1836_v55 = vld [vmem:[%s14347_s6 + $0x18] sm:$0xff] }
 0x405   :  { %9640 = vmatprep.mubr.msk.f32.mxu1 %vm380_vm4, %v12162_v37  ;;  %v10836_v37 = vpack.c.bf16 %v1836_v55, %v1835_v36 }
 0x407   :  { %10837 = vmatprep.subr.bf16.mxu0 %v10836_v37 }
 0x408   :  { %10839 = vmatpush3.bf16.msra.mxu0 %v10836_v37  ;;  %v1966_v37 = vld [vmem:[%s14346_s5] sm:$0xff] }
 0x409   :  { %10841 = vmatprep.subr.bf16.mxu0 %v10840_v61  ;;  %v10864_v2 = vpack.c.bf16 %v1967_v62, %v1966_v37 }
 0x40c   :  { %10843 = vmatpush3.bf16.msra.mxu0 %v10840_v61  ;;  %v1968_v61 = vld [vmem:[%s14346_s5 + $0x10] sm:$0xff] }
 0x40d   :  { %10845 = vmatprep.subr.bf16.mxu0 %v10844_v21  ;;  %v10868_v51 = vpack.c.bf16 %v1969_v47, %v1968_v61 }
 0x410   :  { %10847 = vmatpush3.bf16.msra.mxu0 %v10844_v21  ;;  %v1970_v21 = vld [vmem:[%s14346_s5 + $0x20] sm:$0xff] }
 0x411   :  { %10849 = vmatprep.subr.bf16.mxu0 %v10848_v26  ;;  %v10872_v25 = vpack.c.bf16 %v1971_v24, %v1970_v21 }
 0x414   :  { %10851 = vmatpush3.bf16.msra.mxu0 %v10848_v26  ;;  %v1972_v26 = vld [vmem:[%s14346_s5 + $0x30] sm:$0xff] }
 0x415   :  { %10853 = vmatprep.subr.bf16.mxu0 %v10852_v58  ;;  %v10876_v56 = vpack.c.bf16 %v1973_v27, %v1972_v26 }
 0x418   :  { %10855 = vmatpush3.bf16.msra.mxu0 %v10852_v58  ;;  %v1851_v58 = vsub.s32 2, %v12167_v39 }
 0x419   :  { %10857 = vmatprep.subr.bf16.mxu0 %v10856_v30 }
 0x41a   :  { %v1852_v28 = vrot.slane %v12173_v41, %v1851_v58 }
 0x41c   :  { %10859 = vmatpush3.bf16.msra.mxu0 %v10856_v30 }
 0x41d   :  { %10861 = vmatprep.subr.bf16.mxu0 %v10860_v33 }
 0x420   :  { %10863 = vmatpush3.bf16.msra.mxu0 %v10860_v33 }
 0x421   :  { %10865 = vmatprep.subr.bf16.mxu0 %v10864_v2 }
 0x4d3   :  { %v9568_v35 = vpop.f32.mrb[8].mxu1 }
 0x4d4   :  { %v1802_v46 = vadd.f32 %v9568_v35, %v1800_v53  ;;  %v1774_v57 = vpop.f32.mrb[9].mxu1 }
 0x4d5   :  { %v1801_v63 = vadd.f32 %v1800_v53, %v1774_v57 }
 0x4d6   :  { %v8031_v0 = vmul.f32 -1.442695, %v1802_v46 }
 0x4d7   :  { %v8030_v49 = vmul.f32 -1.442695, %v1801_v63  ;;  %v9571_v44 = vpop.f32.mrb[10].mxu1 }
 0x4d8   :  { %11795 = vpow2.f32 %v8031_v0  ;;  %v1804_v1 = vadd.f32 %v9571_v44, %v1800_v53  ;;  %v1784_v50 = vpop.f32.mrb[11].mxu1 }
 0x4d9   :  { %11797 = vpow2.f32 %v8030_v49  ;;  %v1803_v14 = vadd.f32 %v1800_v53, %v1784_v50 }
 0x4da   :  { %v8033_v15 = vmul.f32 -1.442695, %v1804_v1 }
 0x4db   :  { %v8032_v48 = vmul.f32 -1.442695, %v1803_v14 }
 0x4dc   :  { %11799 = vpow2.f32 %v8033_v15 }
 0x4dd   :  { %11801 = vpow2.f32 %v8032_v48 }
 0x4e2   :  { %v11796_v16 = vpop.eup %11795 }
 0x4e3   :  { %v11798_v17 = vpop.eup %11797  ;;  %v1818_v11 = vadd.f32 1.0, %v11796_v16 }
 0x4e4   :  { %v1817_v18 = vadd.f32 1.0, %v11798_v17 }
 0x4e5   :  { %11803 = vrcp.f32 %v1818_v11 }
 0x4e6   :  { %v11800_v5 = vpop.eup %11799  ;;  %11805 = vrcp.f32 %v1817_v18 }
 0x4e7   :  { %v11802_v23 = vpop.eup %11801  ;;  %v1820_v19 = vadd.f32 1.0, %v11800_v5 }
 0x4e8   :  { %v1819_v22 = vadd.f32 1.0, %v11802_v23 }
 0x4e9   :  { %11807 = vrcp.f32 %v1820_v19 }
 0x4ea   :  { %11809 = vrcp.f32 %v1819_v22 }
 0x4ef   :  { %v11804_v45 = vpop.eup %11803 }
 0x4f0   :  { %v11806_v20 = vpop.eup %11805  ;;  %v1830_v59 = vmul.f32 %v11804_v45, %v1802_v46 }
 0x4f1   :  { %v1829_v42 = vmul.f32 %v11806_v20, %v1801_v63 }
 0x4f3   :  { %v11808_v43 = vpop.eup %11807  ;;  %9604 = vmatprep.mubr.f32.mxu0 %v1829_v42  ;;  %v1976_v42 = vsub.s32 5, %v12167_v39 }
 0x4f4   :  { %v11810_v60 = vpop.eup %11809  ;;  %9605 = vmatmul.mubr.f32.vlgmr.msra.gmra.mrb[20].mxu0 %v1830_v59  ;;  %v1832_v55 = vmul.f32 %v11808_v43, %v1804_v1 }
 0x4f5   :  { %v1831_v36 = vmul.f32 %v11810_v60, %v1803_v14  ;;  %10867 = vmatpush3.bf16.msra.mxu0 %v10864_v2  ;;  %v1977_v59 = vrot.slane %v12173_v41, %v1976_v42  ;;  %v12795_v42 = vld [vmem:[%s14342_s1 + $0xd8] sm:$0xff] }
 0x4f6   :  { %10869 = vmatprep.subr.bf16.mxu0 %v10868_v51 }
 0x4f7   :  { %9607 = vmatprep.mubr.f32.mxu0 %v1831_v36 }
 0x4f8   :  { %9608 = vmatmul.mubr.f32.gmra.mrb[22].mxu0 %v1832_v55 }
 0x4f9   :  { %10871 = vmatpush3.bf16.msra.mxu0 %v10868_v51 }
 0x4fa   :  { %10873 = vmatprep.subr.bf16.mxu0 %v10872_v25 }
 0x4fd   :  { %10875 = vmatpush3.bf16.msra.mxu0 %v10872_v25 }
 0x4fe   :  { %10877 = vmatprep.subr.bf16.mxu0 %v10876_v56 }
 0x501   :  { %10879 = vmatpush3.bf16.msra.mxu0 %v10876_v56 }
 0x5c7   :  { %v9606_v29 = vpop.f32.mrb[20].mxu0 }
 0x5c8   :  { %v1925_v30 = vadd.f32 %v9606_v29, %v1852_v28  ;;  %v1919_v31 = vpop.f32.mrb[21].mxu0 }
 0x5c9   :  { %v1920_v32 = vadd.f32 %v1919_v31, %v1852_v28 }
 0x5ca   :  { %v8035_v33 = vmul.f32 -1.442695, %v1925_v30 }
 0x5cb   :  { %v8034_v53 = vmul.f32 -1.442695, %v1920_v32  ;;  %v9609_v35 = vpop.f32.mrb[22].mxu0 }
 0x5cc   :  { %11811 = vpow2.f32 %v8035_v33  ;;  %v1935_v46 = vadd.f32 %v9609_v35, %v1852_v28  ;;  %v1929_v57 = vpop.f32.mrb[23].mxu0 }
 0x5cd   :  { %11813 = vpow2.f32 %v8034_v53  ;;  %v1930_v63 = vadd.f32 %v1929_v57, %v1852_v28 }
 0x5ce   :  { %v8037_v0 = vmul.f32 -1.442695, %v1935_v46 }
 0x5cf   :  { %v8036_v49 = vmul.f32 -1.442695, %v1930_v63 }
 0x5d0   :  { %11815 = vpow2.f32 %v8037_v0  ;;  %v8063_v0 = vld [vmem:[%s14346_s5 + $0x88] sm:$0xff] }
 0x5d1   :  { %11817 = vpow2.f32 %v8036_v49 }
 0x5d6   :  { %v11812_v44 = vpop.eup %11811 }
 0x5d7   :  { %v11814_v1 = vpop.eup %11813  ;;  %v1951_v50 = vadd.f32 1.0, %v11812_v44 }
 0x5d8   :  { %v1950_v14 = vadd.f32 1.0, %v11814_v1 }
 0x5d9   :  { %11819 = vrcp.f32 %v1951_v50  ;;  %v8064_v50 = vld [vmem:[%s14346_s5 + $0x90] sm:$0xff] }
 0x5da   :  { %v11816_v15 = vpop.eup %11815  ;;  %11821 = vrcp.f32 %v1950_v14  ;;  %v8065_v14 = vld [vmem:[%s14346_s5 + $0x98] sm:$0xff] }
 0x5db   :  { %v11818_v48 = vpop.eup %11817  ;;  %v1953_v16 = vadd.f32 1.0, %v11816_v15  ;;  %v8066_v15 = vld [vmem:[%s14346_s5 + $0xa0] sm:$0xff] }
 0x5dc   :  { %v1952_v17 = vadd.f32 1.0, %v11818_v48  ;;  %v8067_v48 = vld [vmem:[%s14346_s5 + $0xa8] sm:$0xff] }
 0x5dd   :  { %11823 = vrcp.f32 %v1953_v16  ;;  %v8079_v16 = vld [vmem:[%s14342_s1 + $0x48] sm:$0xff] }
 0x5de   :  { %11825 = vrcp.f32 %v1952_v17 }
 0x5e3   :  { %v11820_v11 = vpop.eup %11819 }
 0x5e4   :  { %v11822_v18 = vpop.eup %11821  ;;  %v12623_v23 = vmul.f32 %v11820_v11, %v1925_v30  ;;  %v8081_v11 = vld [vmem:[%s14342_s1 + $0x58] sm:$0xff] }
 0x5e5   :  { %v12621_v5 = vmul.f32 %v11822_v18, %v1920_v32  ;;  %v12737_v18 = vld [vmem:[%s14342_s1 + $0xa0] sm:$0xff] }
 0x5e7   :  { %v11824_v19 = vpop.eup %11823  ;;  %9626 = vmatprep.mubr.msk.f32.mxu0 %vm1978_vm5, %v12621_v5 }
 0x5e8   :  { %v11826_v22 = vpop.eup %11825  ;;  %9627 = vmatmul.mubr.msk.f32.vlgmr.msra.gmra.mrb[24].mxu0 %vm1978_vm5, %v12623_v23  ;;  %v12631_v20 = vmul.f32 %v11824_v19, %v1935_v46  ;;  %v12779_v19 = vld [vmem:[%s14342_s1 + $0xc8] sm:$0xff] }
 0x5e9   :  { %v12629_v45 = vmul.f32 %v11826_v22, %v1930_v63  ;;  %v8062_v63 = vld [vmem:[%s14346_s5 + $0x80] sm:$0xff]  ;;  %v12785_v22 = vld [vmem:[%s14342_s1 + $0xd0] sm:$0xff] }
 0x5ea   :  { %v10896_v1 = vpack.c.bf16 %v8063_v0, %v8062_v63  ;;  %v8057_v63 = vld [vmem:[%s14346_s5 + $0x78] sm:$0xff] }
 0x5eb   :  { %9629 = vmatprep.mubr.msk.f32.mxu0 %vm1978_vm5, %v12629_v45 }
 0x5ec   :  { %9630 = vmatmul.mubr.msk.f32.gmra.mrb[26].mxu0 %vm1978_vm5, %v12631_v20 }
 0x5ed   :  { %9654 = vmatprep.mubr.msk.f32.mxu0 %vm380_vm4, %v12268_v7 }
 0x6bb   :  { %v9628_v43 = vpop.f32.mrb[24].mxu0 }
 0x6bc   :  { %v2063_v60 = vadd.f32 %v9628_v43, %v1977_v59  ;;  %v2057_v36 = vpop.f32.mrb[25].mxu0  ;;  %v12811_v43 = vld [vmem:[%s14342_s1 + $0xe8] sm:$0xff] }
 0x6bd   :  { %v2058_v55 = vadd.f32 %v2057_v36, %v1977_v59  ;;  %v12827_v36 = vld [vmem:[%s14342_s1 + $0xf8] sm:$0xff] }
 0x6be   :  { %v8043_v37 = vmul.f32 -1.442695, %v2063_v60 }
 0x6bf   :  { %v8042_v62 = vmul.f32 -1.442695, %v2058_v55  ;;  %v9631_v2 = vpop.f32.mrb[26].mxu0 }
 0x6c0   :  { %11827 = vpow2.f32 %v8043_v37  ;;  %v2073_v61 = vadd.f32 %v9631_v2, %v1977_v59  ;;  %v2067_v47 = vpop.f32.mrb[27].mxu0  ;;  %v12843_v37 = vld [vmem:[%s14342_s1 + $0x108] sm:$0xff]  ;;  %v12857_v2 = vld [vmem:[%s14342_s1 + $0x118] sm:$0xff] }
 0x6c1   :  { %11829 = vpow2.f32 %v8042_v62  ;;  %v2068_v51 = vadd.f32 %v2067_v47, %v1977_v59  ;;  %v12801_v59 = vld [vmem:[%s14342_s1 + $0xe0] sm:$0xff]  ;;  %v12848_v62 = vld [vmem:[%s14342_s1 + $0x110] sm:$0xff]  ;;  %v8051_v47 = vld [vmem:[%s14346_s5 + $0x48] sm:$0xff] }
 0x6c2   :  { %v8045_v21 = vmul.f32 -1.442695, %v2073_v61 }
 0x6c3   :  { %v8044_v24 = vmul.f32 -1.442695, %v2068_v51 }
 0x6c4   :  { %11831 = vpow2.f32 %v8045_v21  ;;  %v8052_v21 = vld [vmem:[%s14346_s5 + $0x50] sm:$0xff] }
 0x6c5   :  { %11833 = vpow2.f32 %v8044_v24  ;;  %v8053_v24 = vld [vmem:[%s14346_s5 + $0x58] sm:$0xff] }
 0x6ca   :  { %v11828_v7 = vpop.eup %11827 }
 0x6cb   :  { %v11830_v25 = vpop.eup %11829  ;;  %v2089_v26 = vadd.f32 1.0, %v11828_v7 }
 0x6cc   :  { %v2088_v41 = vadd.f32 1.0, %v11830_v25 }
 0x6cd   :  { %11835 = vrcp.f32 %v2089_v26 }
 0x6ce   :  { %v11832_v27 = vpop.eup %11831  ;;  %11837 = vrcp.f32 %v2088_v41  ;;  %v10916_v41 = vpack.c.bf16 %v8053_v24, %v8052_v21  ;;  %v8093_v21 = vld [vmem:[%s14346_s5 + $0xf8] sm:$0xff] }
 0x6cf   :  { %v11834_v56 = vpop.eup %11833  ;;  %v2091_v28 = vadd.f32 1.0, %v11832_v27 }
 0x6d0   :  { %v2090_v29 = vadd.f32 1.0, %v11834_v56  ;;  %v8054_v56 = vld [vmem:[%s14346_s5 + $0x60] sm:$0xff] }
 0x6d1   :  { %11839 = vrcp.f32 %v2091_v28  ;;  %v8055_v28 = vld [vmem:[%s14346_s5 + $0x68] sm:$0xff] }
 0x6d2   :  { %11841 = vrcp.f32 %v2090_v29 }
 0x6d7   :  { %v11836_v30 = vpop.eup %11835 }
 0x6d8   :  { %v11838_v31 = vpop.eup %11837  ;;  %v12641_v32 = vmul.f32 %v11836_v30, %v2063_v60  ;;  %v12817_v60 = vld [vmem:[%s14342_s1 + $0xf0] sm:$0xff] }
 0x6d9   :  { %v12643_v33 = vmul.f32 %v11838_v31, %v2058_v55  ;;  %v12833_v55 = vld [vmem:[%s14342_s1 + $0x100] sm:$0xff]  ;;  %v10920_v31 = vpack.c.bf16 %v8055_v28, %v8054_v56 }
 0x6db   :  { %v11840_v53 = vpop.eup %11839  ;;  %v12647_v35 = vpack.c.bf16 %v12641_v32, %v12643_v33 }
 0x6dc   :  { %v11842_v46 = vpop.eup %11841  ;;  %v12649_v57 = vmul.f32 %v11840_v53, %v2073_v61  ;;  %v8050_v61 = vld [vmem:[%s14346_s5 + $0x40] sm:$0xff] }
 0x6dd   :  { %v12657_v49 = vmul.f32 %v11842_v46, %v2068_v51  ;;  %10881 = vmatprep.subr.bf16.mxu1 %v12647_v35  ;;  %10889 = vmatprep.subr.bf16.mxu0 %v12647_v35  ;;  %v10912_v51 = vpack.c.bf16 %v8051_v47, %v8050_v61  ;;  %v8056_v46 = vld [vmem:[%s14346_s5 + $0x70] sm:$0xff] }
 0x6de   :  { %10883 = vmatpush3.bf16.msra.mxu1 %v12647_v35  ;;  %10891 = vmatpush3.bf16.msra.mxu0 %v12647_v35 }
 0x6df   :  { %v12665_v44 = vpack.c.bf16 %v12649_v57, %v12657_v49 }
 0x6e1   :  { %10885 = vmatprep.subr.bf16.mxu1 %v12665_v44  ;;  %10893 = vmatprep.subr.bf16.mxu0 %v12665_v44 }
 0x6e2   :  { %10887 = vmatpush3.bf16.msra.mxu1 %v12665_v44  ;;  %10895 = vmatpush3.bf16.msra.mxu0 %v12665_v44 }
 0x6e3   :  { %10929 = vmatprep.subr.bf16.mxu0 %v12647_v35  ;;  %10897 = vmatprep.subr.bf16.mxu1 %v10896_v1 }
 0x6e5   :  { %9655 = vmatmul.mubr.msk.f32.vlgmr.msra.gmra.mrb[28].mxu0 %vm380_vm4, %v12277_v8  ;;  %9641 = vmatmul.mubr.msk.f32.vlgmr.msra.gmra.mrb[20].mxu1 %vm380_vm4, %v12247_v4  ;;  %v8078_v8 = vld [vmem:[%s14342_s1 + $0x40] sm:$0xff]  ;;  %v10900_v4 = vpack.c.bf16 %v8065_v14, %v8064_v50  ;;  %v8087_v14 = vld [vmem:[%s14346_s5 + $0xc8] sm:$0xff] }
 0x6e6   :  { %10931 = vmatpush3.bf16.msra.mxu0 %v12647_v35  ;;  %9657 = vmatprep.mubr.msk.f32.mxu0 %vm380_vm4, %v12282_v9  ;;  %v10904_v9 = vpack.c.bf16 %v8067_v48, %v8066_v15  ;;  %v8086_v50 = vld [vmem:[%s14346_s5 + $0xc0] sm:$0xff] }
 0x6e7   :  { %10933 = vmatprep.subr.bf16.mxu0 %v12665_v44  ;;  %9643 = vmatprep.mubr.msk.f32.mxu1 %vm380_vm4, %v12252_v3  ;;  %v8068_v3 = vld [vmem:[%s14346_s5 + $0xb0] sm:$0xff]  ;;  %v10936_v48 = vpack.c.bf16 %v8087_v14, %v8086_v50 }
 0x6e8   :  { %10899 = vmatpush3.bf16.msra.mxu1 %v10896_v1  ;;  %v8108_v14 = vld [vmem:[%s14346_s5 + $0x130] sm:$0xff] }
 0x6e9   :  { %9658 = vmatmul.mubr.msk.f32.gmra.mrb[30].mxu0 %vm380_vm4, %v12291_v10  ;;  %9644 = vmatmul.mubr.msk.f32.gmra.mrb[22].mxu1 %vm380_vm4, %v12263_v6  ;;  %v8069_v10 = vld [vmem:[%s14346_s5 + $0xb8] sm:$0xff]  ;;  %v8080_v6 = vld [vmem:[%s14342_s1 + $0x50] sm:$0xff] }
 0x6ea   :  { %10935 = vmatpush3.bf16.msra.mxu0 %v12665_v44  ;;  %9712 = vmatprep.mubr.msk.f32.mxu0 %vm380_vm4, %v8078_v8  ;;  %v10908_v17 = vpack.c.bf16 %v8069_v10, %v8068_v3 }
 0x6eb   :  { %10953 = vmatprep.subr.bf16.mxu0 %v12647_v35  ;;  %10901 = vmatprep.subr.bf16.mxu1 %v10900_v4 }
 0x6ec   :  { %10903 = vmatpush3.bf16.msra.mxu1 %v10900_v4  ;;  %v8088_v4 = vld [vmem:[%s14346_s5 + $0xd0] sm:$0xff] }
 0x6ed   :  { %9713 = vmatmul.mubr.msk.f32.vlgmr.msra.gmra.mrb[32].mxu0 %vm380_vm4, %v8079_v16  ;;  %10905 = vmatprep.subr.bf16.mxu1 %v10904_v9 }
 0x6ee   :  { %10955 = vmatpush3.bf16.msra.mxu0 %v12647_v35  ;;  %9715 = vmatprep.mubr.msk.f32.mxu0 %vm380_vm4, %v8080_v6  ;;  %v8090_v6 = vld [vmem:[%s14346_s5 + $0xe0] sm:$0xff] }
 0x6ef   :  { %10957 = vmatprep.subr.bf16.mxu0 %v12665_v44 }
 0x6f0   :  { %10907 = vmatpush3.bf16.msra.mxu1 %v10904_v9  ;;  %v8089_v9 = vld [vmem:[%s14346_s5 + $0xd8] sm:$0xff] }
 0x6f1   :  { %9716 = vmatmul.mubr.msk.f32.gmra.mrb[34].mxu0 %vm380_vm4, %v8081_v11  ;;  %10909 = vmatprep.subr.bf16.mxu1 %v10908_v17  ;;  %v10940_v3 = vpack.c.bf16 %v8089_v9, %v8088_v4  ;;  %v8114_v9 = vld [vmem:[%s14346_s5 + $0x140] sm:$0xff] }
 0x6f2   :  { %10959 = vmatpush3.bf16.msra.mxu0 %v12665_v44  ;;  %9748 = vmatprep.mubr.msk.f32.mxu0 %vm380_vm4, %v12364_v52  ;;  %v12747_v52 = vld [vmem:[%s14342_s1 + $0xa8] sm:$0xff] }
 0x6f3   :  { %10993 = vmatprep.subr.bf16.mxu0 %v12647_v35 }
 0x6f4   :  { %10911 = vmatpush3.bf16.msra.mxu1 %v10908_v17  ;;  %v8091_v17 = vld [vmem:[%s14346_s5 + $0xe8] sm:$0xff] }
 0x6f5   :  { %9749 = vmatmul.mubr.msk.f32.vlgmr.msra.gmra.mrb[36].mxu0 %vm380_vm4, %v12369_v54  ;;  %v12753_v54 = vld [vmem:[%s14342_s1 + $0xb0] sm:$0xff]  ;;  %10913 = vmatprep.subr.bf16.mxu1 %v10912_v51  ;;  %v10944_v61 = vpack.c.bf16 %v8091_v17, %v8090_v6 }
 0x6f6   :  { %10995 = vmatpush3.bf16.msra.mxu0 %v12647_v35  ;;  %9751 = vmatprep.mubr.msk.f32.mxu0 %vm380_vm4, %v12378_v12  ;;  %v12763_v12 = vld [vmem:[%s14342_s1 + $0xb8] sm:$0xff]  ;;  %v8116_v17 = vld [vmem:[%s14346_s5 + $0x150] sm:$0xff] }
 0x6f7   :  { %10997 = vmatprep.subr.bf16.mxu0 %v12665_v44 }
 0x6f9   :  { %9752 = vmatmul.mubr.msk.f32.gmra.mrb[38].mxu0 %vm380_vm4, %v12385_v13  ;;  %v12769_v13 = vld [vmem:[%s14342_s1 + $0xc0] sm:$0xff] }
 0x6fa   :  { %10999 = vmatpush3.bf16.msra.mxu0 %v12665_v44  ;;  %9806 = vmatprep.mubr.msk.f32.mxu0 %vm380_vm4, %v12737_v18 }
 0x6fb   :  { %11017 = vmatprep.subr.bf16.mxu0 %v12647_v35 }
 0x6fd   :  { %9807 = vmatmul.mubr.msk.f32.vlgmr.msra.gmra.mrb[40].mxu0 %vm380_vm4, %v12747_v52 }
 0x6fe   :  { %11019 = vmatpush3.bf16.msra.mxu0 %v12647_v35  ;;  %9809 = vmatprep.mubr.msk.f32.mxu0 %vm380_vm4, %v12753_v54 }
 0x6ff   :  { %11021 = vmatprep.subr.bf16.mxu0 %v12665_v44 }
 0x701   :  { %9810 = vmatmul.mubr.msk.f32.gmra.mrb[42].mxu0 %vm380_vm4, %v12763_v12 }
 0x702   :  { %11023 = vmatpush3.bf16.msra.mxu0 %v12665_v44  ;;  %9842 = vmatprep.mubr.msk.f32.mxu0 %vm380_vm4, %v12769_v13 }
 0x703   :  { %11041 = vmatprep.subr.bf16.mxu0 %v12647_v35 }
 0x705   :  { %9843 = vmatmul.mubr.msk.f32.vlgmr.msra.gmra.mrb[44].mxu0 %vm380_vm4, %v12779_v19 }
 0x706   :  { %11043 = vmatpush3.bf16.msra.mxu0 %v12647_v35  ;;  %9845 = vmatprep.mubr.msk.f32.mxu0 %vm380_vm4, %v12785_v22 }
 0x707   :  { %11045 = vmatprep.subr.bf16.mxu0 %v12665_v44 }
 0x709   :  { %9846 = vmatmul.mubr.msk.f32.gmra.mrb[46].mxu0 %vm380_vm4, %v12795_v42 }
 0x70a   :  { %11047 = vmatpush3.bf16.msra.mxu0 %v12665_v44  ;;  %9878 = vmatprep.mubr.msk.f32.mxu0 %vm380_vm4, %v12801_v59 }
 0x70b   :  { %11065 = vmatprep.subr.bf16.mxu0 %v12647_v35 }
 0x70d   :  { %9879 = vmatmul.mubr.msk.f32.vlgmr.msra.gmra.mrb[48].mxu0 %vm380_vm4, %v12811_v43 }
 0x70e   :  { %11067 = vmatpush3.bf16.msra.mxu0 %v12647_v35  ;;  %9881 = vmatprep.mubr.msk.f32.mxu0 %vm380_vm4, %v12817_v60 }
 0x70f   :  { %11069 = vmatprep.subr.bf16.mxu0 %v12665_v44 }
 0x711   :  { %9882 = vmatmul.mubr.msk.f32.gmra.mrb[50].mxu0 %vm380_vm4, %v12827_v36 }
 0x712   :  { %11071 = vmatpush3.bf16.msra.mxu0 %v12665_v44  ;;  %9914 = vmatprep.mubr.msk.f32.mxu0 %vm380_vm4, %v12833_v55  ;;  %v10924_v44 = vpack.c.bf16 %v8057_v63, %v8056_v46  ;;  %v8106_v46 = vld [vmem:[%s14346_s5 + $0x120] sm:$0xff]  ;;  %v8107_v63 = vld [vmem:[%s14346_s5 + $0x128] sm:$0xff] }
 0x715   :  { %9915 = vmatmul.mubr.msk.f32.vlgmr.msra.gmra.mrb[52].mxu0 %vm380_vm4, %v12843_v37 }
 0x716   :  { %9917 = vmatprep.mubr.msk.f32.mxu0 %vm380_vm4, %v12848_v62 }
 0x719   :  { %9918 = vmatmul.mubr.msk.f32.gmra.mrb[54].mxu0 %vm380_vm4, %v12857_v2 }
 0x7b8   :  { %v9656_v7 = vpop.f32.mrb[28].mxu0  ;;  %v9642_v25 = vpop.f32.mrb[20].mxu1 }
 0x7b9   :  { %v2264_v26 = vpop.f32.mrb[29].mxu0  ;;  %v2170_v27 = vpop.f32.mrb[21].mxu1 }
 0x7ba   :  { %9676 = vmatprep.mubr.msk.f32.mxu1 %vm1978_vm5, %v2264_v26  ;;  %v8102_v26 = vld [vmem:[%s14346_s5 + $0x100] sm:$0xff] }
 0x7bb   :  { %9677 = vmatmul.mubr.msk.f32.vlgmr.msra.gmra.mrb[24].mxu1 %vm1978_vm5, %v9656_v7 }
 0x7bc   :  { %10915 = vmatpush3.bf16.msra.mxu1 %v10912_v51  ;;  %v9659_v29 = vpop.f32.mrb[30].mxu0  ;;  %v9645_v30 = vpop.f32.mrb[22].mxu1  ;;  %v8092_v51 = vld [vmem:[%s14346_s5 + $0xf0] sm:$0xff] }
 0x7bd   :  { %10917 = vmatprep.subr.bf16.mxu1 %v10916_v41  ;;  %v2274_v53 = vpop.f32.mrb[31].mxu0  ;;  %v2180_v35 = vpop.f32.mrb[23].mxu1  ;;  %v10948_v7 = vpack.c.bf16 %v8093_v21, %v8092_v51 }
 0x7be   :  { %9679 = vmatprep.mubr.msk.f32.mxu1 %vm1978_vm5, %v2274_v53 }
 0x7bf   :  { %9680 = vmatmul.mubr.msk.f32.gmra.mrb[26].mxu1 %vm1978_vm5, %v9659_v29  ;;  %v8104_v29 = vld [vmem:[%s14346_s5 + $0x110] sm:$0xff] }
 0x7c0   :  { %10919 = vmatpush3.bf16.msra.mxu1 %v10916_v41  ;;  %9698 = vmatprep.mubr.msk.f32.mxu1 %vm1978_vm5, %v2170_v27  ;;  %v9714_v0 = vpop.f32.mrb[32].mxu0  ;;  %v8103_v41 = vld [vmem:[%s14346_s5 + $0x108] sm:$0xff] }
 0x7c1   :  { %10921 = vmatprep.subr.bf16.mxu1 %v10920_v31  ;;  %v2569_v1 = vpop.f32.mrb[33].mxu0  ;;  %v10960_v56 = vpack.c.bf16 %v8103_v41, %v8102_v26  ;;  %v8118_v26 = vld [vmem:[%s14346_s5 + $0x160] sm:$0xff]  ;;  %v8119_v41 = vld [vmem:[%s14346_s5 + $0x168] sm:$0xff] }
 0x7c4   :  { %10923 = vmatpush3.bf16.msra.mxu1 %v10920_v31  ;;  %v9717_v15 = vpop.f32.mrb[34].mxu0 }
 0x7c5   :  { %10925 = vmatprep.subr.bf16.mxu1 %v10924_v44  ;;  %v2579_v8 = vpop.f32.mrb[35].mxu0 }
 0x7c8   :  { %10927 = vmatpush3.bf16.msra.mxu1 %v10924_v44  ;;  %v12902_v16 = vpop.f32.mrb[36].mxu0 }
 0x7c9   :  { %10937 = vmatprep.subr.bf16.mxu1 %v10936_v48  ;;  %v2764_v10 = vpop.f32.mrb[37].mxu0 }
 0x7cb   :  { %9699 = vmatmul.mubr.msk.f32.vlgmr.msra.gmra.mrb[24].mxu1 %vm1978_vm5, %v9642_v25 }
 0x7cc   :  { %10939 = vmatpush3.bf16.msra.mxu1 %v10936_v48  ;;  %9701 = vmatprep.mubr.msk.f32.mxu1 %vm1978_vm5, %v2180_v35  ;;  %v12912_v11 = vpop.f32.mrb[38].mxu0  ;;  %v8109_v48 = vld [vmem:[%s14346_s5 + $0x138] sm:$0xff] }
 0x7cd   :  { %10941 = vmatprep.subr.bf16.mxu1 %v10940_v3  ;;  %v2774_v47 = vpop.f32.mrb[39].mxu0 }
 0x7cf   :  { %9702 = vmatmul.mubr.msk.f32.gmra.mrb[26].mxu1 %vm1978_vm5, %v9645_v30  ;;  %v8105_v30 = vld [vmem:[%s14346_s5 + $0x118] sm:$0xff] }
 0x7d0   :  { %10943 = vmatpush3.bf16.msra.mxu1 %v10940_v3  ;;  %9734 = vmatprep.mubr.msk.f32.mxu1 %vm1978_vm5, %v2569_v1  ;;  %v12922_v24 = vpop.f32.mrb[40].mxu0  ;;  %v10964_v53 = vpack.c.bf16 %v8105_v30, %v8104_v29  ;;  %v10968_v1 = vpack.c.bf16 %v8107_v63, %v8106_v46  ;;  %v8115_v3 = vld [vmem:[%s14346_s5 + $0x148] sm:$0xff]  ;;  %v10984_v29 = vpack.c.bf16 %v8119_v41, %v8118_v26  ;;  %v8121_v46 = vld [vmem:[%s14346_s5 + $0x178] sm:$0xff]  ;;  %v8158_v26 = vld [vmem:[%s14346_s5 + $0x1e0] sm:$0xff] }
 0x7d1   :  { %10945 = vmatprep.subr.bf16.mxu1 %v10944_v61  ;;  %v12924_v25 = vpop.f32.mrb[41].mxu0  ;;  %v8135_v63 = vld [vmem:[%s14346_s5 + $0x188] sm:$0xff] }
 0x7d2   :  { %v8159_v41 = vld [vmem:[%s14346_s5 + $0x1e8] sm:$0xff] }
 0x7d4   :  { %10947 = vmatpush3.bf16.msra.mxu1 %v10944_v61  ;;  %v12932_v27 = vpop.f32.mrb[42].mxu0  ;;  %v8117_v61 = vld [vmem:[%s14346_s5 + $0x158] sm:$0xff] }
 0x7d5   :  { %10949 = vmatprep.subr.bf16.mxu1 %v10948_v7  ;;  %v12934_v28 = vpop.f32.mrb[43].mxu0  ;;  %v10980_v21 = vpack.c.bf16 %v8117_v61, %v8116_v17  ;;  %v8155_v17 = vld [vmem:[%s14346_s5 + $0x1c8] sm:$0xff] }
 0x7d8   :  { %10951 = vmatpush3.bf16.msra.mxu1 %v10948_v7  ;;  %v12942_v31 = vpop.f32.mrb[44].mxu0 }
 0x7d9   :  { %10961 = vmatprep.subr.bf16.mxu1 %v10960_v56  ;;  %v12944_v35 = vpop.f32.mrb[45].mxu0 }
 0x7db   :  { %9735 = vmatmul.mubr.msk.f32.vlgmr.msra.gmra.mrb[24].mxu1 %vm1978_vm5, %v9714_v0 }
 0x7dc   :  { %10963 = vmatpush3.bf16.msra.mxu1 %v10960_v56  ;;  %9737 = vmatprep.mubr.msk.f32.mxu1 %vm1978_vm5, %v2579_v8  ;;  %v12954_v44 = vpop.f32.mrb[46].mxu0  ;;  %v10972_v8 = vpack.c.bf16 %v8109_v48, %v8108_v14  ;;  %v8138_v48 = vld [vmem:[%s14346_s5 + $0x1a0] sm:$0xff] }
 0x7dd   :  { %10965 = vmatprep.subr.bf16.mxu1 %v10964_v53  ;;  %v12956_v50 = vpop.f32.mrb[47].mxu0 }
 0x7df   :  { %9738 = vmatmul.mubr.msk.f32.gmra.mrb[26].mxu1 %vm1978_vm5, %v9717_v15  ;;  %v10976_v15 = vpack.c.bf16 %v8115_v3, %v8114_v9  ;;  %v8140_v3 = vld [vmem:[%s14346_s5 + $0x1b0] sm:$0xff] }
 0x7e0   :  { %10967 = vmatpush3.bf16.msra.mxu1 %v10964_v53  ;;  %9770 = vmatprep.mubr.msk.f32.mxu1 %vm1978_vm5, %v2764_v10  ;;  %v12966_v0 = vpop.f32.mrb[48].mxu0  ;;  %v8120_v53 = vld [vmem:[%s14346_s5 + $0x170] sm:$0xff] }
 0x7e1   :  { %10969 = vmatprep.subr.bf16.mxu1 %v10968_v1  ;;  %v12968_v4 = vpop.f32.mrb[49].mxu0 }
 0x7e4   :  { %10971 = vmatpush3.bf16.msra.mxu1 %v10968_v1  ;;  %v12976_v6 = vpop.f32.mrb[50].mxu0 }
 0x7e5   :  { %10973 = vmatprep.subr.bf16.mxu1 %v10972_v8  ;;  %v12978_v10 = vpop.f32.mrb[51].mxu0 }
 0x7e8   :  { %10975 = vmatpush3.bf16.msra.mxu1 %v10972_v8  ;;  %v12986_v51 = vpop.f32.mrb[52].mxu0  ;;  %v8139_v8 = vld [vmem:[%s14346_s5 + $0x1a8] sm:$0xff] }
 0x7e9   :  { %10977 = vmatprep.subr.bf16.mxu1 %v10976_v15  ;;  %v12988_v7 = vpop.f32.mrb[53].mxu0  ;;  %v11008_v9 = vpack.c.bf16 %v8139_v8, %v8138_v48  ;;  %v8181_v48 = vld [vmem:[%s14346_s5 + $0x238] sm:$0xff]  ;;  %v8195_v8 = vld [vmem:[%s14346_s5 + $0x248] sm:$0xff] }
 0x7eb   :  { %9771 = vmatmul.mubr.msk.f32.vlgmr.msra.gmra.mrb[24].mxu1 %vm1978_vm5, %v12902_v16  ;;  %v10988_v16 = vpack.c.bf16 %v8121_v46, %v8120_v53  ;;  %v8160_v53 = vld [vmem:[%s14346_s5 + $0x1f0] sm:$0xff]  ;;  %v8161_v46 = vld [vmem:[%s14346_s5 + $0x1f8] sm:$0xff] }
 0x7ec   :  { %10979 = vmatpush3.bf16.msra.mxu1 %v10976_v15  ;;  %9773 = vmatprep.mubr.msk.f32.mxu1 %vm1978_vm5, %v2774_v47  ;;  %v12999_v56 = vpop.f32.mrb[54].mxu0  ;;  %v8134_v47 = vld [vmem:[%s14346_s5 + $0x180] sm:$0xff]  ;;  %v8141_v15 = vld [vmem:[%s14346_s5 + $0x1b8] sm:$0xff] }
 0x7ed   :  { %10981 = vmatprep.subr.bf16.mxu1 %v10980_v21  ;;  %v13001_v30 = vpop.f32.mrb[55].mxu0  ;;  %v11000_v1 = vpack.c.bf16 %v8135_v63, %v8134_v47 }
 0x7ef   :  { %9774 = vmatmul.mubr.msk.f32.gmra.mrb[26].mxu1 %vm1978_vm5, %v12912_v11  ;;  %v8136_v11 = vld [vmem:[%s14346_s5 + $0x190] sm:$0xff] }
 0x7f0   :  { %10983 = vmatpush3.bf16.msra.mxu1 %v10980_v21  ;;  %9792 = vmatprep.mubr.msk.f32.mxu1 %vm1978_vm5, %v12643_v33  ;;  %v8137_v33 = vld [vmem:[%s14346_s5 + $0x198] sm:$0xff] }
 0x7f1   :  { %10985 = vmatprep.subr.bf16.mxu1 %v10984_v29  ;;  %v11004_v14 = vpack.c.bf16 %v8137_v33, %v8136_v11  ;;  %v8179_v11 = vld [vmem:[%s14346_s5 + $0x228] sm:$0xff] }
 0x7f4   :  { %10987 = vmatpush3.bf16.msra.mxu1 %v10984_v29  ;;  %v11032_v29 = vpack.c.bf16 %v8159_v41, %v8158_v26  ;;  %v8217_v26 = vld [vmem:[%s14346_s5 + $0x2b8] sm:$0xff] }
 0x7f5   :  { %10989 = vmatprep.subr.bf16.mxu1 %v10988_v16 }
 0x7f8   :  { %10991 = vmatpush3.bf16.msra.mxu1 %v10988_v16  ;;  %v8175_v16 = vld [vmem:[%s14346_s5 + $0x208] sm:$0xff] }
 0x7f9   :  { %11001 = vmatprep.subr.bf16.mxu1 %v11000_v1 }
 0x7fb   :  { %9793 = vmatmul.mubr.msk.f32.vlgmr.msra.gmra.mrb[24].mxu1 %vm1978_vm5, %v12641_v32  ;;  %v11012_v32 = vpack.c.bf16 %v8141_v15, %v8140_v3  ;;  %v8198_v15 = vld [vmem:[%s14346_s5 + $0x260] sm:$0xff] }
 0x7fc   :  { %9795 = vmatprep.mubr.msk.f32.mxu1 %vm1978_vm5, %v12657_v49  ;;  %11003 = vmatpush3.bf16.msra.mxu1 %v11000_v1  ;;  %v8154_v49 = vld [vmem:[%s14346_s5 + $0x1c0] sm:$0xff] }
 0x7fd   :  { %11005 = vmatprep.subr.bf16.mxu1 %v11004_v14  ;;  %v11024_v61 = vpack.c.bf16 %v8155_v17, %v8154_v49  ;;  %v8178_v1 = vld [vmem:[%s14346_s5 + $0x220] sm:$0xff]  ;;  %v8200_v17 = vld [vmem:[%s14346_s5 + $0x270] sm:$0xff] }
 0x7fe   :  { %v11056_v33 = vpack.c.bf16 %v8179_v11, %v8178_v1 }
 0x7ff   :  { %9796 = vmatmul.mubr.msk.f32.gmra.mrb[26].mxu1 %vm1978_vm5, %v12649_v57  ;;  %v8156_v57 = vld [vmem:[%s14346_s5 + $0x1d0] sm:$0xff] }
 0x800   :  { %11007 = vmatpush3.bf16.msra.mxu1 %v11004_v14  ;;  %9828 = vmatprep.mubr.msk.f32.mxu1 %vm1978_vm5, %v12924_v25  ;;  %v8157_v25 = vld [vmem:[%s14346_s5 + $0x1d8] sm:$0xff]  ;;  %v8180_v14 = vld [vmem:[%s14346_s5 + $0x230] sm:$0xff] }
 0x801   :  { %11009 = vmatprep.subr.bf16.mxu1 %v11008_v9  ;;  %v11028_v21 = vpack.c.bf16 %v8157_v25, %v8156_v57  ;;  %v8215_v57 = vld [vmem:[%s14346_s5 + $0x2a8] sm:$0xff] }
 0x804   :  { %11011 = vmatpush3.bf16.msra.mxu1 %v11008_v9 }
 0x805   :  { %11013 = vmatprep.subr.bf16.mxu1 %v11012_v32 }
 0x808   :  { %11015 = vmatpush3.bf16.msra.mxu1 %v11012_v32  ;;  %v8199_v32 = vld [vmem:[%s14346_s5 + $0x268] sm:$0xff] }
 0x809   :  { %11025 = vmatprep.subr.bf16.mxu1 %v11024_v61  ;;  %v11080_v49 = vpack.c.bf16 %v8199_v32, %v8198_v15 }
 0x80b   :  { %9829 = vmatmul.mubr.msk.f32.vlgmr.msra.gmra.mrb[24].mxu1 %vm1978_vm5, %v12922_v24  ;;  %v11036_v24 = vpack.c.bf16 %v8161_v46, %v8160_v53  ;;  %v11945_v53 = vld [vmem:[%s14348_s7] sm:$0xff] }
 0x80c   :  { %11027 = vmatpush3.bf16.msra.mxu1 %v11024_v61  ;;  %9831 = vmatprep.mubr.msk.f32.mxu1 %vm1978_vm5, %v12934_v28  ;;  %v8174_v28 = vld [vmem:[%s14346_s5 + $0x200] sm:$0xff]  ;;  %v8201_v61 = vld [vmem:[%s14346_s5 + $0x278] sm:$0xff] }
 0x80d   :  { %11029 = vmatprep.subr.bf16.mxu1 %v11028_v21  ;;  %v11048_v47 = vpack.c.bf16 %v8175_v16, %v8174_v28 }
 0x80f   :  { %9832 = vmatmul.mubr.msk.f32.gmra.mrb[26].mxu1 %vm1978_vm5, %v12932_v27  ;;  %v8176_v27 = vld [vmem:[%s14346_s5 + $0x210] sm:$0xff] }
 0x810   :  { %11031 = vmatpush3.bf16.msra.mxu1 %v11028_v21  ;;  %9864 = vmatprep.mubr.msk.f32.mxu1 %vm1978_vm5, %v12944_v35  ;;  %v8177_v35 = vld [vmem:[%s14346_s5 + $0x218] sm:$0xff]  ;;  %v8216_v21 = vld [vmem:[%s14346_s5 + $0x2b0] sm:$0xff] }
 0x811   :  { %11033 = vmatprep.subr.bf16.mxu1 %v11032_v29  ;;  %v11052_v63 = vpack.c.bf16 %v8177_v35, %v8176_v27  ;;  %v11100_v41 = vpack.c.bf16 %v8217_v26, %v8216_v21 }
 0x814   :  { %11035 = vmatpush3.bf16.msra.mxu1 %v11032_v29  ;;  %v3853_v29 = vsub.s32 6, %v12167_v39 }
 0x815   :  { %11037 = vmatprep.subr.bf16.mxu1 %v11036_v24 }
 0x816   :  { %v3854_v46 = vrot.slane %v11945_v53, %v3853_v29 }
 0x818   :  { %11039 = vmatpush3.bf16.msra.mxu1 %v11036_v24 }
 0x819   :  { %11049 = vmatprep.subr.bf16.mxu1 %v11048_v47 }
 0x81b   :  { %9865 = vmatmul.mubr.msk.f32.vlgmr.msra.gmra.mrb[24].mxu1 %vm1978_vm5, %v12942_v31  ;;  %v11060_v31 = vpack.c.bf16 %v8181_v48, %v8180_v14 }
 0x81c   :  { %11051 = vmatpush3.bf16.msra.mxu1 %v11048_v47  ;;  %9867 = vmatprep.mubr.msk.f32.mxu1 %vm1978_vm5, %v12956_v50  ;;  %v8194_v50 = vld [vmem:[%s14346_s5 + $0x240] sm:$0xff] }
 0x81d   :  { %11053 = vmatprep.subr.bf16.mxu1 %v11052_v63  ;;  %v11072_v9 = vpack.c.bf16 %v8195_v8, %v8194_v50 }
 0x81f   :  { %9868 = vmatmul.mubr.msk.f32.gmra.mrb[26].mxu1 %vm1978_vm5, %v12954_v44  ;;  %v8196_v44 = vld [vmem:[%s14346_s5 + $0x250] sm:$0xff] }
 0x820   :  { %11055 = vmatpush3.bf16.msra.mxu1 %v11052_v63  ;;  %9900 = vmatprep.mubr.msk.f32.mxu1 %vm1978_vm5, %v12968_v4  ;;  %v8197_v4 = vld [vmem:[%s14346_s5 + $0x258] sm:$0xff] }
 0x821   :  { %11057 = vmatprep.subr.bf16.mxu1 %v11056_v33  ;;  %v11076_v3 = vpack.c.bf16 %v8197_v4, %v8196_v44 }
 0x824   :  { %11059 = vmatpush3.bf16.msra.mxu1 %v11056_v33 }
 0x825   :  { %11061 = vmatprep.subr.bf16.mxu1 %v11060_v31 }
 0x828   :  { %11063 = vmatpush3.bf16.msra.mxu1 %v11060_v31 }
 0x829   :  { %11073 = vmatprep.subr.bf16.mxu1 %v11072_v9 }
 0x82b   :  { %9901 = vmatmul.mubr.msk.f32.vlgmr.msra.gmra.mrb[24].mxu1 %vm1978_vm5, %v12966_v0  ;;  %v11084_v0 = vpack.c.bf16 %v8201_v61, %v8200_v17 }
 0x82c   :  { %11075 = vmatpush3.bf16.msra.mxu1 %v11072_v9  ;;  %9903 = vmatprep.mubr.msk.f32.mxu1 %vm1978_vm5, %v12978_v10  ;;  %v8211_v10 = vld [vmem:[%s14346_s5 + $0x288] sm:$0xff] }
 0x82d   :  { %11077 = vmatprep.subr.bf16.mxu1 %v11076_v3 }
 0x82f   :  { %9904 = vmatmul.mubr.msk.f32.gmra.mrb[26].mxu1 %vm1978_vm5, %v12976_v6  ;;  %v8210_v6 = vld [vmem:[%s14346_s5 + $0x280] sm:$0xff] }
 0x830   :  { %11079 = vmatpush3.bf16.msra.mxu1 %v11076_v3  ;;  %9936 = vmatprep.mubr.msk.f32.mxu1 %vm1978_vm5, %v12988_v7  ;;  %v11088_v7 = vpack.c.bf16 %v8211_v10, %v8210_v6 }
 0x831   :  { %11081 = vmatprep.subr.bf16.mxu1 %v11080_v49 }
 0x832   :  { %11089 = vmatprep.subr.bf16.mxu0 %v11088_v7 }
 0x833   :  { %11091 = vmatpush3.bf16.msra.mxu0 %v11088_v7 }
 0x834   :  { %11083 = vmatpush3.bf16.msra.mxu1 %v11080_v49 }
 0x835   :  { %11085 = vmatprep.subr.bf16.mxu1 %v11084_v0 }
 0x838   :  { %11087 = vmatpush3.bf16.msra.mxu1 %v11084_v0 }
 0x83b   :  { %9937 = vmatmul.mubr.msk.f32.vlgmr.msra.gmra.mrb[24].mxu1 %vm1978_vm5, %v12986_v51  ;;  %v8212_v51 = vld [vmem:[%s14346_s5 + $0x290] sm:$0xff] }
 0x83c   :  { %9939 = vmatprep.mubr.msk.f32.mxu1 %vm1978_vm5, %v13001_v30  ;;  %v8214_v30 = vld [vmem:[%s14346_s5 + $0x2a0] sm:$0xff] }
 0x83d   :  { %v11096_v25 = vpack.c.bf16 %v8215_v57, %v8214_v30  ;;  %v13200_v57 = vld [vmem:[%s14342_s1] sm:$0xff] }
 0x83f   :  { %9940 = vmatmul.mubr.msk.f32.gmra.mrb[26].mxu1 %vm1978_vm5, %v12999_v56  ;;  %v8213_v56 = vld [vmem:[%s14346_s5 + $0x298] sm:$0xff] }
 0x840   :  { %10138 = vmatprep.mubr.msk.f32.mxu1 %vm380_vm4, %v12737_v18  ;;  %v11092_v18 = vpack.c.bf16 %v8213_v56, %v8212_v51 }
 0x842   :  { %11093 = vmatprep.subr.bf16.mxu0 %v11092_v18 }
 0x843   :  { %11095 = vmatpush3.bf16.msra.mxu0 %v11092_v18 }
 0x844   :  { %11097 = vmatprep.subr.bf16.mxu0 %v11096_v25 }
 0x847   :  { %11099 = vmatpush3.bf16.msra.mxu0 %v11096_v25  ;;  %v3902_v25 = vsub.s32 7, %v12167_v39 }
 0x848   :  { %11101 = vmatprep.subr.bf16.mxu0 %v11100_v41 }
 0x849   :  { %v3903_v21 = vrot.slane %v11945_v53, %v3902_v25 }
 0x84b   :  { %11103 = vmatpush3.bf16.msra.mxu0 %v11100_v41 }
 0x90e   :  { %v9938_v24 = vpop.f32.mrb[24].mxu1 }
 0x90f   :  { %v3856_v28 = vadd.f32 %v9938_v24, %v3854_v46  ;;  %v3828_v16 = vpop.f32.mrb[25].mxu1 }
 0x910   :  { %v3855_v47 = vadd.f32 %v3854_v46, %v3828_v16 }
 0x911   :  { %v8207_v27 = vmul.f32 -1.442695, %v3856_v28 }
 0x912   :  { %v8206_v35 = vmul.f32 -1.442695, %v3855_v47  ;;  %v9941_v63 = vpop.f32.mrb[26].mxu1 }
 0x913   :  { %11843 = vpow2.f32 %v8207_v27  ;;  %v3858_v1 = vadd.f32 %v9941_v63, %v3854_v46  ;;  %v3838_v11 = vpop.f32.mrb[27].mxu1 }
 0x914   :  { %11845 = vpow2.f32 %v8206_v35  ;;  %v3857_v33 = vadd.f32 %v3854_v46, %v3838_v11 }
 0x915   :  { %v8209_v14 = vmul.f32 -1.442695, %v3858_v1 }
 0x916   :  { %v8208_v48 = vmul.f32 -1.442695, %v3857_v33 }
 0x917   :  { %11847 = vpow2.f32 %v8209_v14 }
 0x918   :  { %11849 = vpow2.f32 %v8208_v48 }
 0x91d   :  { %v11844_v31 = vpop.eup %11843 }
 0x91e   :  { %v11846_v50 = vpop.eup %11845  ;;  %v3872_v8 = vadd.f32 1.0, %v11844_v31 }
 0x91f   :  { %v3871_v9 = vadd.f32 1.0, %v11846_v50 }
 0x920   :  { %11851 = vrcp.f32 %v3872_v8 }
 0x921   :  { %v11848_v44 = vpop.eup %11847  ;;  %11853 = vrcp.f32 %v3871_v9 }
 0x922   :  { %v11850_v4 = vpop.eup %11849  ;;  %v3874_v3 = vadd.f32 1.0, %v11848_v44 }
 0x923   :  { %v3873_v15 = vadd.f32 1.0, %v11850_v4 }
 0x924   :  { %11855 = vrcp.f32 %v3874_v3 }
 0x925   :  { %11857 = vrcp.f32 %v3873_v15 }
 0x92a   :  { %v11852_v32 = vpop.eup %11851 }
 0x92b   :  { %v11854_v49 = vpop.eup %11853  ;;  %v3884_v17 = vmul.f32 %v11852_v32, %v3856_v28 }
 0x92c   :  { %v3883_v61 = vmul.f32 %v11854_v49, %v3855_v47 }
 0x92d   :  { %v13181_v7 = vadd.f32 %v3884_v17, %v12623_v23 }
 0x92e   :  { %v11856_v0 = vpop.eup %11855  ;;  %v13178_v6 = vadd.f32 %v3883_v61, %v12621_v5 }
 0x92f   :  { %v11858_v10 = vpop.eup %11857  ;;  %v3886_v51 = vmul.f32 %v11856_v0, %v3858_v1 }
 0x930   :  { %v3885_v56 = vmul.f32 %v11858_v10, %v3857_v33  ;;  %9958 = vmatprep.mubr.msk.f32.mxu0 %vm1978_vm5, %v13178_v6  ;;  %v13234_v10 = vld [vmem:[%s14342_s1 + $0x8] sm:$0xff] }
 0x931   :  { %9959 = vmatmul.mubr.msk.f32.vlgmr.msra.gmra.mrb[56].mxu0 %vm1978_vm5, %v13181_v7  ;;  %v13191_v30 = vadd.f32 %v3886_v51, %v12631_v20  ;;  %v8242_v51 = vld [vmem:[%s14346_s5 + $0x300] sm:$0xff] }
 0x932   :  { %v13188_v18 = vadd.f32 %v3885_v56, %v12629_v45  ;;  %v8243_v56 = vld [vmem:[%s14346_s5 + $0x308] sm:$0xff] }
 0x933   :  { %v11120_v25 = vpack.c.bf16 %v8243_v56, %v8242_v51  ;;  %v13399_v51 = vld [vmem:[%s14342_s1 + $0x40] sm:$0xff] }
 0x934   :  { %9961 = vmatprep.mubr.msk.f32.mxu0 %vm1978_vm5, %v13188_v18 }
 0x935   :  { %9962 = vmatmul.mubr.msk.f32.gmra.mrb[58].mxu0 %vm1978_vm5, %v13191_v30 }
 0x936   :  { %9972 = vmatprep.mubr.msk.f32.mxu0 %vm380_vm4, %v13200_v57 }
 0xa04   :  { %v9960_v26 = vpop.f32.mrb[56].mxu0 }
 0xa05   :  { %v3988_v41 = vadd.f32 %v9960_v26, %v3903_v21  ;;  %v3982_v29 = vpop.f32.mrb[57].mxu0  ;;  %v8245_v26 = vld [vmem:[%s14346_s5 + $0x318] sm:$0xff] }
 0xa06   :  { %v3983_v46 = vadd.f32 %v3982_v29, %v3903_v21 }
 0xa07   :  { %v8223_v24 = vmul.f32 -1.442695, %v3988_v41 }
 0xa08   :  { %v8222_v28 = vmul.f32 -1.442695, %v3983_v46  ;;  %v9963_v16 = vpop.f32.mrb[58].mxu0 }
 0xa09   :  { %11859 = vpow2.f32 %v8223_v24  ;;  %v3998_v47 = vadd.f32 %v9963_v16, %v3903_v21  ;;  %v3992_v27 = vpop.f32.mrb[59].mxu0  ;;  %v8232_v16 = vld [vmem:[%s14346_s5 + $0x2d0] sm:$0xff] }
 0xa0a   :  { %11861 = vpow2.f32 %v8222_v28  ;;  %v3993_v35 = vadd.f32 %v3992_v27, %v3903_v21  ;;  %v13262_v21 = vld [vmem:[%s14342_s1 + $0x18] sm:$0xff] }
 0xa0b   :  { %v8225_v63 = vmul.f32 -1.442695, %v3998_v47 }
 0xa0c   :  { %v8224_v1 = vmul.f32 -1.442695, %v3993_v35 }
 0xa0d   :  { %11863 = vpow2.f32 %v8225_v63 }
 0xa0e   :  { %11865 = vpow2.f32 %v8224_v1  ;;  %v8234_v1 = vld [vmem:[%s14346_s5 + $0x2e0] sm:$0xff] }
 0xa13   :  { %v11860_v11 = vpop.eup %11859 }
 0xa14   :  { %v11862_v33 = vpop.eup %11861  ;;  %v4014_v14 = vadd.f32 1.0, %v11860_v11  ;;  %v8235_v11 = vld [vmem:[%s14346_s5 + $0x2e8] sm:$0xff] }
 0xa15   :  { %v4013_v53 = vadd.f32 1.0, %v11862_v33 }
 0xa16   :  { %11867 = vrcp.f32 %v4014_v14 }
 0xa17   :  { %v11864_v48 = vpop.eup %11863  ;;  %11869 = vrcp.f32 %v4013_v53  ;;  %v11144_v53 = vpack.c.bf16 %v8235_v11, %v8234_v1  ;;  %v8284_v11 = vld [vmem:[%s14346_s5 + $0x3b0] sm:$0xff] }
 0xa18   :  { %v11866_v31 = vpop.eup %11865  ;;  %v4016_v50 = vadd.f32 1.0, %v11864_v48  ;;  %v8236_v48 = vld [vmem:[%s14346_s5 + $0x2f0] sm:$0xff] }
 0xa19   :  { %v4015_v8 = vadd.f32 1.0, %v11866_v31  ;;  %v8237_v31 = vld [vmem:[%s14346_s5 + $0x2f8] sm:$0xff] }
 0xa1a   :  { %11871 = vrcp.f32 %v4016_v50  ;;  %v11148_v50 = vpack.c.bf16 %v8237_v31, %v8236_v48  ;;  %v8290_v48 = vld [vmem:[%s14346_s5 + $0x3c0] sm:$0xff]  ;;  %v8291_v31 = vld [vmem:[%s14346_s5 + $0x3c8] sm:$0xff] }
 0xa1b   :  { %11873 = vrcp.f32 %v4015_v8  ;;  %v8262_v8 = vld [vmem:[%s14346_s5 + $0x340] sm:$0xff] }
 0xa20   :  { %v11868_v9 = vpop.eup %11867 }
 0xa21   :  { %v11870_v44 = vpop.eup %11869  ;;  %v13205_v4 = vmul.f32 %v11868_v9, %v3988_v41  ;;  %v13289_v41 = vld [vmem:[%s14342_s1 + $0x28] sm:$0xff] }
 0xa22   :  { %v13207_v3 = vmul.f32 %v11870_v44, %v3983_v46  ;;  %v8263_v9 = vld [vmem:[%s14346_s5 + $0x348] sm:$0xff] }
 0xa23   :  { %v11160_v44 = vpack.c.bf16 %v8263_v9, %v8262_v8 }
 0xa24   :  { %v11872_v15 = vpop.eup %11871  ;;  %v13211_v32 = vpack.c.bf16 %v13205_v4, %v13207_v3 }
 0xa25   :  { %v11874_v49 = vpop.eup %11873  ;;  %v13213_v17 = vmul.f32 %v11872_v15, %v3998_v47  ;;  %v8233_v47 = vld [vmem:[%s14346_s5 + $0x2d8] sm:$0xff]  ;;  %v8264_v15 = vld [vmem:[%s14346_s5 + $0x350] sm:$0xff] }
 0xa26   :  { %v13215_v61 = vmul.f32 %v11874_v49, %v3993_v35  ;;  %11105 = vmatprep.subr.bf16.mxu0 %v13211_v32  ;;  %11217 = vmatprep.subr.bf16.mxu1 %v13211_v32  ;;  %v11140_v63 = vpack.c.bf16 %v8233_v47, %v8232_v16  ;;  %v8265_v49 = vld [vmem:[%s14346_s5 + $0x358] sm:$0xff] }
 0xa27   :  { %11107 = vmatpush3.bf16.msra.mxu0 %v13211_v32  ;;  %11219 = vmatpush3.bf16.msra.mxu1 %v13211_v32  ;;  %v11164_v56 = vpack.c.bf16 %v8265_v49, %v8264_v15  ;;  %v8281_v16 = vld [vmem:[%s14346_s5 + $0x398] sm:$0xff] }
 0xa28   :  { %v13223_v0 = vpack.c.bf16 %v13213_v17, %v13215_v61 }
 0xa2a   :  { %11109 = vmatprep.subr.bf16.mxu0 %v13223_v0  ;;  %11221 = vmatprep.subr.bf16.mxu1 %v13223_v0 }
 0xa2b   :  { %11111 = vmatpush3.bf16.msra.mxu0 %v13223_v0  ;;  %11223 = vmatpush3.bf16.msra.mxu1 %v13223_v0 }
 0xa2c   :  { %11113 = vmatprep.subr.bf16.mxu0 %v13211_v32  ;;  %11241 = vmatprep.subr.bf16.mxu1 %v13211_v32 }
 0xa2e   :  { %9973 = vmatmul.mubr.msk.f32.vlgmr.msra.gmra.mrb[60].mxu0 %vm380_vm4, %v13234_v10  ;;  %10139 = vmatmul.mubr.msk.f32.vlgmr.msra.gmra.mrb[28].mxu1 %vm380_vm4, %v12747_v52  ;;  %v13253_v52 = vld [vmem:[%s14342_s1 + $0x10] sm:$0xff] }
 0xa2f   :  { %11115 = vmatpush3.bf16.msra.mxu0 %v13211_v32  ;;  %11243 = vmatpush3.bf16.msra.mxu1 %v13211_v32 }
 0xa30   :  { %11117 = vmatprep.subr.bf16.mxu0 %v13223_v0  ;;  %11245 = vmatprep.subr.bf16.mxu1 %v13223_v0 }
 0xa31   :  { %9975 = vmatprep.mubr.msk.f32.mxu0 %vm380_vm4, %v13253_v52  ;;  %10141 = vmatprep.mubr.msk.f32.mxu1 %vm380_vm4, %v12753_v54  ;;  %v13274_v54 = vld [vmem:[%s14342_s1 + $0x20] sm:$0xff] }
 0xa32   :  { %9976 = vmatmul.mubr.msk.f32.gmra.mrb[62].mxu0 %vm380_vm4, %v13262_v21  ;;  %10142 = vmatmul.mubr.msk.f32.gmra.mrb[30].mxu1 %vm380_vm4, %v12763_v12  ;;  %v8244_v12 = vld [vmem:[%s14346_s5 + $0x310] sm:$0xff] }
 0xa33   :  { %11119 = vmatpush3.bf16.msra.mxu0 %v13223_v0  ;;  %11247 = vmatpush3.bf16.msra.mxu1 %v13223_v0  ;;  %v11124_v29 = vpack.c.bf16 %v8245_v26, %v8244_v12  ;;  %v8267_v12 = vld [vmem:[%s14346_s5 + $0x368] sm:$0xff] }
 0xa34   :  { %11265 = vmatprep.subr.bf16.mxu1 %v13211_v32  ;;  %9986 = vmatprep.mubr.msk.f32.mxu0 %vm380_vm4, %v13274_v54  ;;  %v13412_v26 = vld [vmem:[%s14342_s1 + $0x48] sm:$0xff] }
 0xa35   :  { %10174 = vmatprep.mubr.msk.f32.mxu1 %vm380_vm4, %v12769_v13  ;;  %11121 = vmatprep.subr.bf16.mxu0 %v11120_v25  ;;  %v13299_v13 = vld [vmem:[%s14342_s1 + $0x30] sm:$0xff] }
 0xa36   :  { %9987 = vmatmul.mubr.msk.f32.vlgmr.msra.gmra.mrb[64].mxu0 %vm380_vm4, %v13289_v41  ;;  %10175 = vmatmul.mubr.msk.f32.vlgmr.msra.gmra.mrb[32].mxu1 %vm380_vm4, %v12779_v19  ;;  %v13309_v19 = vld [vmem:[%s14342_s1 + $0x38] sm:$0xff] }
 0xa37   :  { %11267 = vmatpush3.bf16.msra.mxu1 %v13211_v32  ;;  %9989 = vmatprep.mubr.msk.f32.mxu0 %vm380_vm4, %v13299_v13 }
 0xa38   :  { %11269 = vmatprep.subr.bf16.mxu1 %v13223_v0  ;;  %10177 = vmatprep.mubr.msk.f32.mxu1 %vm380_vm4, %v12785_v22  ;;  %v8246_v22 = vld [vmem:[%s14346_s5 + $0x320] sm:$0xff] }
 0xa39   :  { %11123 = vmatpush3.bf16.msra.mxu0 %v11120_v25  ;;  %v8266_v25 = vld [vmem:[%s14346_s5 + $0x360] sm:$0xff] }
 0xa3a   :  { %9990 = vmatmul.mubr.msk.f32.gmra.mrb[66].mxu0 %vm380_vm4, %v13309_v19  ;;  %10178 = vmatmul.mubr.msk.f32.gmra.mrb[34].mxu1 %vm380_vm4, %v12795_v42  ;;  %v8247_v42 = vld [vmem:[%s14346_s5 + $0x328] sm:$0xff] }
 0xa3b   :  { %11271 = vmatpush3.bf16.msra.mxu1 %v13223_v0  ;;  %10210 = vmatprep.mubr.msk.f32.mxu1 %vm380_vm4, %v12801_v59  ;;  %v11128_v59 = vpack.c.bf16 %v8247_v42, %v8246_v22  ;;  %v11168_v22 = vpack.c.bf16 %v8267_v12, %v8266_v25  ;;  %v8268_v42 = vld [vmem:[%s14346_s5 + $0x370] sm:$0xff] }
 0xa3c   :  { %11289 = vmatprep.subr.bf16.mxu1 %v13211_v32  ;;  %11125 = vmatprep.subr.bf16.mxu0 %v11124_v29 }
 0xa3d   :  { %11127 = vmatpush3.bf16.msra.mxu0 %v11124_v29  ;;  %v13419_v29 = vld [vmem:[%s14342_s1 + $0x50] sm:$0xff] }
 0xa3e   :  { %10211 = vmatmul.mubr.msk.f32.vlgmr.msra.gmra.mrb[36].mxu1 %vm380_vm4, %v12811_v43  ;;  %11129 = vmatprep.subr.bf16.mxu0 %v11128_v59  ;;  %v8248_v43 = vld [vmem:[%s14346_s5 + $0x330] sm:$0xff] }
 0xa3f   :  { %11291 = vmatpush3.bf16.msra.mxu1 %v13211_v32  ;;  %10213 = vmatprep.mubr.msk.f32.mxu1 %vm380_vm4, %v12817_v60  ;;  %v8249_v60 = vld [vmem:[%s14346_s5 + $0x338] sm:$0xff] }
 0xa40   :  { %11293 = vmatprep.subr.bf16.mxu1 %v13223_v0 }
 0xa41   :  { %11131 = vmatpush3.bf16.msra.mxu0 %v11128_v59  ;;  %v8269_v59 = vld [vmem:[%s14346_s5 + $0x378] sm:$0xff] }
 0xa42   :  { %10214 = vmatmul.mubr.msk.f32.gmra.mrb[38].mxu1 %vm380_vm4, %v12827_v36  ;;  %v11132_v36 = vpack.c.bf16 %v8249_v60, %v8248_v43  ;;  %v13432_v43 = vld [vmem:[%s14342_s1 + $0x58] sm:$0xff]  ;;  %v11172_v60 = vpack.c.bf16 %v8269_v59, %v8268_v42 }
 0xa43   :  { %11295 = vmatpush3.bf16.msra.mxu1 %v13223_v0  ;;  %10246 = vmatprep.mubr.msk.f32.mxu1 %vm380_vm4, %v12833_v55  ;;  %v8230_v55 = vld [vmem:[%s14346_s5 + $0x2c0] sm:$0xff] }
 0xa44   :  { %11133 = vmatprep.subr.bf16.mxu0 %v11132_v36 }
 0xa45   :  { %11135 = vmatpush3.bf16.msra.mxu0 %v11132_v36 }
 0xa46   :  { %10247 = vmatmul.mubr.msk.f32.vlgmr.msra.gmra.mrb[40].mxu1 %vm380_vm4, %v12843_v37  ;;  %v8231_v37 = vld [vmem:[%s14346_s5 + $0x2c8] sm:$0xff] }
 0xa47   :  { %10249 = vmatprep.mubr.msk.f32.mxu1 %vm380_vm4, %v12848_v62  ;;  %v11136_v62 = vpack.c.bf16 %v8231_v37, %v8230_v55  ;;  %v8278_v37 = vld [vmem:[%s14346_s5 + $0x380] sm:$0xff] }
 0xa49   :  { %11137 = vmatprep.subr.bf16.mxu0 %v11136_v62 }
 0xa4a   :  { %10250 = vmatmul.mubr.msk.f32.gmra.mrb[42].mxu1 %vm380_vm4, %v12857_v2 }
 0xb01   :  { %v9974_v2 = vpop.f32.mrb[60].mxu0  ;;  %v13502_v8 = vpop.f32.mrb[28].mxu1 }
 0xb02   :  { %v4095_v46 = vpop.f32.mrb[61].mxu0  ;;  %v4977_v9 = vpop.f32.mrb[29].mxu1 }
 0xb05   :  { %v9977_v24 = vpop.f32.mrb[62].mxu0 }
 0xb06   :  { %v4105_v28 = vpop.f32.mrb[63].mxu0 }
 0xb09   :  { %v9988_v27 = vpop.f32.mrb[64].mxu0 }
 0xb0a   :  { %v4189_v35 = vpop.f32.mrb[65].mxu0 }
 0xb0b   :  { %10008 = vmatprep.mubr.msk.f32.mxu0 %vm1978_vm5, %v4189_v35  ;;  %v8283_v35 = vld [vmem:[%s14346_s5 + $0x3a8] sm:$0xff] }
 0xb0c   :  { %10009 = vmatmul.mubr.msk.f32.vlgmr.msra.gmra.mrb[68].mxu0 %vm1978_vm5, %v9988_v27  ;;  %v8282_v27 = vld [vmem:[%s14346_s5 + $0x3a0] sm:$0xff] }
 0xb0d   :  { %11139 = vmatpush3.bf16.msra.mxu0 %v11136_v62  ;;  %v9991_v33 = vpop.f32.mrb[66].mxu0  ;;  %v8279_v62 = vld [vmem:[%s14346_s5 + $0x388] sm:$0xff]  ;;  %v11192_v1 = vpack.c.bf16 %v8283_v35, %v8282_v27 }
 0xb0e   :  { %v4199_v14 = vpop.f32.mrb[67].mxu0  ;;  %11141 = vmatprep.subr.bf16.mxu0 %v11140_v63  ;;  %v8295_v27 = vld [vmem:[%s14346_s5 + $0x3e8] sm:$0xff] }
 0xb0f   :  { %10011 = vmatprep.mubr.msk.f32.mxu0 %vm1978_vm5, %v4199_v14  ;;  %v13492_v14 = vld [vmem:[%s14342_s1 + $0x78] sm:$0xff] }
 0xb10   :  { %10012 = vmatmul.mubr.msk.f32.gmra.mrb[70].mxu0 %vm1978_vm5, %v9991_v33  ;;  %v8285_v33 = vld [vmem:[%s14346_s5 + $0x3b8] sm:$0xff] }
 0xb11   :  { %11143 = vmatpush3.bf16.msra.mxu0 %v11140_v63  ;;  %10030 = vmatprep.mubr.msk.f32.mxu0 %vm1978_vm5, %v4095_v46  ;;  %v13479_v63 = vld [vmem:[%s14342_s1 + $0x70] sm:$0xff] }
 0xb12   :  { %11145 = vmatprep.subr.bf16.mxu0 %v11144_v53 }
 0xb15   :  { %11147 = vmatpush3.bf16.msra.mxu0 %v11144_v53  ;;  %v11196_v53 = vpack.c.bf16 %v8285_v33, %v8284_v11  ;;  %v8296_v33 = vld [vmem:[%s14346_s5 + $0x3f0] sm:$0xff] }
 0xb16   :  { %11149 = vmatprep.subr.bf16.mxu0 %v11148_v50 }
 0xb19   :  { %11151 = vmatpush3.bf16.msra.mxu0 %v11148_v50  ;;  %v11200_v50 = vpack.c.bf16 %v8291_v31, %v8290_v48  ;;  %v8306_v31 = vld [vmem:[%s14346_s5 + $0x400] sm:$0xff] }
 0xb1a   :  { %11153 = vmatprep.subr.bf16.mxu0 %v13211_v32 }
 0xb1c   :  { %10031 = vmatmul.mubr.msk.f32.vlgmr.msra.gmra.mrb[68].mxu0 %vm1978_vm5, %v9974_v2 }
 0xb1d   :  { %10033 = vmatprep.mubr.msk.f32.mxu0 %vm1978_vm5, %v4105_v28  ;;  %11155 = vmatpush3.bf16.msra.mxu0 %v13211_v32  ;;  %v8280_v28 = vld [vmem:[%s14346_s5 + $0x390] sm:$0xff] }
 0xb1e   :  { %11157 = vmatprep.subr.bf16.mxu0 %v13223_v0  ;;  %v11188_v47 = vpack.c.bf16 %v8281_v16, %v8280_v28 }
 0xb20   :  { %10034 = vmatmul.mubr.msk.f32.gmra.mrb[70].mxu0 %vm1978_vm5, %v9977_v24  ;;  %v11184_v24 = vpack.c.bf16 %v8279_v62, %v8278_v37 }
 0xb21   :  { %11159 = vmatpush3.bf16.msra.mxu0 %v13223_v0  ;;  %10044 = vmatprep.mubr.msk.f32.mxu0 %vm380_vm4, %v13399_v51 }
 0xb22   :  { %11161 = vmatprep.subr.bf16.mxu0 %v11160_v44 }
 0xb24   :  { %10045 = vmatmul.mubr.msk.f32.vlgmr.msra.gmra.mrb[72].mxu0 %vm380_vm4, %v13412_v26 }
 0xb25   :  { %11163 = vmatpush3.bf16.msra.mxu0 %v11160_v44  ;;  %10047 = vmatprep.mubr.msk.f32.mxu0 %vm380_vm4, %v13419_v29  ;;  %v13504_v44 = vpop.f32.mrb[30].mxu1 }
 0xb26   :  { %11165 = vmatprep.subr.bf16.mxu0 %v11164_v56  ;;  %v13506_v15 = vpop.f32.mrb[31].mxu1 }
 0xb27   :  { %v13508_v49 = vpop.f32.mrb[32].mxu1 }
 0xb28   :  { %10048 = vmatmul.mubr.msk.f32.gmra.mrb[74].mxu0 %vm380_vm4, %v13432_v43 }
 0xb29   :  { %11167 = vmatpush3.bf16.msra.mxu0 %v11164_v56  ;;  %v13510_v56 = vpop.f32.mrb[33].mxu1 }
 0xb2a   :  { %11169 = vmatprep.subr.bf16.mxu0 %v11168_v22  ;;  %v13512_v25 = vpop.f32.mrb[34].mxu1 }
 0xb2b   :  { %v13514_v12 = vpop.f32.mrb[35].mxu1 }
 0xb2d   :  { %11171 = vmatpush3.bf16.msra.mxu0 %v11168_v22  ;;  %v13516_v22 = vpop.f32.mrb[36].mxu1 }
 0xb2e   :  { %11173 = vmatprep.subr.bf16.mxu0 %v11172_v60  ;;  %v13518_v42 = vpop.f32.mrb[37].mxu1 }
 0xb2f   :  { %v13520_v59 = vpop.f32.mrb[38].mxu1 }
 0xb31   :  { %11175 = vmatpush3.bf16.msra.mxu0 %v11172_v60  ;;  %v13522_v60 = vpop.f32.mrb[39].mxu1 }
 0xb32   :  { %11177 = vmatprep.subr.bf16.mxu0 %v13211_v32 }
 0xbf7   :  { %v10046_v36 = vpop.f32.mrb[72].mxu0 }
 0xbf8   :  { %v4477_v55 = vpop.f32.mrb[73].mxu0 }
 0xbf9   :  { %10066 = vmatprep.mubr.msk.f32.mxu0 %vm1978_vm5, %v4477_v55 }
 0xbfa   :  { %10067 = vmatmul.mubr.msk.f32.vlgmr.msra.gmra.mrb[68].mxu0 %vm1978_vm5, %v10046_v36  ;;  %v13524_v36 = vpop.f32.mrb[40].mxu1 }
 0xbfb   :  { %11179 = vmatpush3.bf16.msra.mxu0 %v13211_v32  ;;  %v10049_v2 = vpop.f32.mrb[74].mxu0  ;;  %v13459_v32 = vld [vmem:[%s14342_s1 + $0x60] sm:$0xff]  ;;  %v13526_v55 = vpop.f32.mrb[41].mxu1 }
 0xbfc   :  { %11181 = vmatprep.subr.bf16.mxu0 %v13223_v0  ;;  %v4487_v46 = vpop.f32.mrb[75].mxu0  ;;  %v13528_v37 = vpop.f32.mrb[42].mxu1 }
 0xbfd   :  { %10069 = vmatprep.mubr.msk.f32.mxu0 %vm1978_vm5, %v4487_v46  ;;  %v13530_v62 = vpop.f32.mrb[43].mxu1  ;;  %v8293_v46 = vld [vmem:[%s14346_s5 + $0x3d8] sm:$0xff] }
 0xbfe   :  { %10070 = vmatmul.mubr.msk.f32.gmra.mrb[70].mxu0 %vm1978_vm5, %v10049_v2  ;;  %v8292_v2 = vld [vmem:[%s14346_s5 + $0x3d0] sm:$0xff] }
 0xbff   :  { %11183 = vmatpush3.bf16.msra.mxu0 %v13223_v0  ;;  %10080 = vmatprep.mubr.msk.f32.mxu0 %vm380_vm4, %v13459_v32  ;;  %v13472_v0 = vld [vmem:[%s14342_s1 + $0x68] sm:$0xff]  ;;  %v11204_v16 = vpack.c.bf16 %v8293_v46, %v8292_v2  ;;  %v8308_v46 = vld [vmem:[%s14346_s5 + $0x410] sm:$0xff] }
 0xc00   :  { %11185 = vmatprep.subr.bf16.mxu0 %v11184_v24 }
 0xc02   :  { %10081 = vmatmul.mubr.msk.f32.vlgmr.msra.gmra.mrb[76].mxu0 %vm380_vm4, %v13472_v0 }
 0xc03   :  { %10083 = vmatprep.mubr.msk.f32.mxu0 %vm380_vm4, %v13479_v63  ;;  %11187 = vmatpush3.bf16.msra.mxu0 %v11184_v24 }
 0xc04   :  { %11189 = vmatprep.subr.bf16.mxu0 %v11188_v47 }
 0xc06   :  { %10084 = vmatmul.mubr.msk.f32.gmra.mrb[78].mxu0 %vm380_vm4, %v13492_v14 }
 0xc07   :  { %11191 = vmatpush3.bf16.msra.mxu0 %v11188_v47  ;;  %v8294_v47 = vld [vmem:[%s14346_s5 + $0x3e0] sm:$0xff] }
 0xc08   :  { %11193 = vmatprep.subr.bf16.mxu0 %v11192_v1  ;;  %v11208_v11 = vpack.c.bf16 %v8295_v27, %v8294_v47  ;;  %v8312_v27 = vld [vmem:[%s14346_s5 + $0x430] sm:$0xff] }
 0xc0b   :  { %11195 = vmatpush3.bf16.msra.mxu0 %v11192_v1 }
 0xc0c   :  { %11197 = vmatprep.subr.bf16.mxu0 %v11196_v53 }
 0xc0f   :  { %11199 = vmatpush3.bf16.msra.mxu0 %v11196_v53  ;;  %v8297_v53 = vld [vmem:[%s14346_s5 + $0x3f8] sm:$0xff] }
 0xc10   :  { %11201 = vmatprep.subr.bf16.mxu0 %v11200_v50  ;;  %v11212_v48 = vpack.c.bf16 %v8297_v53, %v8296_v33  ;;  %v8326_v53 = vld [vmem:[%s14346_s5 + $0x460] sm:$0xff] }
 0xcd5   :  { %v10082_v24 = vpop.f32.mrb[76].mxu0 }
 0xcd6   :  { %v4672_v28 = vpop.f32.mrb[77].mxu0 }
 0xcd7   :  { %10102 = vmatprep.mubr.msk.f32.mxu0 %vm1978_vm5, %v4672_v28  ;;  %v8310_v28 = vld [vmem:[%s14346_s5 + $0x420] sm:$0xff] }
 0xcd8   :  { %10103 = vmatmul.mubr.msk.f32.vlgmr.msra.gmra.mrb[68].mxu0 %vm1978_vm5, %v10082_v24 }
 0xcd9   :  { %11203 = vmatpush3.bf16.msra.mxu0 %v11200_v50  ;;  %v10085_v35 = vpop.f32.mrb[78].mxu0  ;;  %v8307_v50 = vld [vmem:[%s14346_s5 + $0x408] sm:$0xff] }
 0xcda   :  { %v4682_v1 = vpop.f32.mrb[79].mxu0  ;;  %11205 = vmatprep.subr.bf16.mxu0 %v11204_v16  ;;  %v11224_v2 = vpack.c.bf16 %v8307_v50, %v8306_v31  ;;  %v8328_v50 = vld [vmem:[%s14346_s5 + $0x470] sm:$0xff] }
 0xcdb   :  { %10105 = vmatprep.mubr.msk.f32.mxu0 %vm1978_vm5, %v4682_v1  ;;  %v8323_v1 = vld [vmem:[%s14346_s5 + $0x448] sm:$0xff] }
 0xcdc   :  { %10106 = vmatmul.mubr.msk.f32.gmra.mrb[70].mxu0 %vm1978_vm5, %v10085_v35  ;;  %v8313_v35 = vld [vmem:[%s14346_s5 + $0x438] sm:$0xff] }
 0xcdd   :  { %11207 = vmatpush3.bf16.msra.mxu0 %v11204_v16  ;;  %10124 = vmatprep.mubr.msk.f32.mxu0 %vm1978_vm5, %v13207_v3  ;;  %v8309_v3 = vld [vmem:[%s14346_s5 + $0x418] sm:$0xff]  ;;  %v8311_v16 = vld [vmem:[%s14346_s5 + $0x428] sm:$0xff] }
 0xcde   :  { %11209 = vmatprep.subr.bf16.mxu0 %v11208_v11  ;;  %v11228_v24 = vpack.c.bf16 %v8309_v3, %v8308_v46  ;;  %v11232_v47 = vpack.c.bf16 %v8311_v16, %v8310_v28  ;;  %v8339_v46 = vld [vmem:[%s14346_s5 + $0x488] sm:$0xff]  ;;  %v8342_v28 = vld [vmem:[%s14346_s5 + $0x4a0] sm:$0xff] }
 0xcdf   :  { %v8343_v16 = vld [vmem:[%s14346_s5 + $0x4a8] sm:$0xff] }
 0xce1   :  { %11211 = vmatpush3.bf16.msra.mxu0 %v11208_v11 }
 0xce2   :  { %11213 = vmatprep.subr.bf16.mxu0 %v11212_v48 }
 0xce5   :  { %11215 = vmatpush3.bf16.msra.mxu0 %v11212_v48  ;;  %v8327_v48 = vld [vmem:[%s14346_s5 + $0x468] sm:$0xff] }
 0xce6   :  { %11225 = vmatprep.subr.bf16.mxu0 %v11224_v2  ;;  %v11256_v31 = vpack.c.bf16 %v8327_v48, %v8326_v53  ;;  %v8361_v53 = vld [vmem:[%s14346_s5 + $0x4f8] sm:$0xff]  ;;  %v8375_v48 = vld [vmem:[%s14346_s5 + $0x528] sm:$0xff] }
 0xce8   :  { %10125 = vmatmul.mubr.msk.f32.vlgmr.msra.gmra.mrb[68].mxu0 %vm1978_vm5, %v13205_v4  ;;  %v11236_v4 = vpack.c.bf16 %v8313_v35, %v8312_v27  ;;  %v8344_v27 = vld [vmem:[%s14346_s5 + $0x4b0] sm:$0xff]  ;;  %v8345_v35 = vld [vmem:[%s14346_s5 + $0x4b8] sm:$0xff] }
 0xce9   :  { %10127 = vmatprep.mubr.msk.f32.mxu0 %vm1978_vm5, %v13215_v61  ;;  %11227 = vmatpush3.bf16.msra.mxu0 %v11224_v2  ;;  %v8322_v61 = vld [vmem:[%s14346_s5 + $0x440] sm:$0xff]  ;;  %v8329_v2 = vld [vmem:[%s14346_s5 + $0x478] sm:$0xff] }
 0xcea   :  { %11229 = vmatprep.subr.bf16.mxu0 %v11228_v24  ;;  %v11248_v11 = vpack.c.bf16 %v8323_v1, %v8322_v61 }
 0xcec   :  { %10128 = vmatmul.mubr.msk.f32.gmra.mrb[70].mxu0 %vm1978_vm5, %v13213_v17  ;;  %v8324_v17 = vld [vmem:[%s14346_s5 + $0x450] sm:$0xff] }
 0xced   :  { %11231 = vmatpush3.bf16.msra.mxu0 %v11228_v24  ;;  %10160 = vmatprep.mubr.msk.f32.mxu0 %vm1978_vm5, %v4977_v9  ;;  %v8325_v9 = vld [vmem:[%s14346_s5 + $0x458] sm:$0xff] }
 0xcee   :  { %11233 = vmatprep.subr.bf16.mxu0 %v11232_v47  ;;  %v11252_v33 = vpack.c.bf16 %v8325_v9, %v8324_v17  ;;  %v8359_v17 = vld [vmem:[%s14346_s5 + $0x4e8] sm:$0xff] }
 0xcf1   :  { %11235 = vmatpush3.bf16.msra.mxu0 %v11232_v47  ;;  %v11280_v47 = vpack.c.bf16 %v8343_v16, %v8342_v28 }
 0xcf2   :  { %11237 = vmatprep.subr.bf16.mxu0 %v11236_v4 }
 0xcf5   :  { %11239 = vmatpush3.bf16.msra.mxu0 %v11236_v4  ;;  %v8355_v4 = vld [vmem:[%s14346_s5 + $0x4c8] sm:$0xff] }
 0xcf6   :  { %11249 = vmatprep.subr.bf16.mxu0 %v11248_v11 }
 0xcf8   :  { %10161 = vmatmul.mubr.msk.f32.vlgmr.msra.gmra.mrb[68].mxu0 %vm1978_vm5, %v13502_v8  ;;  %v11260_v8 = vpack.c.bf16 %v8329_v2, %v8328_v50  ;;  %v8376_v50 = vld [vmem:[%s14346_s5 + $0x530] sm:$0xff]  ;;  %v8377_v2 = vld [vmem:[%s14346_s5 + $0x538] sm:$0xff] }
 0xcf9   :  { %11251 = vmatpush3.bf16.msra.mxu0 %v11248_v11  ;;  %10163 = vmatprep.mubr.msk.f32.mxu0 %vm1978_vm5, %v13506_v15  ;;  %v8338_v15 = vld [vmem:[%s14346_s5 + $0x480] sm:$0xff] }
 0xcfa   :  { %11253 = vmatprep.subr.bf16.mxu0 %v11252_v33  ;;  %v11272_v3 = vpack.c.bf16 %v8339_v46, %v8338_v15  ;;  %v8358_v11 = vld [vmem:[%s14346_s5 + $0x4e0] sm:$0xff]  ;;  %v13718_v15 = vld [vmem:[%s14348_s7 + $0x8] sm:$0x7] }
 0xcfb   :  { %v11304_v9 = vpack.c.bf16 %v8359_v17, %v8358_v11  ;;  %v5694_v46 = vrot.slane %v13718_v15, %v64_v40 }
 0xcfc   :  { %10164 = vmatmul.mubr.msk.f32.gmra.mrb[70].mxu0 %vm1978_vm5, %v13504_v44  ;;  %v8340_v44 = vld [vmem:[%s14346_s5 + $0x490] sm:$0xff] }
 0xcfd   :  { %11255 = vmatpush3.bf16.msra.mxu0 %v11252_v33  ;;  %10196 = vmatprep.mubr.msk.f32.mxu0 %vm1978_vm5, %v13510_v56  ;;  %v8341_v56 = vld [vmem:[%s14346_s5 + $0x498] sm:$0xff]  ;;  %v8360_v33 = vld [vmem:[%s14346_s5 + $0x4f0] sm:$0xff] }
 0xcfe   :  { %11257 = vmatprep.subr.bf16.mxu0 %v11256_v31  ;;  %v11276_v24 = vpack.c.bf16 %v8341_v56, %v8340_v44 }
 0xd01   :  { %11259 = vmatpush3.bf16.msra.mxu0 %v11256_v31 }
 0xd02   :  { %11261 = vmatprep.subr.bf16.mxu0 %v11260_v8 }
 0xd05   :  { %11263 = vmatpush3.bf16.msra.mxu0 %v11260_v8  ;;  %v11324_v8 = vpack.c.bf16 %v8377_v2, %v8376_v50 }
 0xd06   :  { %11273 = vmatprep.subr.bf16.mxu0 %v11272_v3 }
 0xd08   :  { %10197 = vmatmul.mubr.msk.f32.vlgmr.msra.gmra.mrb[68].mxu0 %vm1978_vm5, %v13508_v49  ;;  %v11284_v49 = vpack.c.bf16 %v8345_v35, %v8344_v27 }
 0xd09   :  { %11275 = vmatpush3.bf16.msra.mxu0 %v11272_v3  ;;  %10199 = vmatprep.mubr.msk.f32.mxu0 %vm1978_vm5, %v13514_v12  ;;  %v8354_v12 = vld [vmem:[%s14346_s5 + $0x4c0] sm:$0xff] }
 0xd0a   :  { %11277 = vmatprep.subr.bf16.mxu0 %v11276_v24  ;;  %v11296_v61 = vpack.c.bf16 %v8355_v4, %v8354_v12 }
 0xd0c   :  { %10200 = vmatmul.mubr.msk.f32.gmra.mrb[70].mxu0 %vm1978_vm5, %v13512_v25  ;;  %v8356_v25 = vld [vmem:[%s14346_s5 + $0x4d0] sm:$0xff] }
 0xd0d   :  { %11279 = vmatpush3.bf16.msra.mxu0 %v11276_v24  ;;  %10232 = vmatprep.mubr.msk.f32.mxu0 %vm1978_vm5, %v13518_v42  ;;  %v8357_v42 = vld [vmem:[%s14346_s5 + $0x4d8] sm:$0xff] }
 0xd0e   :  { %11281 = vmatprep.subr.bf16.mxu0 %v11280_v47  ;;  %v11300_v1 = vpack.c.bf16 %v8357_v42, %v8356_v25 }
 0xd11   :  { %11283 = vmatpush3.bf16.msra.mxu0 %v11280_v47 }
 0xd12   :  { %11285 = vmatprep.subr.bf16.mxu0 %v11284_v49 }
 0xd15   :  { %11287 = vmatpush3.bf16.msra.mxu0 %v11284_v49 }
 0xd16   :  { %11297 = vmatprep.subr.bf16.mxu0 %v11296_v61 }
 0xd18   :  { %10233 = vmatmul.mubr.msk.f32.vlgmr.msra.gmra.mrb[68].mxu0 %vm1978_vm5, %v13516_v22  ;;  %v11308_v22 = vpack.c.bf16 %v8361_v53, %v8360_v33 }
 0xd19   :  { %11299 = vmatpush3.bf16.msra.mxu0 %v11296_v61  ;;  %10235 = vmatprep.mubr.msk.f32.mxu0 %vm1978_vm5, %v13522_v60  ;;  %v8371_v60 = vld [vmem:[%s14346_s5 + $0x508] sm:$0xff] }
 0xd1a   :  { %11301 = vmatprep.subr.bf16.mxu0 %v11300_v1 }
 0xd1c   :  { %10236 = vmatmul.mubr.msk.f32.gmra.mrb[70].mxu0 %vm1978_vm5, %v13520_v59  ;;  %v8370_v59 = vld [vmem:[%s14346_s5 + $0x500] sm:$0xff] }
 0xd1d   :  { %11303 = vmatpush3.bf16.msra.mxu0 %v11300_v1  ;;  %10268 = vmatprep.mubr.msk.f32.mxu0 %vm1978_vm5, %v13526_v55  ;;  %v11312_v55 = vpack.c.bf16 %v8371_v60, %v8370_v59 }
 0xd1e   :  { %11305 = vmatprep.subr.bf16.mxu0 %v11304_v9 }
 0xd1f   :  { %11313 = vmatprep.subr.bf16.mxu1 %v11312_v55 }
 0xd20   :  { %11315 = vmatpush3.bf16.msra.mxu1 %v11312_v55 }
 0xd21   :  { %11307 = vmatpush3.bf16.msra.mxu0 %v11304_v9 }
 0xd22   :  { %11309 = vmatprep.subr.bf16.mxu0 %v11308_v22 }
 0xd25   :  { %11311 = vmatpush3.bf16.msra.mxu0 %v11308_v22 }
 0xd28   :  { %10269 = vmatmul.mubr.msk.f32.vlgmr.msra.gmra.mrb[68].mxu0 %vm1978_vm5, %v13524_v36  ;;  %v8372_v36 = vld [vmem:[%s14346_s5 + $0x510] sm:$0xff] }
 0xd29   :  { %10271 = vmatprep.mubr.msk.f32.mxu0 %vm1978_vm5, %v13530_v62  ;;  %v8374_v62 = vld [vmem:[%s14346_s5 + $0x520] sm:$0xff] }
 0xd2a   :  { %v11320_v31 = vpack.c.bf16 %v8375_v48, %v8374_v62 }
 0xd2c   :  { %10272 = vmatmul.mubr.msk.f32.gmra.mrb[70].mxu0 %vm1978_vm5, %v13528_v37  ;;  %v8373_v37 = vld [vmem:[%s14346_s5 + $0x518] sm:$0xff] }
 0xd2d   :  { %10412 = vmatprep.mubr.msk.f32.mxu0 %vm380_vm4, %v13459_v32  ;;  %v11316_v32 = vpack.c.bf16 %v8373_v37, %v8372_v36 }
 0xd2f   :  { %11317 = vmatprep.subr.bf16.mxu1 %v11316_v32 }
 0xd30   :  { %11319 = vmatpush3.bf16.msra.mxu1 %v11316_v32 }
 0xd31   :  { %11321 = vmatprep.subr.bf16.mxu1 %v11320_v31 }
 0xd34   :  { %11323 = vmatpush3.bf16.msra.mxu1 %v11320_v31 }
 0xd35   :  { %11325 = vmatprep.subr.bf16.mxu1 %v11324_v8 }
 0xd38   :  { %11327 = vmatpush3.bf16.msra.mxu1 %v11324_v8 }
 0xdfb   :  { %v10270_v3 = vpop.f32.mrb[68].mxu0 }
 0xdfc   :  { %v5696_v44 = vadd.f32 %v10270_v3, %v5694_v46  ;;  %v5668_v56 = vpop.f32.mrb[69].mxu0 }
 0xdfd   :  { %v5695_v24 = vadd.f32 %v5694_v46, %v5668_v56 }
 0xdfe   :  { %v8367_v28 = vmul.f32 -1.442695, %v5696_v44 }
 0xdff   :  { %v8366_v16 = vmul.f32 -1.442695, %v5695_v24  ;;  %v10273_v47 = vpop.f32.mrb[70].mxu0 }
 0xe00   :  { %11875 = vpow2.f32 %v8367_v28  ;;  %v5698_v27 = vadd.f32 %v10273_v47, %v5694_v46  ;;  %v5678_v35 = vpop.f32.mrb[71].mxu0 }
 0xe01   :  { %11877 = vpow2.f32 %v8366_v16  ;;  %v5697_v49 = vadd.f32 %v5694_v46, %v5678_v35 }
 0xe02   :  { %v8369_v12 = vmul.f32 -1.442695, %v5698_v27 }
 0xe03   :  { %v8368_v4 = vmul.f32 -1.442695, %v5697_v49 }
 0xe04   :  { %11879 = vpow2.f32 %v8369_v12 }
 0xe05   :  { %11881 = vpow2.f32 %v8368_v4 }
 0xe0a   :  { %v11876_v61 = vpop.eup %11875 }
 0xe0b   :  { %v11878_v25 = vpop.eup %11877  ;;  %v5712_v42 = vadd.f32 1.0, %v11876_v61 }
 0xe0c   :  { %v5711_v40 = vadd.f32 1.0, %v11878_v25 }
 0xe0d   :  { %11883 = vrcp.f32 %v5712_v42 }
 0xe0e   :  { %v11880_v1 = vpop.eup %11879  ;;  %11885 = vrcp.f32 %v5711_v40 }
 0xe0f   :  { %v11882_v11 = vpop.eup %11881  ;;  %v5714_v17 = vadd.f32 1.0, %v11880_v1 }
 0xe10   :  { %v5713_v9 = vadd.f32 1.0, %v11882_v11 }
 0xe11   :  { %11887 = vrcp.f32 %v5714_v17 }
 0xe12   :  { %11889 = vrcp.f32 %v5713_v9 }
 0xe17   :  { %v11884_v33 = vpop.eup %11883 }
 0xe18   :  { %v11886_v53 = vpop.eup %11885  ;;  %v5724_v22 = vmul.f32 %v11884_v33, %v5696_v44 }
 0xe19   :  { %v5723_v59 = vmul.f32 %v11886_v53, %v5695_v24  ;;  %v8402_v53 = vld [vmem:[%s14346_s5 + $0x580] sm:$0xff] }
 0xe1a   :  { %v13727_v37 = vadd.f32 %v5724_v22, %v13181_v7  ;;  %v8403_v22 = vld [vmem:[%s14346_s5 + $0x588] sm:$0xff] }
 0xe1b   :  { %v11888_v60 = vpop.eup %11887  ;;  %v13724_v55 = vadd.f32 %v5723_v59, %v13178_v6  ;;  %v5743_v6 = vrot.slane %v13718_v15, %v1799_v34  ;;  %v11968_v59 = vld [vmem:[%s14342_s1 + $0xd0] sm:$0xff] }
 0xe1c   :  { %v11890_v36 = vpop.eup %11889  ;;  %v5726_v32 = vmul.f32 %v11888_v60, %v5698_v27  ;;  %v11969_v60 = vld [vmem:[%s14342_s1 + $0xd8] sm:$0xff] }
 0xe1d   :  { %v5725_v62 = vmul.f32 %v11890_v36, %v5697_v49  ;;  %10290 = vmatprep.mubr.msk.f32.mxu1 %vm1978_vm5, %v13724_v55  ;;  %v11970_v36 = vld [vmem:[%s14342_s1 + $0xe0] sm:$0xff] }
 0xe1e   :  { %10291 = vmatmul.mubr.msk.f32.vlgmr.msra.gmra.mrb[44].mxu1 %vm1978_vm5, %v13727_v37  ;;  %v13737_v31 = vadd.f32 %v5726_v32, %v13191_v30  ;;  %v11971_v32 = vld [vmem:[%s14342_s1 + $0xe8] sm:$0xff] }
 0xe1f   :  { %v13734_v48 = vadd.f32 %v5725_v62, %v13188_v18  ;;  %v11972_v62 = vld [vmem:[%s14342_s1 + $0xf0] sm:$0xff] }
 0xe21   :  { %10293 = vmatprep.mubr.msk.f32.mxu1 %vm1978_vm5, %v13734_v48 }
 0xe22   :  { %10294 = vmatmul.mubr.msk.f32.gmra.mrb[46].mxu1 %vm1978_vm5, %v13737_v31 }
 0xe23   :  { %10304 = vmatprep.mubr.msk.f32.mxu1 %vm380_vm4, %v13200_v57 }
 0xef1   :  { %v10292_v7 = vpop.f32.mrb[44].mxu1 }
 0xef2   :  { %v5828_v50 = vadd.f32 %v10292_v7, %v5743_v6  ;;  %v5822_v18 = vpop.f32.mrb[45].mxu1  ;;  %v11974_v7 = vld [vmem:[%s14342_s1 + $0x100] sm:$0xff] }
 0xef3   :  { %v5823_v2 = vadd.f32 %v5822_v18, %v5743_v6  ;;  %v11976_v18 = vld [vmem:[%s14342_s1 + $0x110] sm:$0xff] }
 0xef4   :  { %v8383_v8 = vmul.f32 -1.442695, %v5828_v50 }
 0xef5   :  { %v8382_v30 = vmul.f32 -1.442695, %v5823_v2  ;;  %v10295_v46 = vpop.f32.mrb[46].mxu1 }
 0xef6   :  { %11891 = vpow2.f32 %v8383_v8  ;;  %v5838_v3 = vadd.f32 %v10295_v46, %v5743_v6  ;;  %v5832_v44 = vpop.f32.mrb[47].mxu1  ;;  %v8406_v8 = vld [vmem:[%s14346_s5 + $0x5a0] sm:$0xff] }
 0xef7   :  { %11893 = vpow2.f32 %v8382_v30  ;;  %v5833_v56 = vadd.f32 %v5832_v44, %v5743_v6  ;;  %v11973_v6 = vld [vmem:[%s14342_s1 + $0xf8] sm:$0xff]  ;;  %v8407_v30 = vld [vmem:[%s14346_s5 + $0x5a8] sm:$0xff] }
 0xef8   :  { %v8385_v24 = vmul.f32 -1.442695, %v5838_v3  ;;  %v11352_v46 = vpack.c.bf16 %v8407_v30, %v8406_v8  ;;  %v8409_v44 = vld [vmem:[%s14346_s5 + $0x5b8] sm:$0xff] }
 0xef9   :  { %v8384_v28 = vmul.f32 -1.442695, %v5833_v56 }
 0xefa   :  { %11895 = vpow2.f32 %v8385_v24  ;;  %v8390_v24 = vld [vmem:[%s14346_s5 + $0x540] sm:$0xff] }
 0xefb   :  { %11897 = vpow2.f32 %v8384_v28  ;;  %v8391_v28 = vld [vmem:[%s14346_s5 + $0x548] sm:$0xff] }
 0xf00   :  { %v11892_v57 = vpop.eup %11891 }
 0xf01   :  { %v11894_v16 = vpop.eup %11893  ;;  %v5854_v47 = vadd.f32 1.0, %v11892_v57  ;;  %v11360_v57 = vpack.c.bf16 %v8391_v28, %v8390_v24 }
 0xf02   :  { %v5853_v34 = vadd.f32 1.0, %v11894_v16 }
 0xf03   :  { %11899 = vrcp.f32 %v5854_v47 }
 0xf04   :  { %v11896_v27 = vpop.eup %11895  ;;  %11901 = vrcp.f32 %v5853_v34 }
 0xf05   :  { %v11898_v35 = vpop.eup %11897  ;;  %v5856_v49 = vadd.f32 1.0, %v11896_v27 }
 0xf06   :  { %v5855_v12 = vadd.f32 1.0, %v11898_v35  ;;  %v8392_v35 = vld [vmem:[%s14346_s5 + $0x550] sm:$0xff] }
 0xf07   :  { %11903 = vrcp.f32 %v5856_v49  ;;  %v8393_v49 = vld [vmem:[%s14346_s5 + $0x558] sm:$0xff] }
 0xf08   :  { %11905 = vrcp.f32 %v5855_v12 }
 0xf0d   :  { %v11900_v4 = vpop.eup %11899 }
 0xf0e   :  { %v11902_v61 = vpop.eup %11901  ;;  %v13748_v25 = vmul.f32 %v11900_v4, %v5828_v50  ;;  %v11975_v50 = vld [vmem:[%s14342_s1 + $0x108] sm:$0xff] }
 0xf0f   :  { %v13750_v42 = vmul.f32 %v11902_v61, %v5823_v2  ;;  %v11977_v2 = vld [vmem:[%s14342_s1 + $0x118] sm:$0xff]  ;;  %v11364_v61 = vpack.c.bf16 %v8393_v49, %v8392_v35  ;;  %v8440_v35 = vld [vmem:[%s14346_s5 + $0x610] sm:$0xff] }
 0xf10   :  { %v8441_v49 = vld [vmem:[%s14346_s5 + $0x618] sm:$0xff] }
 0xf11   :  { %v11904_v40 = vpop.eup %11903  ;;  %v13754_v1 = vpack.c.bf16 %v13748_v25, %v13750_v42 }
 0xf12   :  { %v11906_v11 = vpop.eup %11905  ;;  %v13756_v17 = vmul.f32 %v11904_v40, %v5838_v3  ;;  %v8408_v3 = vld [vmem:[%s14346_s5 + $0x5b0] sm:$0xff]  ;;  %v8394_v40 = vld [vmem:[%s14346_s5 + $0x560] sm:$0xff] }
 0xf13   :  { %v13758_v9 = vmul.f32 %v11906_v11, %v5833_v56  ;;  %11329 = vmatprep.subr.bf16.mxu1 %v13754_v1  ;;  %11401 = vmatprep.subr.bf16.mxu0 %v13754_v1  ;;  %v11356_v56 = vpack.c.bf16 %v8409_v44, %v8408_v3  ;;  %v8395_v11 = vld [vmem:[%s14346_s5 + $0x568] sm:$0xff] }
 0xf14   :  { %11331 = vmatpush3.bf16.msra.mxu1 %v13754_v1  ;;  %11403 = vmatpush3.bf16.msra.mxu0 %v13754_v1 }
 0xf15   :  { %v13766_v33 = vpack.c.bf16 %v13756_v17, %v13758_v9 }
 0xf17   :  { %11333 = vmatprep.subr.bf16.mxu1 %v13766_v33  ;;  %11405 = vmatprep.subr.bf16.mxu0 %v13766_v33 }
 0xf18   :  { %11335 = vmatpush3.bf16.msra.mxu1 %v13766_v33  ;;  %11407 = vmatpush3.bf16.msra.mxu0 %v13766_v33 }
 0xf19   :  { %11337 = vmatprep.subr.bf16.mxu1 %v13754_v1  ;;  %11441 = vmatprep.subr.bf16.mxu0 %v13754_v1 }
 0xf1b   :  { %10305 = vmatmul.mubr.msk.f32.vlgmr.msra.gmra.mrb[48].mxu1 %vm380_vm4, %v13234_v10  ;;  %10413 = vmatmul.mubr.msk.f32.vlgmr.msra.gmra.mrb[80].mxu0 %vm380_vm4, %v13472_v0  ;;  %v11344_v10 = vpack.c.bf16 %v8403_v22, %v8402_v53  ;;  %v8405_v0 = vld [vmem:[%s14346_s5 + $0x598] sm:$0xff] }
 0xf1c   :  { %11339 = vmatpush3.bf16.msra.mxu1 %v13754_v1  ;;  %11443 = vmatpush3.bf16.msra.mxu0 %v13754_v1 }
 0xf1d   :  { %11341 = vmatprep.subr.bf16.mxu1 %v13766_v33  ;;  %11445 = vmatprep.subr.bf16.mxu0 %v13766_v33 }
 0xf1e   :  { %10307 = vmatprep.mubr.msk.f32.mxu1 %vm380_vm4, %v13253_v52  ;;  %10415 = vmatprep.mubr.msk.f32.mxu0 %vm380_vm4, %v13479_v63  ;;  %v11962_v52 = vld [vmem:[%s14342_s1 + $0xa0] sm:$0xff]  ;;  %v11964_v63 = vld [vmem:[%s14342_s1 + $0xb0] sm:$0xff] }
 0xf1f   :  { %10308 = vmatmul.mubr.msk.f32.gmra.mrb[50].mxu1 %vm380_vm4, %v13262_v21  ;;  %10416 = vmatmul.mubr.msk.f32.gmra.mrb[82].mxu0 %vm380_vm4, %v13492_v14  ;;  %v8404_v21 = vld [vmem:[%s14346_s5 + $0x590] sm:$0xff]  ;;  %v11965_v14 = vld [vmem:[%s14342_s1 + $0xb8] sm:$0xff] }
 0xf20   :  { %11343 = vmatpush3.bf16.msra.mxu1 %v13766_v33  ;;  %11447 = vmatpush3.bf16.msra.mxu0 %v13766_v33 }
 0xf21   :  { %11465 = vmatprep.subr.bf16.mxu0 %v13754_v1  ;;  %10318 = vmatprep.mubr.msk.f32.mxu1 %vm380_vm4, %v13274_v54  ;;  %v11963_v54 = vld [vmem:[%s14342_s1 + $0xa8] sm:$0xff] }
 0xf22   :  { %10470 = vmatprep.mubr.msk.f32.mxu0 %vm380_vm4, %v11962_v52  ;;  %11345 = vmatprep.subr.bf16.mxu1 %v11344_v10  ;;  %v8396_v52 = vld [vmem:[%s14346_s5 + $0x570] sm:$0xff] }
 0xf23   :  { %10319 = vmatmul.mubr.msk.f32.vlgmr.msra.gmra.mrb[52].mxu1 %vm380_vm4, %v13289_v41  ;;  %10471 = vmatmul.mubr.msk.f32.vlgmr.msra.gmra.mrb[84].mxu0 %vm380_vm4, %v11963_v54  ;;  %v11348_v41 = vpack.c.bf16 %v8405_v0, %v8404_v21  ;;  %v8397_v21 = vld [vmem:[%s14346_s5 + $0x578] sm:$0xff]  ;;  %v8422_v54 = vld [vmem:[%s14346_s5 + $0x5c0] sm:$0xff] }
 0xf24   :  { %11467 = vmatpush3.bf16.msra.mxu0 %v13754_v1  ;;  %10321 = vmatprep.mubr.msk.f32.mxu1 %vm380_vm4, %v13299_v13  ;;  %v11966_v13 = vld [vmem:[%s14342_s1 + $0xc0] sm:$0xff]  ;;  %v11372_v0 = vpack.c.bf16 %v8397_v21, %v8396_v52  ;;  %v8444_v52 = vld [vmem:[%s14346_s5 + $0x630] sm:$0xff]  ;;  %v8445_v21 = vld [vmem:[%s14346_s5 + $0x638] sm:$0xff] }
 0xf25   :  { %11469 = vmatprep.subr.bf16.mxu0 %v13766_v33  ;;  %10473 = vmatprep.mubr.msk.f32.mxu0 %vm380_vm4, %v11964_v63  ;;  %v8423_v63 = vld [vmem:[%s14346_s5 + $0x5c8] sm:$0xff] }
 0xf26   :  { %11347 = vmatpush3.bf16.msra.mxu1 %v11344_v10  ;;  %v11368_v10 = vpack.c.bf16 %v8395_v11, %v8394_v40  ;;  %v8442_v40 = vld [vmem:[%s14346_s5 + $0x620] sm:$0xff]  ;;  %v8443_v11 = vld [vmem:[%s14346_s5 + $0x628] sm:$0xff] }
 0xf27   :  { %10322 = vmatmul.mubr.msk.f32.gmra.mrb[54].mxu1 %vm380_vm4, %v13309_v19  ;;  %10474 = vmatmul.mubr.msk.f32.gmra.mrb[86].mxu0 %vm380_vm4, %v11965_v14  ;;  %v11967_v19 = vld [vmem:[%s14342_s1 + $0xc8] sm:$0xff]  ;;  %v8424_v14 = vld [vmem:[%s14346_s5 + $0x5d0] sm:$0xff] }
 0xf28   :  { %11471 = vmatpush3.bf16.msra.mxu0 %v13766_v33  ;;  %10506 = vmatprep.mubr.msk.f32.mxu0 %vm380_vm4, %v11966_v13  ;;  %v8425_v13 = vld [vmem:[%s14346_s5 + $0x5d8] sm:$0xff] }
 0xf29   :  { %11489 = vmatprep.subr.bf16.mxu0 %v13754_v1  ;;  %11349 = vmatprep.subr.bf16.mxu1 %v11348_v41 }
 0xf2a   :  { %11351 = vmatpush3.bf16.msra.mxu1 %v11348_v41  ;;  %v11384_v41 = vpack.c.bf16 %v8423_v63, %v8422_v54  ;;  %v8450_v54 = vld [vmem:[%s14346_s5 + $0x640] sm:$0xff]  ;;  %v8451_v63 = vld [vmem:[%s14346_s5 + $0x648] sm:$0xff] }
 0xf2b   :  { %10507 = vmatmul.mubr.msk.f32.vlgmr.msra.gmra.mrb[88].mxu0 %vm380_vm4, %v11967_v19  ;;  %11353 = vmatprep.subr.bf16.mxu1 %v11352_v46  ;;  %v8426_v19 = vld [vmem:[%s14346_s5 + $0x5e0] sm:$0xff] }
 0xf2c   :  { %11491 = vmatpush3.bf16.msra.mxu0 %v13754_v1  ;;  %10509 = vmatprep.mubr.msk.f32.mxu0 %vm380_vm4, %v11968_v59  ;;  %v8427_v59 = vld [vmem:[%s14346_s5 + $0x5e8] sm:$0xff] }
 0xf2d   :  { %11493 = vmatprep.subr.bf16.mxu0 %v13766_v33 }
 0xf2e   :  { %11355 = vmatpush3.bf16.msra.mxu1 %v11352_v46 }
 0xf2f   :  { %10510 = vmatmul.mubr.msk.f32.gmra.mrb[90].mxu0 %vm380_vm4, %v11969_v60  ;;  %11357 = vmatprep.subr.bf16.mxu1 %v11356_v56  ;;  %v8429_v60 = vld [vmem:[%s14346_s5 + $0x5f8] sm:$0xff] }
 0xf30   :  { %11495 = vmatpush3.bf16.msra.mxu0 %v13766_v33  ;;  %10542 = vmatprep.mubr.msk.f32.mxu0 %vm380_vm4, %v11970_v36  ;;  %v8439_v36 = vld [vmem:[%s14346_s5 + $0x608] sm:$0xff] }
 0xf31   :  { %11513 = vmatprep.subr.bf16.mxu0 %v13754_v1 }
 0xf32   :  { %11359 = vmatpush3.bf16.msra.mxu1 %v11356_v56 }
 0xf33   :  { %10543 = vmatmul.mubr.msk.f32.vlgmr.msra.gmra.mrb[92].mxu0 %vm380_vm4, %v11971_v32  ;;  %11361 = vmatprep.subr.bf16.mxu1 %v11360_v57 }
 0xf34   :  { %11515 = vmatpush3.bf16.msra.mxu0 %v13754_v1  ;;  %10545 = vmatprep.mubr.msk.f32.mxu0 %vm380_vm4, %v11972_v62 }
 0xf35   :  { %11517 = vmatprep.subr.bf16.mxu0 %v13766_v33 }
 0xf37   :  { %10546 = vmatmul.mubr.msk.f32.gmra.mrb[94].mxu0 %vm380_vm4, %v11973_v6 }
 0xf38   :  { %11519 = vmatpush3.bf16.msra.mxu0 %v13766_v33  ;;  %10578 = vmatprep.mubr.msk.f32.mxu0 %vm380_vm4, %v11974_v7 }
 0xf3b   :  { %10579 = vmatmul.mubr.msk.f32.vlgmr.msra.gmra.mrb[96].mxu0 %vm380_vm4, %v11975_v50 }
 0xf3c   :  { %10581 = vmatprep.mubr.msk.f32.mxu0 %vm380_vm4, %v11976_v18 }
 0xf3f   :  { %10582 = vmatmul.mubr.msk.f32.gmra.mrb[98].mxu0 %vm380_vm4, %v11977_v2 }
 0xfee   :  { %v10306_v16 = vpop.f32.mrb[48].mxu1  ;;  %v10414_v62 = vpop.f32.mrb[80].mxu0 }
 0xfef   :  { %v5935_v47 = vpop.f32.mrb[49].mxu1  ;;  %v6512_v6 = vpop.f32.mrb[81].mxu0 }
 0xff2   :  { %v10309_v34 = vpop.f32.mrb[50].mxu1  ;;  %v10417_v7 = vpop.f32.mrb[82].mxu0 }
 0xff3   :  { %v5945_v27 = vpop.f32.mrb[51].mxu1 }
 0xff6   :  { %v10320_v12 = vpop.f32.mrb[52].mxu1 }
 0xff7   :  { %v6029_v4 = vpop.f32.mrb[53].mxu1 }
 0xff8   :  { %10340 = vmatprep.mubr.msk.f32.mxu1 %vm1978_vm5, %v6029_v4 }
 0xff9   :  { %10341 = vmatmul.mubr.msk.f32.vlgmr.msra.gmra.mrb[56].mxu1 %vm1978_vm5, %v10320_v12 }
 0xffa   :  { %11363 = vmatpush3.bf16.msra.mxu1 %v11360_v57  ;;  %v10323_v53 = vpop.f32.mrb[54].mxu1 }
 0xffb   :  { %v6039_v22 = vpop.f32.mrb[55].mxu1  ;;  %11365 = vmatprep.subr.bf16.mxu1 %v11364_v61 }
 0xffc   :  { %10343 = vmatprep.mubr.msk.f32.mxu1 %vm1978_vm5, %v6039_v22  ;;  %v11416_v22 = vpack.c.bf16 %v8443_v11, %v8442_v40  ;;  %v8486_v11 = vld [vmem:[%s14346_s5 + $0x6e0] sm:$0xff] }
 0xffd   :  { %10344 = vmatmul.mubr.msk.f32.gmra.mrb[58].mxu1 %vm1978_vm5, %v10323_v53 }
 0xffe   :  { %11367 = vmatpush3.bf16.msra.mxu1 %v11364_v61  ;;  %10362 = vmatprep.mubr.msk.f32.mxu1 %vm1978_vm5, %v5935_v47  ;;  %v11412_v61 = vpack.c.bf16 %v8441_v49, %v8440_v35  ;;  %v8472_v49 = vld [vmem:[%s14346_s5 + $0x6b0] sm:$0xff] }
 0xfff   :  { %11369 = vmatprep.subr.bf16.mxu1 %v11368_v10 }
0x1002   :  { %11371 = vmatpush3.bf16.msra.mxu1 %v11368_v10 }
0x1003   :  { %11373 = vmatprep.subr.bf16.mxu1 %v11372_v0 }
0x1006   :  { %11375 = vmatpush3.bf16.msra.mxu1 %v11372_v0  ;;  %v11420_v0 = vpack.c.bf16 %v8445_v21, %v8444_v52  ;;  %v8489_v52 = vld [vmem:[%s14346_s5 + $0x6f8] sm:$0xff]  ;;  %v8499_v21 = vld [vmem:[%s14346_s5 + $0x708] sm:$0xff] }
0x1007   :  { %11377 = vmatprep.subr.bf16.mxu1 %v13754_v1 }
0x1009   :  { %10363 = vmatmul.mubr.msk.f32.vlgmr.msra.gmra.mrb[56].mxu1 %vm1978_vm5, %v10306_v16 }
0x100a   :  { %10365 = vmatprep.mubr.msk.f32.mxu1 %vm1978_vm5, %v5945_v27  ;;  %11379 = vmatpush3.bf16.msra.mxu1 %v13754_v1  ;;  %v11388_v1 = vpack.c.bf16 %v8425_v13, %v8424_v14  ;;  %v8452_v14 = vld [vmem:[%s14346_s5 + $0x650] sm:$0xff]  ;;  %v8453_v13 = vld [vmem:[%s14346_s5 + $0x658] sm:$0xff] }
0x100b   :  { %11381 = vmatprep.subr.bf16.mxu1 %v13766_v33 }
0x100d   :  { %10366 = vmatmul.mubr.msk.f32.gmra.mrb[58].mxu1 %vm1978_vm5, %v10309_v34 }
0x100e   :  { %11383 = vmatpush3.bf16.msra.mxu1 %v13766_v33  ;;  %10376 = vmatprep.mubr.msk.f32.mxu1 %vm380_vm4, %v13399_v51  ;;  %v11392_v33 = vpack.c.bf16 %v8427_v59, %v8426_v19  ;;  %v8428_v51 = vld [vmem:[%s14346_s5 + $0x5f0] sm:$0xff]  ;;  %v8454_v19 = vld [vmem:[%s14346_s5 + $0x660] sm:$0xff]  ;;  %v8455_v59 = vld [vmem:[%s14346_s5 + $0x668] sm:$0xff] }
0x100f   :  { %11385 = vmatprep.subr.bf16.mxu1 %v11384_v41 }
0x1011   :  { %10377 = vmatmul.mubr.msk.f32.vlgmr.msra.gmra.mrb[60].mxu1 %vm380_vm4, %v13412_v26  ;;  %v11396_v26 = vpack.c.bf16 %v8429_v60, %v8428_v51  ;;  %v8456_v51 = vld [vmem:[%s14346_s5 + $0x670] sm:$0xff]  ;;  %v8457_v60 = vld [vmem:[%s14346_s5 + $0x678] sm:$0xff] }
0x1012   :  { %10379 = vmatprep.mubr.msk.f32.mxu1 %vm380_vm4, %v13419_v29  ;;  %11387 = vmatpush3.bf16.msra.mxu1 %v11384_v41  ;;  %v8438_v29 = vld [vmem:[%s14346_s5 + $0x600] sm:$0xff]  ;;  %v11424_v41 = vpack.c.bf16 %v8451_v63, %v8450_v54 }
0x1013   :  { %11389 = vmatprep.subr.bf16.mxu1 %v11388_v1  ;;  %v11408_v32 = vpack.c.bf16 %v8439_v36, %v8438_v29  ;;  %v8466_v29 = vld [vmem:[%s14346_s5 + $0x680] sm:$0xff]  ;;  %v8467_v36 = vld [vmem:[%s14346_s5 + $0x688] sm:$0xff] }
0x1014   :  { %v8502_v63 = vld [vmem:[%s14346_s5 + $0x720] sm:$0xff] }
0x1015   :  { %10380 = vmatmul.mubr.msk.f32.gmra.mrb[62].mxu1 %vm380_vm4, %v13432_v43  ;;  %v6522_v43 = vpop.f32.mrb[83].mxu0 }
0x1016   :  { %11391 = vmatpush3.bf16.msra.mxu1 %v11388_v1  ;;  %v13974_v50 = vpop.f32.mrb[84].mxu0  ;;  %v11428_v1 = vpack.c.bf16 %v8453_v13, %v8452_v14  ;;  %v8504_v13 = vld [vmem:[%s14346_s5 + $0x730] sm:$0xff] }
0x1017   :  { %11393 = vmatprep.subr.bf16.mxu1 %v11392_v33  ;;  %v13976_v18 = vpop.f32.mrb[85].mxu0 }
0x1018   :  { %v13978_v2 = vpop.f32.mrb[86].mxu0 }
0x1019   :  { %v13980_v8 = vpop.f32.mrb[87].mxu0 }
0x101a   :  { %11395 = vmatpush3.bf16.msra.mxu1 %v11392_v33  ;;  %v13982_v30 = vpop.f32.mrb[88].mxu0  ;;  %v11432_v33 = vpack.c.bf16 %v8455_v59, %v8454_v19  ;;  %v8515_v19 = vld [vmem:[%s14346_s5 + $0x748] sm:$0xff] }
0x101b   :  { %11397 = vmatprep.subr.bf16.mxu1 %v11396_v26  ;;  %v13984_v46 = vpop.f32.mrb[89].mxu0 }
0x101c   :  { %v13986_v3 = vpop.f32.mrb[90].mxu0 }
0x101d   :  { %v13988_v44 = vpop.f32.mrb[91].mxu0 }
0x101e   :  { %11399 = vmatpush3.bf16.msra.mxu1 %v11396_v26  ;;  %v13990_v56 = vpop.f32.mrb[92].mxu0  ;;  %v11436_v26 = vpack.c.bf16 %v8457_v60, %v8456_v51  ;;  %v8518_v51 = vld [vmem:[%s14346_s5 + $0x760] sm:$0xff]  ;;  %v8519_v60 = vld [vmem:[%s14346_s5 + $0x768] sm:$0xff] }
0x101f   :  { %11409 = vmatprep.subr.bf16.mxu1 %v11408_v32  ;;  %v13992_v24 = vpop.f32.mrb[93].mxu0 }
0x1020   :  { %v13994_v28 = vpop.f32.mrb[94].mxu0 }
0x1021   :  { %v13996_v57 = vpop.f32.mrb[95].mxu0 }
0x1022   :  { %v13998_v16 = vpop.f32.mrb[96].mxu0 }
0x1023   :  { %v14000_v47 = vpop.f32.mrb[97].mxu0 }
0x1024   :  { %v14002_v34 = vpop.f32.mrb[98].mxu0 }
0x1025   :  { %v14004_v27 = vpop.f32.mrb[99].mxu0 }
0x10e4   :  { %v10378_v12 = vpop.f32.mrb[60].mxu1 }
0x10e5   :  { %v6317_v4 = vpop.f32.mrb[61].mxu1 }
0x10e6   :  { %10398 = vmatprep.mubr.msk.f32.mxu1 %vm1978_vm5, %v6317_v4  ;;  %v8483_v4 = vld [vmem:[%s14346_s5 + $0x6c8] sm:$0xff] }
0x10e7   :  { %10399 = vmatmul.mubr.msk.f32.vlgmr.msra.gmra.mrb[56].mxu1 %vm1978_vm5, %v10378_v12  ;;  %v8473_v12 = vld [vmem:[%s14346_s5 + $0x6b8] sm:$0xff] }
0x10e8   :  { %11411 = vmatpush3.bf16.msra.mxu1 %v11408_v32  ;;  %v10381_v53 = vpop.f32.mrb[62].mxu1  ;;  %v11448_v32 = vpack.c.bf16 %v8467_v36, %v8466_v29  ;;  %v8520_v29 = vld [vmem:[%s14346_s5 + $0x770] sm:$0xff]  ;;  %v8521_v36 = vld [vmem:[%s14346_s5 + $0x778] sm:$0xff] }
0x10e9   :  { %11413 = vmatprep.subr.bf16.mxu1 %v11412_v61  ;;  %v6327_v10 = vpop.f32.mrb[63].mxu1 }
0x10ea   :  { %10401 = vmatprep.mubr.msk.f32.mxu1 %vm1978_vm5, %v6327_v10  ;;  %v8488_v10 = vld [vmem:[%s14346_s5 + $0x6f0] sm:$0xff] }
0x10eb   :  { %10402 = vmatmul.mubr.msk.f32.gmra.mrb[58].mxu1 %vm1978_vm5, %v10381_v53  ;;  %v8487_v53 = vld [vmem:[%s14346_s5 + $0x6e8] sm:$0xff] }
0x10ec   :  { %11415 = vmatpush3.bf16.msra.mxu1 %v11412_v61  ;;  %10434 = vmatprep.mubr.msk.f32.mxu1 %vm1978_vm5, %v6512_v6 }
0x10ed   :  { %11417 = vmatprep.subr.bf16.mxu1 %v11416_v22 }
0x10f0   :  { %11419 = vmatpush3.bf16.msra.mxu1 %v11416_v22  ;;  %v11480_v22 = vpack.c.bf16 %v8487_v53, %v8486_v11  ;;  %v8545_v11 = vld [vmem:[%s14347_s6 + $0xf8] sm:$0xff] }
0x10f1   :  { %11421 = vmatprep.subr.bf16.mxu1 %v11420_v0 }
0x10f4   :  { %11423 = vmatpush3.bf16.msra.mxu1 %v11420_v0 }
0x10f5   :  { %11425 = vmatprep.subr.bf16.mxu1 %v11424_v41 }
0x10f7   :  { %10435 = vmatmul.mubr.msk.f32.vlgmr.msra.gmra.mrb[56].mxu1 %vm1978_vm5, %v10414_v62  ;;  %v8468_v62 = vld [vmem:[%s14346_s5 + $0x690] sm:$0xff] }
0x10f8   :  { %11427 = vmatpush3.bf16.msra.mxu1 %v11424_v41  ;;  %10437 = vmatprep.mubr.msk.f32.mxu1 %vm1978_vm5, %v6522_v43  ;;  %v8471_v43 = vld [vmem:[%s14346_s5 + $0x6a8] sm:$0xff] }
0x10f9   :  { %11429 = vmatprep.subr.bf16.mxu1 %v11428_v1  ;;  %v8503_v41 = vld [vmem:[%s14346_s5 + $0x728] sm:$0xff] }
0x10fa   :  { %v11504_v14 = vpack.c.bf16 %v8503_v41, %v8502_v63 }
0x10fb   :  { %10438 = vmatmul.mubr.msk.f32.gmra.mrb[58].mxu1 %vm1978_vm5, %v10417_v7  ;;  %v8470_v7 = vld [vmem:[%s14346_s5 + $0x6a0] sm:$0xff] }
0x10fc   :  { %11431 = vmatpush3.bf16.msra.mxu1 %v11428_v1  ;;  %10456 = vmatprep.mubr.msk.f32.mxu1 %vm1978_vm5, %v13750_v42  ;;  %v8469_v42 = vld [vmem:[%s14346_s5 + $0x698] sm:$0xff]  ;;  %v11456_v35 = vpack.c.bf16 %v8471_v43, %v8470_v7 }
0x10fd   :  { %11433 = vmatprep.subr.bf16.mxu1 %v11432_v33  ;;  %v11452_v6 = vpack.c.bf16 %v8469_v42, %v8468_v62  ;;  %v8505_v1 = vld [vmem:[%s14346_s5 + $0x738] sm:$0xff]  ;;  %v8535_v62 = vld [vmem:[%s14347_s6 + $0xa8] sm:$0xff] }
0x10fe   :  { %v8537_v7 = vld [vmem:[%s14347_s6 + $0xb8] sm:$0xff] }
0x1100   :  { %11435 = vmatpush3.bf16.msra.mxu1 %v11432_v33 }
0x1101   :  { %11437 = vmatprep.subr.bf16.mxu1 %v11436_v26 }
0x1104   :  { %11439 = vmatpush3.bf16.msra.mxu1 %v11436_v26  ;;  %v11528_v26 = vpack.c.bf16 %v8519_v60, %v8518_v51 }
0x1105   :  { %11449 = vmatprep.subr.bf16.mxu1 %v11448_v32 }
0x1107   :  { %10457 = vmatmul.mubr.msk.f32.vlgmr.msra.gmra.mrb[56].mxu1 %vm1978_vm5, %v13748_v25  ;;  %v11460_v25 = vpack.c.bf16 %v8473_v12, %v8472_v49  ;;  %v8539_v49 = vld [vmem:[%s14347_s6 + $0xc8] sm:$0xff] }
0x1108   :  { %10459 = vmatprep.mubr.msk.f32.mxu1 %vm1978_vm5, %v13758_v9  ;;  %11451 = vmatpush3.bf16.msra.mxu1 %v11448_v32  ;;  %v8482_v9 = vld [vmem:[%s14346_s5 + $0x6c0] sm:$0xff] }
0x1109   :  { %11453 = vmatprep.subr.bf16.mxu1 %v11452_v6  ;;  %v11472_v61 = vpack.c.bf16 %v8483_v4, %v8482_v9  ;;  %v8534_v32 = vld [vmem:[%s14347_s6 + $0xa0] sm:$0xff]  ;;  %v8541_v9 = vld [vmem:[%s14347_s6 + $0xd8] sm:$0xff] }
0x110a   :  { %v11544_v42 = vpack.c.bf16 %v8535_v62, %v8534_v32 }
0x110b   :  { %10460 = vmatmul.mubr.msk.f32.gmra.mrb[58].mxu1 %vm1978_vm5, %v13756_v17  ;;  %v8484_v17 = vld [vmem:[%s14346_s5 + $0x6d0] sm:$0xff] }
0x110c   :  { %11455 = vmatpush3.bf16.msra.mxu1 %v11452_v6  ;;  %10492 = vmatprep.mubr.msk.f32.mxu1 %vm1978_vm5, %v13976_v18  ;;  %v8485_v18 = vld [vmem:[%s14346_s5 + $0x6d8] sm:$0xff]  ;;  %v8536_v6 = vld [vmem:[%s14347_s6 + $0xb0] sm:$0xff] }
0x110d   :  { %11457 = vmatprep.subr.bf16.mxu1 %v11456_v35  ;;  %v11476_v40 = vpack.c.bf16 %v8485_v18, %v8484_v17  ;;  %v11548_v43 = vpack.c.bf16 %v8537_v7, %v8536_v6  ;;  %v8543_v17 = vld [vmem:[%s14347_s6 + $0xe8] sm:$0xff] }
0x1110   :  { %11459 = vmatpush3.bf16.msra.mxu1 %v11456_v35  ;;  %v8538_v35 = vld [vmem:[%s14347_s6 + $0xc0] sm:$0xff] }
0x1111   :  { %11461 = vmatprep.subr.bf16.mxu1 %v11460_v25  ;;  %v11552_v12 = vpack.c.bf16 %v8539_v49, %v8538_v35 }
0x1114   :  { %11463 = vmatpush3.bf16.msra.mxu1 %v11460_v25  ;;  %v8540_v25 = vld [vmem:[%s14347_s6 + $0xd0] sm:$0xff] }
0x1115   :  { %11473 = vmatprep.subr.bf16.mxu1 %v11472_v61  ;;  %v11556_v4 = vpack.c.bf16 %v8541_v9, %v8540_v25 }
0x1117   :  { %10493 = vmatmul.mubr.msk.f32.vlgmr.msra.gmra.mrb[56].mxu1 %vm1978_vm5, %v13974_v50  ;;  %v11484_v50 = vpack.c.bf16 %v8489_v52, %v8488_v10 }
0x1118   :  { %11475 = vmatpush3.bf16.msra.mxu1 %v11472_v61  ;;  %10495 = vmatprep.mubr.msk.f32.mxu1 %vm1978_vm5, %v13980_v8  ;;  %v8498_v8 = vld [vmem:[%s14346_s5 + $0x700] sm:$0xff] }
0x1119   :  { %11477 = vmatprep.subr.bf16.mxu1 %v11476_v40  ;;  %v11496_v0 = vpack.c.bf16 %v8499_v21, %v8498_v8  ;;  %v8542_v61 = vld [vmem:[%s14347_s6 + $0xe0] sm:$0xff] }
0x111a   :  { %v11560_v18 = vpack.c.bf16 %v8543_v17, %v8542_v61 }
0x111b   :  { %10496 = vmatmul.mubr.msk.f32.gmra.mrb[58].mxu1 %vm1978_vm5, %v13978_v2  ;;  %v8500_v2 = vld [vmem:[%s14346_s5 + $0x710] sm:$0xff] }
0x111c   :  { %11479 = vmatpush3.bf16.msra.mxu1 %v11476_v40  ;;  %10528 = vmatprep.mubr.msk.f32.mxu1 %vm1978_vm5, %v13984_v46  ;;  %v8501_v46 = vld [vmem:[%s14346_s5 + $0x718] sm:$0xff]  ;;  %v8544_v40 = vld [vmem:[%s14347_s6 + $0xf0] sm:$0xff] }
0x111d   :  { %11481 = vmatprep.subr.bf16.mxu1 %v11480_v22  ;;  %v11500_v54 = vpack.c.bf16 %v8501_v46, %v8500_v2  ;;  %v11564_v53 = vpack.c.bf16 %v8545_v11, %v8544_v40 }
0x1120   :  { %11483 = vmatpush3.bf16.msra.mxu1 %v11480_v22  ;;  %v7534_v22 = vrot.slane %v13718_v15, %v1851_v58 }
0x1121   :  { %11485 = vmatprep.subr.bf16.mxu1 %v11484_v50 }
0x1124   :  { %11487 = vmatpush3.bf16.msra.mxu1 %v11484_v50 }
0x1125   :  { %11497 = vmatprep.subr.bf16.mxu1 %v11496_v0 }
0x1127   :  { %10529 = vmatmul.mubr.msk.f32.vlgmr.msra.gmra.mrb[56].mxu1 %vm1978_vm5, %v13982_v30  ;;  %v11508_v30 = vpack.c.bf16 %v8505_v1, %v8504_v13 }
0x1128   :  { %11499 = vmatpush3.bf16.msra.mxu1 %v11496_v0  ;;  %10531 = vmatprep.mubr.msk.f32.mxu1 %vm1978_vm5, %v13988_v44  ;;  %v8514_v44 = vld [vmem:[%s14346_s5 + $0x740] sm:$0xff] }
0x1129   :  { %11501 = vmatprep.subr.bf16.mxu1 %v11500_v54  ;;  %v11520_v59 = vpack.c.bf16 %v8515_v19, %v8514_v44 }
0x112b   :  { %10532 = vmatmul.mubr.msk.f32.gmra.mrb[58].mxu1 %vm1978_vm5, %v13986_v3  ;;  %v8516_v3 = vld [vmem:[%s14346_s5 + $0x750] sm:$0xff] }
0x112c   :  { %11503 = vmatpush3.bf16.msra.mxu1 %v11500_v54  ;;  %10564 = vmatprep.mubr.msk.f32.mxu1 %vm1978_vm5, %v13992_v24  ;;  %v8517_v24 = vld [vmem:[%s14346_s5 + $0x758] sm:$0xff] }
0x112d   :  { %11505 = vmatprep.subr.bf16.mxu1 %v11504_v14  ;;  %v11524_v33 = vpack.c.bf16 %v8517_v24, %v8516_v3 }
0x1130   :  { %11507 = vmatpush3.bf16.msra.mxu1 %v11504_v14 }
0x1131   :  { %11509 = vmatprep.subr.bf16.mxu1 %v11508_v30 }
0x1134   :  { %11511 = vmatpush3.bf16.msra.mxu1 %v11508_v30 }
0x1135   :  { %11521 = vmatprep.subr.bf16.mxu1 %v11520_v59 }
0x1137   :  { %10565 = vmatmul.mubr.msk.f32.vlgmr.msra.gmra.mrb[56].mxu1 %vm1978_vm5, %v13990_v56  ;;  %v11532_v56 = vpack.c.bf16 %v8521_v36, %v8520_v29 }
0x1138   :  { %11523 = vmatpush3.bf16.msra.mxu1 %v11520_v59  ;;  %10567 = vmatprep.mubr.msk.f32.mxu1 %vm1978_vm5, %v13996_v57  ;;  %v8531_v57 = vld [vmem:[%s14347_s6 + $0x88] sm:$0xff] }
0x1139   :  { %11525 = vmatprep.subr.bf16.mxu1 %v11524_v33 }
0x113b   :  { %10568 = vmatmul.mubr.msk.f32.gmra.mrb[58].mxu1 %vm1978_vm5, %v13994_v28  ;;  %v8530_v28 = vld [vmem:[%s14347_s6 + $0x80] sm:$0xff] }
0x113c   :  { %11527 = vmatpush3.bf16.msra.mxu1 %v11524_v33  ;;  %10600 = vmatprep.mubr.msk.f32.mxu1 %vm1978_vm5, %v14000_v47  ;;  %v11536_v47 = vpack.c.bf16 %v8531_v57, %v8530_v28 }
0x113d   :  { %11529 = vmatprep.subr.bf16.mxu1 %v11528_v26 }
0x113e   :  { %11537 = vmatprep.subr.bf16.mxu0 %v11536_v47 }
0x113f   :  { %11539 = vmatpush3.bf16.msra.mxu0 %v11536_v47 }
0x1140   :  { %11531 = vmatpush3.bf16.msra.mxu1 %v11528_v26 }
0x1141   :  { %11533 = vmatprep.subr.bf16.mxu1 %v11532_v56 }
0x1144   :  { %11535 = vmatpush3.bf16.msra.mxu1 %v11532_v56 }
0x1147   :  { %10601 = vmatmul.mubr.msk.f32.vlgmr.msra.gmra.mrb[56].mxu1 %vm1978_vm5, %v13998_v16  ;;  %v8532_v16 = vld [vmem:[%s14347_s6 + $0x90] sm:$0xff] }
0x1148   :  { %10603 = vmatprep.mubr.msk.f32.mxu1 %vm1978_vm5, %v14004_v27  ;;  %v8533_v27 = vld [vmem:[%s14347_s6 + $0x98] sm:$0xff] }
0x114b   :  { %10604 = vmatmul.mubr.msk.f32.gmra.mrb[58].mxu1 %vm1978_vm5, %v14002_v34  ;;  %v11540_v34 = vpack.c.bf16 %v8533_v27, %v8532_v16 }
0x114d   :  { %11541 = vmatprep.subr.bf16.mxu0 %v11540_v34 }
0x114e   :  { %11543 = vmatpush3.bf16.msra.mxu0 %v11540_v34  ;;  %v12004_v34 = vmov 0.0|0.0  }
0x114f   :  { %11545 = vmatprep.subr.bf16.mxu0 %v11544_v42 }
0x1152   :  { %11547 = vmatpush3.bf16.msra.mxu0 %v11544_v42 }
0x1153   :  { %11549 = vmatprep.subr.bf16.mxu0 %v11548_v43 }
0x1156   :  { %11551 = vmatpush3.bf16.msra.mxu0 %v11548_v43 }
0x1157   :  { %11553 = vmatprep.subr.bf16.mxu0 %v11552_v12 }
0x115a   :  { %11555 = vmatpush3.bf16.msra.mxu0 %v11552_v12 }
0x115b   :  { %11557 = vmatprep.subr.bf16.mxu0 %v11556_v4 }
0x115e   :  { %11559 = vmatpush3.bf16.msra.mxu0 %v11556_v4 }
0x115f   :  { %11561 = vmatprep.subr.bf16.mxu0 %v11560_v18 }
0x1162   :  { %11563 = vmatpush3.bf16.msra.mxu0 %v11560_v18 }
0x1163   :  { %11565 = vmatprep.subr.bf16.mxu0 %v11564_v53 }
0x1166   :  { %11567 = vmatpush3.bf16.msra.mxu0 %v11564_v53 }
0x1167   :  { %11568 = vmatprep.subr.bf16.mxu0 %v12004_v34 }
0x121a   :  { %v10602_v10 = vpop.f32.mrb[56].mxu1 }
0x121b   :  { %v7536_v52 = vadd.f32 %v10602_v10, %v7534_v22  ;;  %v7508_v50 = vpop.f32.mrb[57].mxu1 }
0x121c   :  { %v7535_v8 = vadd.f32 %v7534_v22, %v7508_v50 }
0x121d   :  { %v8527_v21 = vmul.f32 -1.442695, %v7536_v52 }
0x121e   :  { %v8526_v0 = vmul.f32 -1.442695, %v7535_v8  ;;  %v10605_v2 = vpop.f32.mrb[58].mxu1 }
0x121f   :  { %11907 = vpow2.f32 %v8527_v21  ;;  %v7538_v46 = vadd.f32 %v10605_v2, %v7534_v22  ;;  %v7518_v54 = vpop.f32.mrb[59].mxu1 }
0x1220   :  { %11909 = vpow2.f32 %v8526_v0  ;;  %v7537_v63 = vadd.f32 %v7534_v22, %v7518_v54  ;;  %v8551_v54 = vld [vmem:[%s14347_s6 + $0x100] sm:$0xff] }
0x1221   :  { %v8529_v41 = vmul.f32 -1.442695, %v7538_v46 }
0x1222   :  { %v8528_v14 = vmul.f32 -1.442695, %v7537_v63 }
0x1223   :  { %11911 = vpow2.f32 %v8529_v41 }
0x1224   :  { %11913 = vpow2.f32 %v8528_v14  ;;  %v7709_v14 = vld [vmem:[%s14343_s2] sm:$0x3] }
0x1229   :  { %v11908_v13 = vpop.eup %11907 }
0x122a   :  { %v11910_v1 = vpop.eup %11909  ;;  %v7552_v30 = vadd.f32 1.0, %v11908_v13 }
0x122b   :  { %v7551_v58 = vadd.f32 1.0, %v11910_v1  ;;  %v8553_v1 = vld [vmem:[%s14347_s6 + $0x110] sm:$0xff] }
0x122c   :  { %11915 = vrcp.f32 %v7552_v30  ;;  %v8554_v30 = vld [vmem:[%s14347_s6 + $0x118] sm:$0xff] }
0x122d   :  { %v11912_v15 = vpop.eup %11911  ;;  %11917 = vrcp.f32 %v7551_v58  ;;  %v11578_v58 = vpack.c.bf16 %v8554_v30, %v8553_v1 }
0x122e   :  { %v11914_v44 = vpop.eup %11913  ;;  %v7554_v19 = vadd.f32 1.0, %v11912_v15  ;;  %v8555_v15 = vld [vmem:[%s14347_s6 + $0x120] sm:$0xff] }
0x122f   :  { %v7553_v59 = vadd.f32 1.0, %v11914_v44  ;;  %v8556_v44 = vld [vmem:[%s14347_s6 + $0x128] sm:$0xff] }
0x1230   :  { %11919 = vrcp.f32 %v7554_v19  ;;  %v11581_v19 = vpack.c.bf16 %v8556_v44, %v8555_v15 }
0x1231   :  { %11921 = vrcp.f32 %v7553_v59  ;;  %v8557_v59 = vld [vmem:[%s14347_s6 + $0x130] sm:$0xff] }
0x1236   :  { %v11916_v3 = vpop.eup %11915 }
0x1237   :  { %v11918_v24 = vpop.eup %11917  ;;  %v7564_v33 = vmul.f32 %v11916_v3, %v7536_v52  ;;  %v8558_v3 = vld [vmem:[%s14347_s6 + $0x138] sm:$0xff] }
0x1238   :  { %v7563_v51 = vmul.f32 %v11918_v24, %v7535_v8  ;;  %v11584_v24 = vpack.c.bf16 %v8558_v3, %v8557_v59 }
0x1239   :  { %v7568_v60 = vadd.f32 %v7564_v33, %v13727_v37  ;;  %v8559_v33 = vld [vmem:[%s14347_s6 + $0x140] sm:$0xff] }
0x123a   :  { %v11920_v26 = vpop.eup %11919  ;;  %v7567_v29 = vadd.f32 %v7563_v51, %v13724_v55  ;;  %v8560_v51 = vld [vmem:[%s14347_s6 + $0x148] sm:$0xff] }
0x123b   :  { %v11922_v36 = vpop.eup %11921  ;;  %v7566_v56 = vmul.f32 %v11920_v26, %v7538_v46  ;;  %v7572_v16 = vsel %vm1978_vm5, %v7568_v60, %v12623_v23  ;;  %v7594_v23 = vsub.s32 3, %v12167_v39  ;;  %v11587_v60 = vpack.c.bf16 %v8560_v51, %v8559_v33  ;;  %v8561_v26 = vld [vmem:[%s14347_s6 + $0x150] sm:$0xff] }
0x123c   :  { %v7565_v28 = vmul.f32 %v11922_v36, %v7537_v63  ;;  %v7571_v57 = vsel %vm1978_vm5, %v7567_v29, %v12621_v5  ;;  %v12006_v5 = vmov 0.0   ;;  %v8552_v63 = vld [vmem:[%s14347_s6 + $0x108] sm:$0xff]  ;;  %v8562_v29 = vld [vmem:[%s14347_s6 + $0x158] sm:$0xff] }
0x123d   :  { %v7570_v47 = vadd.f32 %v7566_v56, %v13737_v31  ;;  %10638 = vmatprep.mubr.f32.mxu0 %v7571_v57  ;;  %v11575_v13 = vpack.c.bf16 %v8552_v63, %v8551_v54  ;;  %v11590_v36 = vpack.c.bf16 %v8562_v29, %v8561_v26  ;;  %v8563_v56 = vld [vmem:[%s14347_s6 + $0x160] sm:$0xff] }
0x123e   :  { %v7569_v27 = vadd.f32 %v7565_v28, %v13734_v48  ;;  %10639 = vmatmul.mubr.f32.vlgmr.msra.gmra.mrb[100].mxu0 %v7572_v16  ;;  %v14261_v48 = vld [vmem:[%s14348_s7] sm:$0xff]  ;;  %v8564_v28 = vld [vmem:[%s14347_s6 + $0x168] sm:$0xff]  ;;  %v8566_v16 = vld [vmem:[%s14347_s6 + $0x178] sm:$0xff] }
0x123f   :  { %v7574_v55 = vsel %vm1978_vm5, %v7570_v47, %v12631_v20  ;;  %v11593_v57 = vpack.c.bf16 %v8564_v28, %v8563_v56  ;;  %v8565_v47 = vld [vmem:[%s14347_s6 + $0x170] sm:$0xff]  ;;  %s12007_s6 = smov [#allocation2]  }
0x1240   :  { %v7573_v37 = vsel %vm1978_vm5, %v7569_v27, %v12629_v45  ;;  %v7595_v45 = vrot.slane %v14261_v48, %v7594_v23  ;;  %v11596_v27 = vpack.c.bf16 %v8566_v16, %v8565_v47  ;;  %s7893_s20 = sshll.u32 %s12007_s6, 4  ;;  %s7894_s20 = int_to_ptr.vmem [resolvable:$true] %s7893_s20 }
0x1241   :  { %10641 = vmatprep.mubr.f32.mxu0 %v7573_v37  ;;  %s11979_s4 = scalar_lea.vmem %s7894_s20, 32  ;;  %p11984_p1 = scmp.lt.s32.totalorder %s7894_s20, %s7894_s20 }
0x1242   :  { %10642 = vmatmul.mubr.f32.gmra.mrb[102].mxu0 %v7574_v55  ;;  %p11980_p0 = scmp.ne.s32.totalorder %s7894_s20, %s11979_s4  ;;  %p11985_p2 = scmp.lt.s32.totalorder %s11979_s4, %s11979_s4 }
0x1243   :  { %10652 = vmatprep.mubr.msk.f32.mxu0 %vm12005_vm6, %v12006_v5 }
0x1244   :  { %p11986_p3 = por %p11985_p2, %p11984_p1 }
0x1246   :  { %p11987_p4 = pnand %p11986_p3, %p11980_p0 }
0x1311   :  { %v10640_v31 = vpop.f32.mrb[100].mxu0 }
0x1312   :  { %v7668_v32 = vadd.f32 %v10640_v31, %v7595_v45  ;;  %v7662_v20 = vpop.f32.mrb[101].mxu0 }
0x1313   :  { %v7663_v62 = vadd.f32 %v7662_v20, %v7595_v45 }
0x1314   :  { %v8547_v42 = vmul.f32 -1.442695, %v7668_v32 }
0x1315   :  { %v8546_v6 = vmul.f32 -1.442695, %v7663_v62  ;;  %v10643_v7 = vpop.f32.mrb[102].mxu0 }
0x1316   :  { %11923 = vpow2.f32 %v8547_v42  ;;  %v7678_v43 = vadd.f32 %v10643_v7, %v7595_v45  ;;  %v7672_v35 = vpop.f32.mrb[103].mxu0 }
0x1317   :  { %11925 = vpow2.f32 %v8546_v6  ;;  %v7673_v49 = vadd.f32 %v7672_v35, %v7595_v45  ;;  %v7875_v6 = vand.u32 127, %v62_v38 }
0x1318   :  { %v8549_v12 = vmul.f32 -1.442695, %v7678_v43 }
0x1319   :  { %v8548_v25 = vmul.f32 -1.442695, %v7673_v49  ;;  %vm7876_vm7 = vcmp.lt.s32.totalorder %v7875_v6, 4 }
0x131a   :  { %11927 = vpow2.f32 %v8549_v12 }
0x131b   :  { %11929 = vpow2.f32 %v8548_v25 }
0x1320   :  { %v11924_v9 = vpop.eup %11923 }
0x1321   :  { %v11926_v4 = vpop.eup %11925  ;;  %v7694_v61 = vadd.f32 1.0, %v11924_v9 }
0x1322   :  { %v7693_v17 = vadd.f32 1.0, %v11926_v4 }
0x1323   :  { %11931 = vrcp.f32 %v7694_v61 }
0x1324   :  { %v11928_v18 = vpop.eup %11927  ;;  %11933 = vrcp.f32 %v7693_v17 }
0x1325   :  { %v11930_v40 = vpop.eup %11929  ;;  %v7696_v11 = vadd.f32 1.0, %v11928_v18 }
0x1326   :  { %v7695_v53 = vadd.f32 1.0, %v11930_v40 }
0x1327   :  { %11935 = vrcp.f32 %v7696_v11 }
0x1328   :  { %11937 = vrcp.f32 %v7695_v53 }
0x132d   :  { %v11932_v22 = vpop.eup %11931 }
0x132e   :  { %v11934_v10 = vpop.eup %11933  ;;  %v7706_v52 = vmul.f32 %v11932_v22, %v7668_v32 }
0x132f   :  { %v7705_v50 = vmul.f32 %v11934_v10, %v7663_v62 }
0x1331   :  { %v11936_v8 = vpop.eup %11935  ;;  %v11569_v21 = vpack.c.bf16 %v7706_v52, %v7705_v50 }
0x1332   :  { %v11938_v0 = vpop.eup %11937  ;;  %v7708_v2 = vmul.f32 %v11936_v8, %v7678_v43 }
0x1333   :  { %v7707_v46 = vmul.f32 %v11938_v0, %v7673_v49  ;;  %11570 = vmatpush3.bf16.msra.mxu0 %v11569_v21 }
0x1334   :  { %11571 = vmatprep.subr.bf16.mxu0 %v12004_v34 }
0x1335   :  { %v11572_v41 = vpack.c.bf16 %v7708_v2, %v7707_v46 }
0x1337   :  { %11573 = vmatpush3.bf16.msra.mxu0 %v11572_v41 }
0x1338   :  { %11574 = vmatprep.subr.bf16.mxu0 %v12004_v34 }
0x133a   :  { %10653 = vmatmul.mubr.msk.f32.vlgmr.msra.gmra.mrb[104].mxu0 %vm380_vm4, %v7709_v14 }
0x133b   :  { %11576 = vmatpush3.bf16.msra.mxu0 %v11575_v13  ;;  %10687 = vmatprep.mubr.msk.f32.mxu0 %vm12005_vm6, %v12006_v5  ;;  %v7802_v5 = vsub.s32 4, %v12167_v39 }
0x133c   :  { %11577 = vmatprep.subr.bf16.mxu0 %v12004_v34 }
0x133d   :  { %v7803_v23 = vrot.slane %v14261_v48, %v7802_v5 }
0x133f   :  { %11579 = vmatpush3.bf16.msra.mxu0 %v11578_v58 }
0x1340   :  { %11580 = vmatprep.subr.bf16.mxu0 %v12004_v34 }
0x1343   :  { %11582 = vmatpush3.bf16.msra.mxu0 %v11581_v19 }
0x1344   :  { %11583 = vmatprep.subr.bf16.mxu0 %v12004_v34 }
0x1347   :  { %11585 = vmatpush3.bf16.msra.mxu0 %v11584_v24 }
0x1348   :  { %11586 = vmatprep.subr.bf16.mxu0 %v12004_v34 }
0x134b   :  { %11588 = vmatpush3.bf16.msra.mxu0 %v11587_v60 }
0x134c   :  { %11589 = vmatprep.subr.bf16.mxu0 %v12004_v34 }
0x134f   :  { %11591 = vmatpush3.bf16.msra.mxu0 %v11590_v36 }
0x1350   :  { %11592 = vmatprep.subr.bf16.mxu0 %v12004_v34 }
0x1353   :  { %11594 = vmatpush3.bf16.msra.mxu0 %v11593_v57 }
0x1354   :  { %11595 = vmatprep.subr.bf16.mxu0 %v12004_v34 }
0x1357   :  { %11597 = vmatpush3.bf16.msra.mxu0 %v11596_v27 }
0x140d   :  { %v7779_v37 = vpop.f32.mrb[104].mxu0 }
0x140e   :  { %v10654_v55 = vpop.f32.mrb[105].mxu0  ;;  %10688 = vmatmul.mubr.f32.vlgmr.msra.gmra.mrb[106].mxu0 %v7779_v37 }
0x14e1   :  { %v7870_v45 = vpop.f32.mrb[106].mxu0 }
0x14e2   :  { %v7871_v31 = vadd.f32 %v7870_v45, %v7803_v23  ;;  %v10689_v32 = vpop.f32.mrb[107].mxu0 }
0x14e4   :  { %v8567_v20 = vmul.f32 -1.442695, %v7871_v31 }
0x14e6   :  { %11939 = vpow2.f32 %v8567_v20 }
0x14e7   :  { %11941 = vtanh.f32 %v7871_v31 }
0x14f0   :  { %v11940_v62 = vpop.eup %11939 }
0x14f1   :  { %v7880_v42 = vadd.f32 1.0, %v11940_v62  ;;  %v11942_v34 = vpop.eup %11941 }
0x14f3   :  { %11943 = vrcp.f32 %v7880_v42 }
0x14fd   :  { %v11944_v7 = vpop.eup %11943 }
0x14fe   :  { %v7884_v39 = vsel %vm7876_vm7, %v11944_v7, %v11942_v34 }
0x14ff   :  { %7886 = vst.msk [vmem:[#allocation2] sm:$0x3] %vm7885_vm8, %v7884_v39 }
0x1500   :  { %11990 = shalt.err (!%p11987_p4)
}
0x1501   :  { %s11991_s0 = scalar_lea.hbm %s14349_s8, 32 }
0x1502   :  { %p11992_p5 = scmp.ne.s32.totalorder %s14349_s8, %s11991_s0  ;;  %p11995_p6 = scmp.lt.u32.totalorder %s11991_s0, %s14349_s8 }
0x1504   :  { %p11997_p7 = pnand %p11995_p6, %p11992_p5 }
0x1506   :  { %12000 = shalt.err (!%p11997_p7)
}
0x1507   :  { %7896 = dma.vmem_to_hbm [thread:$0]  %s7894_s20, 32, %s14349_s8, [#allocation3]  }
0x1508   :  { %12001 = dma.done.wait [#allocation3], 32  }
0x1509   :  { %12002 = vsyncadd [#allocation3], 4294967264 }
0x150a   :  { %7900 = vsyncpa [#allocation3], 1 }

</bundles_post_ra>
